<compile_context>
chip_gen: v7x
topology: tpu7x:2x2x1
jax: 0.10.0
libtpu: 0.0.40
codegen_flags: <defaults>
</compile_context>

<pallas_src>
import functools

import jax
import jax.numpy as jnp
from jax import lax
from jax.experimental import pallas as pl
from jax.experimental.pallas import tpu as pltpu


def _round_up(x, m):
    return (x + m - 1) // m * m


# ------------------------- fused Pallas kernel -------------------------

def rpn_fused_kernel(xcol_ref, wp_ref, bp_ref, wh_ref, bh_ref, out_ref, *,
                     NC, NA, C_heads):
    """Fused prop_feats conv (im2col) + ReLU + all 1x1 heads + class softmax.

    xcol_ref : (1, TM, Kp)   bf16 im2col patches (Kp = pad(9*Cin, 128))
    wp_ref   : (Kp, Cp)      bf16 conv weights, im2col layout
    bp_ref   : (1, Cp)       f32 conv bias
    wh_ref   : (Cp, Chp)     bf16 stacked 1x1 head weights (Chp = pad(C_heads + NC*NA, 128))
    bh_ref   : (1, Chp)      f32 stacked head bias (zero in pad columns)
    out_ref  : (1, TM, Chp)  f32 lane-dense slab:
                             [0:C_heads]               raw head outputs (cls | 14 bbox heads)
                             [C_heads:C_heads+NC*NA]   class softmax probabilities
                             [C_heads+NC*NA:Chp]       zero pad
    """
    # prop_feats: single im2col matmul (bf16 operands, f32 MXU accumulation) + ReLU
    prop = jnp.dot(xcol_ref[0], wp_ref[...],
                   preferred_element_type=jnp.float32) + bp_ref[...]
    prop = jnp.maximum(prop, 0.0)

    # all fifteen 1x1-conv heads fused into one lane-dense matmul
    wh = wh_ref[...]
    heads = jnp.dot(prop.astype(wh.dtype), wh,
                    preferred_element_type=jnp.float32) + bh_ref[...]

    # Softmax over classes: cls channel layout is class*NA + anchor; the PyTorch
    # view(B, NC, H*NA, W) + Softmax(dim=1) reduces over classes per (anchor, pos).
    NCNA = NC * NA
    cls = heads[:, :NCNA]
    m = cls[:, :NA]
    for c in range(1, NC):
        m = jnp.maximum(m, cls[:, c * NA:(c + 1) * NA])
    e = jnp.exp(cls - jnp.concatenate([m] * NC, axis=-1))     # one exp on whole block
    s = e[:, :NA]
    for c in range(1, NC):
        s = s + e[:, c * NA:(c + 1) * NA]
    prob = e * pl.reciprocal(jnp.concatenate([s] * NC, axis=-1), approx=True)

    # Pack probabilities into the pad columns -> single lane-dense store, no 32-lane
    # masked partial stores and no second output DMA stream.
    Chp = heads.shape[-1]
    pieces = [heads[:, :C_heads], prob]
    if C_heads + NCNA < Chp:
        pieces.append(heads[:, C_heads + NCNA:])
    out_ref[...] = jnp.concatenate(pieces, axis=-1)[None]


# ------------------------- wrappers -------------------------

def init_params(key, Cin, Cp, NC, NA):
    C_heads = NC * NA + 14 * NA
    ks = jax.random.split(key, 4)
    w_prop = jax.random.normal(ks[0], (3, 3, Cin, Cp), jnp.float32) * 0.05
    b_prop = jax.random.normal(ks[1], (Cp,), jnp.float32) * 0.05
    w_heads = jax.random.normal(ks[2], (Cp, C_heads), jnp.float32) * 0.05
    b_heads = jax.random.normal(ks[3], (C_heads,), jnp.float32) * 0.05
    return w_prop, b_prop, w_heads, b_heads


def rpn_forward(x_nchw, params, NC, NA, *, tm=512, mxu_dtype=jnp.bfloat16,
                single_buffer_weights=False,
                vmem_limit_bytes=64 * 1024 * 1024):
    """Runs the fused Pallas hot path; returns (heads, prob) as (B, H*W, C) slabs.

    v7x note: pass tm=256 and single_buffer_weights=True (64 MiB physical VMEM);
    v6e/v5e can run tm=512-1024 with the raised vmem_limit_bytes.
    """
    w_prop, b_prop, w_heads, b_heads = params
    B, Cin, H, W = x_nchw.shape
    Cp = w_prop.shape[-1]
    C_heads = w_heads.shape[-1]              # NC*NA + 14*NA
    NCNA = NC * NA

    HW = H * W
    TM = min(tm, _round_up(HW, 16))          # spatial tile rows; 16-multiple (bf16 sublane pack)
    HWp = _round_up(HW, TM)
    K = 9 * Cin
    Kp = _round_up(K, 128)                   # lane/MXU-aligned contraction dim
    Chp = _round_up(C_heads + NCNA, 128)     # lane-dense output: heads + packed softmax

    # --- wrapper-side im2col packing (folds NHWC transpose + pad=1 halo) ---
    x_nhwc = jnp.transpose(x_nchw, (0, 2, 3, 1))
    xp = jnp.pad(x_nhwc, ((0, 0), (1, 1), (1, 1), (0, 0)))
    taps = [xp[:, dy:dy + H, dx:dx + W, :] for dy in range(3) for dx in range(3)]
    xcol = jnp.concatenate(taps, axis=-1).reshape(B, HW, K)
    xcol = jnp.pad(xcol, ((0, 0), (0, HWp - HW), (0, Kp - K))).astype(mxu_dtype)

    w_col = jnp.pad(w_prop.reshape(K, Cp), ((0, Kp - K), (0, 0))).astype(mxu_dtype)
    wh = jnp.pad(w_heads, ((0, 0), (0, Chp - C_heads))).astype(mxu_dtype)
    bp = b_prop.reshape(1, Cp).astype(jnp.float32)
    bh = jnp.pad(b_heads, (0, Chp - C_heads)).reshape(1, Chp).astype(jnp.float32)

    def const_spec(shape):
        # Constant block index -> weights DMA'd once, not per grid step.
        if single_buffer_weights:   # v7x: keep the weight slab single-buffered in VMEM
            return pl.BlockSpec(shape, lambda *_: (0,) * len(shape),
                                pipeline_mode=pl.Buffered(1))
        return pl.BlockSpec(shape, lambda *_: (0,) * len(shape))

    flops = 2 * B * HWp * (Kp * Cp + Cp * Chp)
    transcendentals = 2 * B * HWp * NCNA                       # exp + reciprocal
    bytes_accessed = (xcol.size * xcol.dtype.itemsize
                      + w_col.size * w_col.dtype.itemsize
                      + wh.size * wh.dtype.itemsize
                      + bp.size * 4 + bh.size * 4
                      + B * HWp * Chp * 4)

    fused = pl.pallas_call(
        functools.partial(rpn_fused_kernel, NC=NC, NA=NA, C_heads=C_heads),
        out_shape=jax.ShapeDtypeStruct((B, HWp, Chp), jnp.float32),
        grid_spec=pltpu.PrefetchScalarGridSpec(
            num_scalar_prefetch=0,
            grid=(B, HWp // TM),
            in_specs=[
                pl.BlockSpec((1, TM, Kp), lambda b, s: (b, s, 0)),
                const_spec((Kp, Cp)),
                const_spec((1, Cp)),
                const_spec((Cp, Chp)),
                const_spec((1, Chp)),
            ],
            out_specs=pl.BlockSpec((1, TM, Chp), lambda b, s: (b, s, 0)),
        ),
        compiler_params=pltpu.CompilerParams(
            dimension_semantics=("parallel", "parallel"),
            vmem_limit_bytes=vmem_limit_bytes),
        cost_estimate=pl.CostEstimate(
            flops=int(flops),
            transcendentals=int(transcendentals),
            bytes_accessed=int(bytes_accessed)),
    )
    out_pad = fused(xcol, w_col, bp, wh, bh)

    heads = out_pad[:, :HW, :C_heads]
    prob_flat = out_pad[:, :HW, C_heads:C_heads + NCNA]
    return heads, prob_flat


def assemble_outputs(heads, prob_flat, B, H, W, NC, NA):
    """Reproduces view(...) + softmax layout + flatten_tensor(...) exactly (glue)."""
    def cls_like(t):  # (B, H*W, NC*NA), channel = class*NA + anchor
        t = t.reshape(B, H, W, NC, NA)
        t = jnp.transpose(t, (0, 4, 1, 2, 3))          # (B, NA, H, W, NC)
        return t.reshape(B, NA * H * W, NC)            # row = (a*H + h)*W + w

    cls = cls_like(heads[..., :NC * NA])
    prob = cls_like(prob_flat)

    def bbox_head(i):
        start = NC * NA + i * NA
        t = heads[..., start:start + NA].reshape(B, H, W, NA)
        t = jnp.transpose(t, (0, 3, 1, 2))             # (B, NA, H, W)
        return t.reshape(B, NA * H * W, 1)

    bbox = [bbox_head(i) for i in range(14)]
    bbox_2d = jnp.concatenate(bbox[0:4], axis=2)       # x, y, w, h
    bbox_3d = jnp.concatenate(bbox[4:14], axis=2)      # x3d..rY3d, front_{x,y,z}3d
    return cls, prob, bbox_2d, bbox_3d, [H, W]


# ------------------------- plain-JAX reference -------------------------

def rpn_reference(x_nchw, params, NC, NA):
    """Reference with kernel-matching precision: operands rounded to bf16, dots in f32.

    (Runs on any backend; avoids BF16 x BF16 = F32 dots that CPU DotThunk rejects.)
    """
    w_prop, b_prop, w_heads, b_heads = params
    bf = lambda t: t.astype(jnp.bfloat16).astype(jnp.float32)
    B, Cin, H, W = x_nchw.shape
    out = lax.conv_general_dilated(
        bf(x_nchw), bf(w_prop),
        window_strides=(1, 1), padding=((1, 1), (1, 1)),
        dimension_numbers=("NCHW", "HWIO", "NCHW"))
    prop = jnp.maximum(out + b_prop[None, :, None, None], 0.0)
    heads_nchw = jnp.einsum("bchw,cd->bdhw", bf(prop), bf(w_heads))
    heads_nchw = heads_nchw + b_heads[None, :, None, None]
    heads = jnp.transpose(heads_nchw, (0, 2, 3, 1)).reshape(B, H * W, -1)
    cls_logits = heads[..., :NC * NA].reshape(B, H * W, NC, NA)
    prob = jax.nn.softmax(cls_logits, axis=2).reshape(B, H * W, NC * NA)
    return heads, prob


# ------------------------- main -------------------------

if __name__ == "__main__":
    # Small synthetic config: Cin stands in for base[-1].num_features,
    # NC = len(lbls) + 1 = 4, NA = conf.anchors.shape[0] = 8, prop channels 512.
    B, Cin, H, W = 2, 32, 12, 20
    NC, NA, Cp = 4, 8, 512

    key = jax.random.PRNGKey(0)
    kx, kp = jax.random.split(key)
    x = jax.random.normal(kx, (B, Cin, H, W), jnp.float32)      # backbone features
    params = init_params(kp, Cin, Cp, NC, NA)

    heads, prob_flat = rpn_forward(x, params, NC, NA)
    cls, prob, bbox_2d, bbox_3d, feat_size = assemble_outputs(
        heads, prob_flat, B, H, W, NC, NA)
    jax.block_until_ready((cls, prob, bbox_2d, bbox_3d))

    # correctness check against plain-JAX reference (same bf16-rounded operands)
    ref_heads, ref_prob = rpn_reference(x, params, NC, NA)
    assert float(jnp.max(jnp.abs(heads - ref_heads))) < 5e-3
    assert float(jnp.max(jnp.abs(prob_flat - ref_prob))) < 1e-2
    assert cls.shape == (B, NA * H * W, NC)
    assert prob.shape == (B, NA * H * W, NC)
    assert bbox_2d.shape == (B, NA * H * W, 4)
    assert bbox_3d.shape == (B, NA * H * W, 10)
    assert feat_size == [H, W]

    print("KERNEL_OK")
</pallas_src>

<mosaic_0001>
module attributes {stable_mosaic.version = 11 : i64} {
  func.func @rpn_fused_kernel(%arg0: i32, %arg1: i32, %arg2: memref<1x240x384xbf16, #tpu.memory_space<vmem>>, %arg3: memref<384x512xbf16, #tpu.memory_space<vmem>>, %arg4: memref<1x512xf32, #tpu.memory_space<vmem>>, %arg5: memref<512x256xbf16, #tpu.memory_space<vmem>>, %arg6: memref<1x256xf32, #tpu.memory_space<vmem>>, %arg7: memref<1x240x256xf32, #tpu.memory_space<vmem>>) attributes {dimension_semantics = [#tpu.dimension_semantics<parallel>, #tpu.dimension_semantics<parallel>], iteration_bounds = array<i64: 2, 1>, scalar_prefetch = 0 : i64, scratch_operands = 0 : i64, tpu.core_type = #tpu.core_type<tc>, window_params = [{transform_indices = @transform_0, window_bounds = array<i64: 1, 240, 384>}, {pipeline_mode = #tpu.pipeline_mode<synchronous>, transform_indices = @transform_1, window_bounds = array<i64: 384, 512>}, {pipeline_mode = #tpu.pipeline_mode<synchronous>, transform_indices = @transform_2, window_bounds = array<i64: 1, 512>}, {pipeline_mode = #tpu.pipeline_mode<synchronous>, transform_indices = @transform_3, window_bounds = array<i64: 512, 256>}, {pipeline_mode = #tpu.pipeline_mode<synchronous>, transform_indices = @transform_4, window_bounds = array<i64: 1, 256>}, {transform_indices = @transform_5, window_bounds = array<i64: 1, 240, 256>}]} {
    %c0 = arith.constant 0 : index
    %c0_0 = arith.constant 0 : index
    %c0_1 = arith.constant 0 : index
    %0 = vector.load %arg2[%c0, %c0_0, %c0_1] : memref<1x240x384xbf16, #tpu.memory_space<vmem>>, vector<1x240x384xbf16>
    %1 = vector.shape_cast %0 : vector<1x240x384xbf16> to vector<240x384xbf16>
    %c0_2 = arith.constant 0 : index
    %c0_3 = arith.constant 0 : index
    %2 = vector.load %arg3[%c0_2, %c0_3] : memref<384x512xbf16, #tpu.memory_space<vmem>>, vector<384x512xbf16>
    %cst = arith.constant dense<0.000000e+00> : vector<240x512xf32>
    %3 = tpu.matmul %1, %2, %cst {dimension_numbers = #tpu.dot_dimension_numbers<[1], [0], [0], [1], [0, 0, 1, 1], [], []>} : vector<240x384xbf16>, vector<384x512xbf16>, vector<240x512xf32> -> vector<240x512xf32>
    %c0_4 = arith.constant 0 : index
    %c0_5 = arith.constant 0 : index
    %4 = vector.load %arg4[%c0_4, %c0_5] : memref<1x512xf32, #tpu.memory_space<vmem>>, vector<1x512xf32>
    %5 = vector.broadcast %4 : vector<1x512xf32> to vector<240x512xf32>
    %6 = arith.addf %3, %5 : vector<240x512xf32>
    %cst_6 = arith.constant 0.000000e+00 : f32
    %7 = vector.broadcast %cst_6 : f32 to vector<240x512xf32>
    %8 = arith.maximumf %6, %7 : vector<240x512xf32>
    %c0_7 = arith.constant 0 : index
    %c0_8 = arith.constant 0 : index
    %9 = vector.load %arg5[%c0_7, %c0_8] : memref<512x256xbf16, #tpu.memory_space<vmem>>, vector<512x256xbf16>
    %10 = arith.truncf %8 : vector<240x512xf32> to vector<240x512xbf16>
    %cst_9 = arith.constant dense<0.000000e+00> : vector<240x256xf32>
    %11 = tpu.matmul %10, %9, %cst_9 {dimension_numbers = #tpu.dot_dimension_numbers<[1], [0], [0], [1], [0, 0, 1, 1], [], []>} : vector<240x512xbf16>, vector<512x256xbf16>, vector<240x256xf32> -> vector<240x256xf32>
    %c0_10 = arith.constant 0 : index
    %c0_11 = arith.constant 0 : index
    %12 = vector.load %arg6[%c0_10, %c0_11] : memref<1x256xf32, #tpu.memory_space<vmem>>, vector<1x256xf32>
    %13 = vector.broadcast %12 : vector<1x256xf32> to vector<240x256xf32>
    %14 = arith.addf %11, %13 : vector<240x256xf32>
    %15 = vector.extract_strided_slice %14 {offsets = [0, 0], sizes = [240, 32], strides = [1, 1]} : vector<240x256xf32> to vector<240x32xf32>
    %16 = vector.extract_strided_slice %15 {offsets = [0, 0], sizes = [240, 8], strides = [1, 1]} : vector<240x32xf32> to vector<240x8xf32>
    %17 = vector.extract_strided_slice %15 {offsets = [0, 8], sizes = [240, 8], strides = [1, 1]} : vector<240x32xf32> to vector<240x8xf32>
    %18 = arith.maximumf %16, %17 : vector<240x8xf32>
    %19 = vector.extract_strided_slice %15 {offsets = [0, 16], sizes = [240, 8], strides = [1, 1]} : vector<240x32xf32> to vector<240x8xf32>
    %20 = arith.maximumf %18, %19 : vector<240x8xf32>
    %21 = vector.extract_strided_slice %15 {offsets = [0, 24], sizes = [240, 8], strides = [1, 1]} : vector<240x32xf32> to vector<240x8xf32>
    %22 = arith.maximumf %20, %21 : vector<240x8xf32>
    %23 = tpu.concatenate %22, %22, %22, %22 in 1 : vector<240x8xf32>, vector<240x8xf32>, vector<240x8xf32>, vector<240x8xf32> -> vector<240x32xf32>
    %24 = arith.subf %15, %23 : vector<240x32xf32>
    %25 = math.exp %24 : vector<240x32xf32>
    %26 = vector.extract_strided_slice %25 {offsets = [0, 0], sizes = [240, 8], strides = [1, 1]} : vector<240x32xf32> to vector<240x8xf32>
    %27 = vector.extract_strided_slice %25 {offsets = [0, 8], sizes = [240, 8], strides = [1, 1]} : vector<240x32xf32> to vector<240x8xf32>
    %28 = arith.addf %26, %27 : vector<240x8xf32>
    %29 = vector.extract_strided_slice %25 {offsets = [0, 16], sizes = [240, 8], strides = [1, 1]} : vector<240x32xf32> to vector<240x8xf32>
    %30 = arith.addf %28, %29 : vector<240x8xf32>
    %31 = vector.extract_strided_slice %25 {offsets = [0, 24], sizes = [240, 8], strides = [1, 1]} : vector<240x32xf32> to vector<240x8xf32>
    %32 = arith.addf %30, %31 : vector<240x8xf32>
    %33 = tpu.concatenate %32, %32, %32, %32 in 1 : vector<240x8xf32>, vector<240x8xf32>, vector<240x8xf32>, vector<240x8xf32> -> vector<240x32xf32>
    %34 = tpu.reciprocal %33 {approx = true} : vector<240x32xf32> -> vector<240x32xf32>
    %35 = arith.mulf %25, %34 : vector<240x32xf32>
    %36 = vector.extract_strided_slice %14 {offsets = [0, 0], sizes = [240, 144], strides = [1, 1]} : vector<240x256xf32> to vector<240x144xf32>
    %37 = vector.extract_strided_slice %14 {offsets = [0, 176], sizes = [240, 80], strides = [1, 1]} : vector<240x256xf32> to vector<240x80xf32>
    %38 = tpu.concatenate %36, %35, %37 in 1 : vector<240x144xf32>, vector<240x32xf32>, vector<240x80xf32> -> vector<240x256xf32>
    %39 = vector.shape_cast %38 : vector<240x256xf32> to vector<1x240x256xf32>
    %c0_12 = arith.constant 0 : index
    %c0_13 = arith.constant 0 : index
    %c0_14 = arith.constant 0 : index
    %40 = vector.load %arg7[%c0_12, %c0_13, %c0_14] : memref<1x240x256xf32, #tpu.memory_space<vmem>>, vector<1x240x256xf32>
    tpu.vector_store %arg7[%c0_12, %c0_13, %c0_14], %39 {strides = array<i32>} : memref<1x240x256xf32, #tpu.memory_space<vmem>>, vector<1x240x256xf32>,
    return
  }
  func.func @transform_0(%arg0: i32, %arg1: i32) -> (i32, i32, i32) {
    %c0_i32 = arith.constant 0 : i32
    %c0_i32_0 = arith.constant 0 : i32
    return %arg0, %arg1, %c0_i32 : i32, i32, i32
  }
  func.func @transform_1(%arg0: i32, %arg1: i32) -> (i32, i32) {
    %c0_i32 = arith.constant 0 : i32
    %c0_i32_0 = arith.constant 0 : i32
    %c0_i32_1 = arith.constant 0 : i32
    return %c0_i32, %c0_i32_0 : i32, i32
  }
  func.func @transform_2(%arg0: i32, %arg1: i32) -> (i32, i32) {
    %c0_i32 = arith.constant 0 : i32
    %c0_i32_0 = arith.constant 0 : i32
    %c0_i32_1 = arith.constant 0 : i32
    return %c0_i32, %c0_i32_0 : i32, i32
  }
  func.func @transform_3(%arg0: i32, %arg1: i32) -> (i32, i32) {
    %c0_i32 = arith.constant 0 : i32
    %c0_i32_0 = arith.constant 0 : i32
    %c0_i32_1 = arith.constant 0 : i32
    return %c0_i32, %c0_i32_0 : i32, i32
  }
  func.func @transform_4(%arg0: i32, %arg1: i32) -> (i32, i32) {
    %c0_i32 = arith.constant 0 : i32
    %c0_i32_0 = arith.constant 0 : i32
    %c0_i32_1 = arith.constant 0 : i32
    return %c0_i32, %c0_i32_0 : i32, i32
  }
  func.func @transform_5(%arg0: i32, %arg1: i32) -> (i32, i32, i32) {
    %c0_i32 = arith.constant 0 : i32
    %c0_i32_0 = arith.constant 0 : i32
    return %arg0, %arg1, %c0_i32 : i32, i32, i32
  }
}

</mosaic_0001>

<bundles_post_ra>
// kernel: tpu_custom_call.1
= control target key start
LH: loop header
LB: loop body
LE: loop exit
PB: predicated region body
PF: predicated region fallthrough
CT: control target
= control target key end

     0   :  { %s9742_s0 = inlined_call_operand.hbm [shape: bf16[2,240,384], index: 0, kind: input, shape index: {}]   ;;  %s9743_s1 = inlined_call_operand.hbm [shape: bf16[384,512], index: 1, kind: input, shape index: {}]   ;;  %s9744_s2 = inlined_call_operand.hbm [shape: f32[1,512], index: 2, kind: input, shape index: {}]   ;;  %s9745_s3 = inlined_call_operand.hbm [shape: bf16[512,256], index: 3, kind: input, shape index: {}]   ;;  %s9746_s4 = inlined_call_operand.hbm [shape: f32[1,256], index: 4, kind: input, shape index: {}]   ;;  %s9747_s5 = inlined_call_operand.hbm [shape: f32[2,240,256], index: 5, kind: output, shape index: {}]  }
   0x1   :  { %9796 = sst [smem:[#allocation80_spill]] %s9743_s1 }
   0x2   :  { %10 = vsyncpa [#allocation3], 0 }
   0x3   :  { %12 = vsyncpa [#allocation3 + $0x1], 0 }
   0x4   :  { %13 = vsyncpa [#allocation6], 0 }
   0x5   :  { %14 = vsyncpa [#allocation9], 0 }
   0x6   :  { %15 = vsyncpa [#allocation4], 0 }
   0x7   :  { %17 = vsyncpa [#allocation4 + $0x1], 0  ;;  %s6439_s18 = smov 0   ;;  %s6441_s19 = smov 0  }
   0x8   :  { %s6443_s20 = smov 0   ;;  %s6445_s21 = smov 0  }
   0x9   :  { %s6447_s22 = smov 0   ;;  %s6449_s23 = smov 0  }
   0xa LB: > { %s4987_s24 = sadd.s32 4294967295, %s6387_s23   ;;  %s4988_s25 = sadd.s32 4294967294, %s6387_s23   ;;  %s6387_s23 = sphi %s6449_s23, %s23_s23   ;;  %s6383_s22 = sphi %s6447_s22, %s9960_s22   ;;  %s6379_s21 = sphi %s6445_s21, %s9959_s21   ;;  %s6375_s20 = sphi %s6443_s20, %s9958_s20   ;;  %s6371_s19 = sphi %s6441_s19, %s9957_s19   ;;  %s6367_s18 = sphi %s6439_s18, %s9956_s18  }
   0xb   : > { %p57_p0 = scmp.ne.s32.totalorder %s6371_s19, %s6367_s18  ;;  %p6473_p1 = scmp.eq.s32.totalorder %s4987_s24, 0 }
   0xc   : > { %p6477_p2 = scmp.eq.s32.totalorder %s4987_s24, 1  ;;  %p173_p3 = scmp.eq.s32.totalorder %s4988_s25, 1 }
   0xd   : > { %s9797_s26 = scalar_select %p6473_p1, 1, 0 }
   0xe   : > { %s9798_s27 = scalar_select %p6477_p2, 1, 0 }
   0xf   : > { %p6483_p4 = por %p6473_p1, %p57_p0  ;;  %p4989_p5 = scmp.ge.s32.totalorder %s6387_s23, 1 }
  0x10   : > { %p6488_p6 = por %p173_p3, %p57_p0  ;;  %p180_p7 = scmp.lt.s32.totalorder %s6387_s23, 3 }
  0x11   : > { %s9799_s28 = scalar_select %p6483_p4, 1, 0 }
  0x12   : > { %s9800_s29 = scalar_select %p6488_p6, 1, 0 }
  0x13   : > { %p6493_p8 = pnand %p4989_p5, %p180_p7  ;;  %s6389_s6 = smov [#allocation5]  }
  0x14   : > { %9801 = sst [smem:[#allocation16_spill]] %s9800_s29  ;;  %s192_s7 = sshll.u32 %s6389_s6, 4  ;;  %s6497_s7 = int_to_ptr.vmem [resolvable:$true] %s192_s7 }
  0x15   : > { %s9802_s30 = scalar_select %p6493_p8, 1, 0 }
  0x16   : > { %p5594_p9 = pneg %p6493_p8  ;;  %s6390_s9 = smov [#allocation8]  }
  0x17   : > { %s216_s10 = sshll.u32 %s6390_s9, 4  ;;  %s9804_s1 = sld [smem:[#allocation80_spill]]  ;;  %s6508_s10 = int_to_ptr.vmem [resolvable:$true] %s216_s10 }
  0x18   : > { %p6504_p11 = pnand %p5594_p9, %p6473_p1 }
  0x1a   : > { %p6518_p13 = pneg %p6504_p11 }
  0x1d   : > { %s6155_s13 = scalar_lea.hbm %s9804_s1, 12288 }
  0x1e   : > { %p6156_p12 = scmp.ne.s32.totalorder %s9804_s1, %s6155_s13  ;;  %p6162_p5 = scmp.lt.u32.totalorder %s6155_s13, %s9804_s1 }
  0x20   : > { %p6158_p0 = pnand %p6518_p13, %p6156_p12 }
  0x22   : > { %p6159_p3 = pneg %p6158_p0 }
  0x24   : > { %p6164_p7 = pnand %p6162_p5, %p6159_p3 }
  0x26   : > { %6167 = shalt.err (!%p6164_p7)
}
  0x27   : > { %s6168_s25 = scalar_lea.vmem %s6497_s7, 12288  ;;  %p6176_p1 = scmp.lt.s32.totalorder %s6497_s7, %s6497_s7 }
  0x28   : > { %p6169_p9 = scmp.ne.s32.totalorder %s6497_s7, %s6168_s25  ;;  %p6177_p4 = scmp.lt.s32.totalorder %s6168_s25, %s6168_s25 }
  0x2a   : > { %p6171_p10 = pnand %p6169_p9, %p6518_p13  ;;  %p6178_p12 = por %p6177_p4, %p6176_p1 }
  0x2c   : > { %p6172_p6 = pneg %p6171_p10 }
  0x2e   : > { %p6179_p0 = pnand %p6178_p12, %p6172_p6 }
  0x30   : > { %6182 = shalt.err (!%p6179_p0)
}
  0x31   : > { %s6391_s6 = smov 256   ;;  %s6392_s9 = smov 16  }
  0x32   : > { %5597 = dma.hbm_to_vmem [thread:$0]  (!%p6504_p11), %s9804_s1, 12288, %s6497_s7, [#allocation6], %s6391_s6, %s6391_s6, %s6392_s9  }
  0x33   : > { %s6183_s15 = scalar_lea.hbm %s9745_s3, 8192 }
  0x34   : > { %p6184_p1 = scmp.ne.s32.totalorder %s9745_s3, %s6183_s15  ;;  %p6190_p10 = scmp.lt.u32.totalorder %s6183_s15, %s9745_s3 }
  0x36   : > { %p6186_p4 = pnand %p6184_p1, %p6518_p13 }
  0x38   : > { %p6187_p6 = pneg %p6186_p4 }
  0x3a   : > { %p6192_p3 = pnand %p6190_p10, %p6187_p6 }
  0x3c   : > { %6195 = shalt.err (!%p6192_p3)
}
  0x3d   : > { %s6196_s7 = scalar_lea.vmem %s6508_s10, 8192  ;;  %p6204_p12 = scmp.lt.s32.totalorder %s6508_s10, %s6508_s10 }
  0x3e   : > { %p6197_p5 = scmp.ne.s32.totalorder %s6508_s10, %s6196_s7  ;;  %p6205_p0 = scmp.lt.s32.totalorder %s6196_s7, %s6196_s7 }
  0x40   : > { %p6199_p7 = pnand %p6197_p5, %p6518_p13  ;;  %p6206_p1 = por %p6205_p0, %p6204_p12 }
  0x42   : > { %p6200_p9 = pneg %p6199_p7 }
  0x44   : > { %p6207_p4 = pnand %p6206_p1, %p6200_p9 }
  0x46   : > { %6210 = shalt.err (!%p6207_p4)
}
  0x47   : > { %s6393_s6 = smov 128   ;;  %s6394_s29 = smov 8  }
  0x48   : > { %5603 = dma.hbm_to_vmem [thread:$0]  (!%p6504_p11), %s9745_s3, 8192, %s6508_s10, [#allocation9], %s6393_s6, %s6393_s6, %s6394_s29  }
  0x49   : > { %s6395_s12 = smov [#allocation7]   ;;  %s6396_s14 = smov [#allocation10]  }
  0x4a   : > { %s206_s13 = sshll.u32 %s6395_s12, 4  ;;  %s230_s15 = sshll.u32 %s6396_s14, 4  ;;  %s207_s13 = int_to_ptr.vmem [resolvable:$true] %s206_s13  ;;  %s6562_s15 = int_to_ptr.vmem [resolvable:$true] %s230_s15 }
  0x4b   : > { %s6211_s25 = scalar_lea.hbm %s9744_s2, 64 }
  0x4c   : > { %p6212_p6 = scmp.ne.s32.totalorder %s9744_s2, %s6211_s25  ;;  %p6218_p5 = scmp.lt.u32.totalorder %s6211_s25, %s9744_s2 }
  0x4e   : > { %p6214_p10 = pnand %p6212_p6, %p6518_p13 }
  0x50   : > { %p6215_p3 = pneg %p6214_p10 }
  0x52   : > { %p6220_p7 = pnand %p6218_p5, %p6215_p3 }
  0x54   : > { %6223 = shalt.err (!%p6220_p7)
}
  0x55   : > { %s6224_s6 = scalar_lea.vmem %s207_s13, 64  ;;  %p6232_p1 = scmp.lt.s32.totalorder %s207_s13, %s207_s13 }
  0x56   : > { %p6225_p9 = scmp.ne.s32.totalorder %s207_s13, %s6224_s6  ;;  %p6233_p4 = scmp.lt.s32.totalorder %s6224_s6, %s6224_s6 }
  0x58   : > { %p6227_p12 = pnand %p6225_p9, %p6518_p13  ;;  %p6234_p8 = por %p6233_p4, %p6232_p1 }
  0x5a   : > { %p6228_p0 = pneg %p6227_p12 }
  0x5c   : > { %p6235_p2 = pnand %p6234_p8, %p6228_p0 }
  0x5e   : > { %6238 = shalt.err (!%p6235_p2)
}
  0x5f   : > { %5600 = dma.hbm_to_vmem [thread:$0]  (!%p6504_p11), %s9744_s2, 64, %s207_s13, [#allocation6]  }
  0x60   : > { %s6239_s14 = scalar_lea.hbm %s9746_s4, 32 }
  0x61   : > { %p6240_p6 = scmp.ne.s32.totalorder %s9746_s4, %s6239_s14  ;;  %p6246_p2 = scmp.lt.u32.totalorder %s6239_s14, %s9746_s4 }
  0x63   : > { %p6242_p10 = pnand %p6240_p6, %p6518_p13 }
  0x65   : > { %p6243_p3 = pneg %p6242_p10 }
  0x67   : > { %p6248_p8 = pnand %p6246_p2, %p6243_p3 }
  0x69   : > { %6251 = shalt.err (!%p6248_p8)
}
  0x6a   : > { %s6252_s13 = scalar_lea.vmem %s6562_s15, 32  ;;  %p6260_p12 = scmp.lt.s32.totalorder %s6562_s15, %s6562_s15 }
  0x6b   : > { %p6253_p5 = scmp.ne.s32.totalorder %s6562_s15, %s6252_s13  ;;  %p6261_p0 = scmp.lt.s32.totalorder %s6252_s13, %s6252_s13 }
  0x6d   : > { %p6255_p7 = pnand %p6253_p5, %p6518_p13  ;;  %p6262_p1 = por %p6261_p0, %p6260_p12 }
  0x6f   : > { %p6256_p9 = pneg %p6255_p7 }
  0x71   : > { %p6263_p4 = pnand %p6262_p1, %p6256_p9 }
  0x73   : > { %6266 = shalt.err (!%p6263_p4)
}
  0x74   : > { %5606 = dma.hbm_to_vmem [thread:$0]  (!%p6504_p11), %s9746_s4, 32, %s6562_s15, [#allocation9]  }
  0x75   : > { %s35_s16 = sadd.s32 1, %s6383_s22  ;;  %s44_s6 = sadd.s32 1, %s6375_s20 }
  0x76   : > { %p37_p13 = scmp.ge.s32.totalorder %s35_s16, 2  ;;  %p51_p6 = scmp.ne.s32.totalorder %s6375_s20, %s6371_s19 }
  0x77   : > { %p52_p10 = scmp.eq.s32.totalorder %s6387_s23, 0  ;;  %p5619_p3 = scmp.lt.s32.totalorder %s6387_s23, 2 }
  0x78   : > { %s9962_s16 = smov (%p37_p13, %s35_s16), 0  ;;  %p9806_p8 = scmp.ne.s32.totalorder %s9798_s27, 0 }
  0x79   : > { %p53_p2 = por %p52_p10, %p51_p6  ;;  %s39_s1 = ssub.s32 %s6383_s22, %s9962_s16 }
  0x7a   : > { %p6615_p5 = por %p9806_p8, %p51_p6  ;;  %s241_s29 = sand.u32 1, %s6375_s20  }
  0x7b   : > { %p42_p7 = scmp.eq.s32.totalorder %s39_s1, 0  ;;  %s5569_s15 = smul.u32 360, %s241_s29 }
  0x7c   : > { %p6622_p11 = pnand %p5619_p3, %p53_p2  ;;  %s5570_s14 = smul.u32 5760, %s6383_s22 }
  0x7d   : > { %s6627_s12 = scalar_select %p42_p7, %s6375_s20, %s44_s6  }
  0x7e   : > { %s245_s17 = scalar_lea.vmem [#allocation2], %s5569_s15  ;;  %s6633_s7 = scalar_lea.hbm %s9742_s0, %s5570_s14 }
  0x7f   : > { %s255_s24 = sshll.u32 %s245_s17, 4  ;;  %s6637_s13 = scalar_lea.sflag [#allocation3], %s241_s29  ;;  %s6635_s24 = int_to_ptr.vmem [resolvable:$true] %s255_s24 }
  0x80   : > { %s6267_s9 = scalar_lea.hbm %s6633_s7, 5760  ;;  %p6269_p12 = pneg %p6622_p11 }
  0x81   : > { %p6268_p9 = scmp.ne.s32.totalorder %s6633_s7, %s6267_s9  ;;  %s6272_s1 = scalar_lea.hbm %s9742_s0, 11520 }
  0x82   : > { %p6273_p4 = scmp.lt.u32.totalorder %s6633_s7, %s9742_s0  ;;  %p6274_p13 = scmp.lt.u32.totalorder %s6272_s1, %s6267_s9 }
  0x83   : > { %p6270_p0 = pnand %p6269_p12, %p6268_p9  ;;  %p6276_p10 = scmp.lt.u32.totalorder %s6267_s9, %s6633_s7 }
  0x84   : > { %p6275_p6 = por %p6274_p13, %p6273_p4 }
  0x85   : > { %p6271_p1 = pneg %p6270_p0 }
  0x86   : > { %p6277_p3 = por %p6276_p10, %p6275_p6 }
  0x88   : > { %p6278_p2 = pnand %p6277_p3, %p6271_p1 }
  0x8a   : > { %6281 = shalt.err (!%p6278_p2)
}
  0x8b   : > { %s6282_s29 = scalar_lea.vmem %s6635_s24, 5760  ;;  %s6397_s17 = smov [#allocation2]  }
  0x8c   : > { %p6283_p8 = scmp.ne.s32.totalorder %s6635_s24, %s6282_s29  ;;  %s6287_s27 = sshll.u32 %s6397_s17, 4  ;;  %s6288_s27 = int_to_ptr.vmem [resolvable:$false] %s6287_s27 }
  0x8d   : > { %s6289_s25 = scalar_lea.vmem %s6288_s27, 11520  ;;  %p6290_p0 = scmp.lt.s32.totalorder %s6635_s24, %s6288_s27 }
  0x8e   : > { %p6285_p7 = pnand %p6283_p8, %p6269_p12  ;;  %p6291_p4 = scmp.lt.s32.totalorder %s6289_s25, %s6282_s29 }
  0x90   : > { %p6286_p9 = pneg %p6285_p7  ;;  %p6292_p13 = por %p6291_p4, %p6290_p0 }
  0x92   : > { %p6293_p6 = pnand %p6292_p13, %p6286_p9 }
  0x94   : > { %6296 = shalt.err (!%p6293_p6)
}
  0x95   : > { %s6398_s9 = smov 192   ;;  %s6399_s10 = smov 12  }
  0x96   : > { %5610 = dma.hbm_to_vmem [thread:$0]  (!%p6622_p11), %s6633_s7, 5760, %s6635_s24, %s6637_s13, %s6398_s9, %s6398_s9, %s6399_s10  }
  0x97   : > { %p9809_p12 = scmp.ne.s32.totalorder %s9802_s30, 0 }
  0x99   : > { %267 = sbr.rel (%p9809_p12) target bundleno = 1890 (0x762), region = 40 }
  0xa0   : > { %s6668_s6 = sand.u32 1, %s6371_s19   ;;  %p9810_p1 = scmp.ne.s32.totalorder %s9799_s28, 0 }
  0xa1   : > { %s5571_s1 = smul.u32 360, %s6668_s6  ;;  %s270_s15 = scalar_lea.sflag [#allocation3], %s6668_s6 }
  0xa3   : > { %s6672_s14 = scalar_lea.vmem [#allocation2], %s5571_s1 }
  0xa4   : > { %6350 = dma.done.wait (%p9810_p1), %s270_s15, 5760  }
  0xa5   : > { %6352 = vsyncadd (%p9810_p1), %s270_s15, 4294961536  ;;  %p9811_p11 = scmp.ne.s32.totalorder %s9797_s26, 0 }
  0xa7   : > { %6354 = dma.done.wait (%p9811_p11), [#allocation6], 12352  }
  0xa8   : > { %6356 = vsyncadd (%p9811_p11), [#allocation6], 4294954944 }
  0xa9   : > { %6358 = dma.done.wait (%p9811_p11), [#allocation9], 8224  }
  0xaa   : > { %6360 = vsyncadd (%p9811_p11), [#allocation9], 4294959072  ;;  %v6400_v0 = vmov 0   ;;  %v5691_v1 = vld [vmem:[#allocation5 + $0x4] ss:$16 sps:$4 sm:$0xff]   ;;  %s5572_s26 = smul.u32 480, %s6668_s6 }
  0xab   : > { %1432 = vmatprep.mubr.bf16.mxu0 %v6400_v0  ;;  %v5693_v2 = vld [vmem:[#allocation5] ss:$16 sps:$4 sm:$0xff]   ;;  %1217 = vmatprep.subr.bf16.mxu1 %v5691_v1  ;;  %v5694_v3 = vld [vmem:[#allocation5 + $0x24] ss:$16 sps:$4 sm:$0xff]   ;;  %v5768_v53 = vld [vmem:[#allocation5 + $0xc] ss:$16 sps:$4 sm:$0xff]  }
  0xac   : > { %1218 = vmatpush1.bf16.msra.mxu1 %v5693_v2  ;;  %v5696_v4 = vld [vmem:[#allocation5 + $0x20] ss:$16 sps:$4 sm:$0xff]   ;;  %v5697_v5 = vld [vmem:[#allocation5 + $0x44] ss:$16 sps:$4 sm:$0xff]   ;;  %v5766_v55 = vld [vmem:[#allocation5 + $0x8] ss:$16 sps:$4 sm:$0xff]  }
  0xad   : > { %1219 = vmatprep.subr.bf16.mxu1 %v5694_v3  ;;  %v5699_v6 = vld [vmem:[#allocation5 + $0x40] ss:$16 sps:$4 sm:$0xff]   ;;  %v5700_v7 = vld [vmem:[#allocation5 + $0x64] ss:$16 sps:$4 sm:$0xff]   ;;  %v5775_v57 = vld [vmem:[#allocation5 + $0x2c] ss:$16 sps:$4 sm:$0xff]  }
  0xae   : > { %v5702_v8 = vld [vmem:[#allocation5 + $0x60] ss:$16 sps:$4 sm:$0xff]   ;;  %v5703_v9 = vld [vmem:[#allocation5 + $0x84] ss:$16 sps:$4 sm:$0xff]   ;;  %v5773_v59 = vld [vmem:[#allocation5 + $0x28] ss:$16 sps:$4 sm:$0xff]  }
  0xaf   : > { %v5718_v10 = vld [vmem:[#allocation5 + $0x204] ss:$16 sps:$4 sm:$0xff]   ;;  %v5720_v11 = vld [vmem:[#allocation5 + $0x200] ss:$16 sps:$4 sm:$0xff]   ;;  %v5781_v60 = vld [vmem:[#allocation5 + $0x4c] ss:$16 sps:$4 sm:$0xff]  }
  0xb0   : > { %1220 = vmatpush1.bf16.msra.mxu1 %v5696_v4  ;;  %v5705_v12 = vld [vmem:[#allocation5 + $0x80] ss:$16 sps:$4 sm:$0xff]   ;;  %1400 = vmatprep.subr.bf16.mxu0 %v5718_v10  ;;  %v5724_v13 = vld [vmem:[#allocation5 + $0x224] ss:$16 sps:$4 sm:$0xff]   ;;  %v5779_v63 = vld [vmem:[#allocation5 + $0x48] ss:$16 sps:$4 sm:$0xff]  }
  0xb1   : > { %1221 = vmatprep.subr.bf16.mxu1 %v5697_v5  ;;  %1401 = vmatpush1.bf16.msra.mxu0 %v5720_v11  ;;  %v5726_v14 = vld [vmem:[#allocation5 + $0x220] ss:$16 sps:$4 sm:$0xff]   ;;  %v5706_v15 = vld [vmem:[#allocation5 + $0xa4] ss:$16 sps:$4 sm:$0xff]   ;;  %v5788_v1 = vld [vmem:[#allocation5 + $0x6c] ss:$16 sps:$4 sm:$0xff]  }
  0xb2   : > { %1402 = vmatprep.subr.bf16.mxu0 %v5724_v13  ;;  %v5708_v16 = vld [vmem:[#allocation5 + $0xa0] ss:$16 sps:$4 sm:$0xff]   ;;  %v5730_v17 = vld [vmem:[#allocation5 + $0x244] ss:$16 sps:$4 sm:$0xff]   ;;  %v5786_v3 = vld [vmem:[#allocation5 + $0x68] ss:$16 sps:$4 sm:$0xff]  }
  0xb3   : > { %v5709_v18 = vld [vmem:[#allocation5 + $0xc4] ss:$16 sps:$4 sm:$0xff]   ;;  %v5732_v19 = vld [vmem:[#allocation5 + $0x240] ss:$16 sps:$4 sm:$0xff]   ;;  %v5793_v4 = vld [vmem:[#allocation5 + $0x8c] ss:$16 sps:$4 sm:$0xff]  }
  0xb4   : > { %1222 = vmatpush1.bf16.msra.mxu1 %v5699_v6  ;;  %v5736_v20 = vld [vmem:[#allocation5 + $0x264] ss:$16 sps:$4 sm:$0xff]   ;;  %v5711_v21 = vld [vmem:[#allocation5 + $0xc0] ss:$16 sps:$4 sm:$0xff]   ;;  %v5798_v10 = vld [vmem:[#allocation5 + $0xa8] ss:$16 sps:$4 sm:$0xff]  }
  0xb5   : > { %1223 = vmatprep.subr.bf16.mxu1 %v5700_v7  ;;  %1403 = vmatpush1.bf16.msra.mxu0 %v5726_v14  ;;  %v5712_v22 = vld [vmem:[#allocation5 + $0xe4] ss:$16 sps:$4 sm:$0xff]   ;;  %v5738_v23 = vld [vmem:[#allocation5 + $0x260] ss:$16 sps:$4 sm:$0xff]   ;;  %v5791_v7 = vld [vmem:[#allocation5 + $0x88] ss:$16 sps:$4 sm:$0xff]  }
  0xb6   : > { %1404 = vmatprep.subr.bf16.mxu0 %v5730_v17  ;;  %v5742_v24 = vld [vmem:[#allocation5 + $0x284] ss:$16 sps:$4 sm:$0xff]   ;;  %v5714_v25 = vld [vmem:[#allocation5 + $0xe0] ss:$16 sps:$4 sm:$0xff]   ;;  %v5807_v11 = vld [vmem:[#allocation5 + $0xcc] ss:$16 sps:$4 sm:$0xff]  }
  0xb7   : > { %v5715_v26 = vld [vmem:[#allocation5 + $0x104] ss:$16 sps:$4 sm:$0xff]   ;;  %v5744_v27 = vld [vmem:[#allocation5 + $0x280] ss:$16 sps:$4 sm:$0xff]   ;;  %v5805_v14 = vld [vmem:[#allocation5 + $0xc8] ss:$16 sps:$4 sm:$0xff]  }
  0xb8   : > { %1224 = vmatpush1.bf16.msra.mxu1 %v5702_v8  ;;  %v5748_v28 = vld [vmem:[#allocation5 + $0x2a4] ss:$16 sps:$4 sm:$0xff]   ;;  %v5717_v29 = vld [vmem:[#allocation5 + $0x100] ss:$16 sps:$4 sm:$0xff]   ;;  %v5800_v8 = vld [vmem:[#allocation5 + $0xac] ss:$16 sps:$4 sm:$0xff]  }
  0xb9   : > { %1225 = vmatprep.subr.bf16.mxu1 %v5703_v9  ;;  %1405 = vmatpush1.bf16.msra.mxu0 %v5732_v19  ;;  %v5721_v30 = vld [vmem:[#allocation5 + $0x124] ss:$16 sps:$4 sm:$0xff]   ;;  %v5750_v31 = vld [vmem:[#allocation5 + $0x2a0] ss:$16 sps:$4 sm:$0xff]   ;;  %v5812_v17 = vld [vmem:[#allocation5 + $0xe8] ss:$16 sps:$4 sm:$0xff]  }
  0xba   : > { %1406 = vmatprep.subr.bf16.mxu0 %v5736_v20  ;;  %v5754_v32 = vld [vmem:[#allocation5 + $0x2c4] ss:$16 sps:$4 sm:$0xff]   ;;  %v5723_v34 = vld [vmem:[#allocation5 + $0x120] ss:$16 sps:$4 sm:$0xff]   ;;  %v5821_v19 = vld [vmem:[#allocation5 + $0x10c] ss:$16 sps:$4 sm:$0xff]  }
  0xbb   : > { %v6688_v33 = vld [vmem:[%s6672_s14 + $0x4] ss:$12 sps:$4 sm:$0xff]   ;;  %v5769_v41 = vld [vmem:[%s6672_s14 + $0x8] ss:$12 sps:$4 sm:$0xff]   ;;  %v5776_v46 = vld [vmem:[%s6672_s14 + $0x20] ss:$12 sps:$4 sm:$0xff]  }
  0xbc   : > { %1226 = vmatpush1.bf16.msra.mxu1 %v5705_v12  ;;  %1249 = vmatprep.mubr.bf16.mxu1 %v6688_v33  ;;  %v5756_v35 = vld [vmem:[#allocation5 + $0x2c0] ss:$16 sps:$4 sm:$0xff]   ;;  %v5727_v36 = vld [vmem:[#allocation5 + $0x144] ss:$16 sps:$4 sm:$0xff]   ;;  %s7206_s28 = scalar_lea.vmem [#allocation11], %s5572_s26  ;;  %s6401_s30 = smov 120  }
  0xbd   : > { %1227 = vmatprep.subr.bf16.mxu1 %v5706_v15  ;;  %1407 = vmatpush1.bf16.msra.mxu0 %v5738_v23  ;;  %v5760_v37 = vld [vmem:[#allocation5 + $0x2e4] ss:$16 sps:$4 sm:$0xff]   ;;  %v5729_v38 = vld [vmem:[#allocation5 + $0x140] ss:$16 sps:$4 sm:$0xff]   ;;  %v5814_v15 = vld [vmem:[#allocation5 + $0xec] ss:$16 sps:$4 sm:$0xff]  }
  0xbe   : > { %1408 = vmatprep.subr.bf16.mxu0 %v5742_v24  ;;  %v5765_v39 = vld [vmem:[#allocation5 + $0x2e0] ss:$16 sps:$4 sm:$0xff]   ;;  %v5733_v40 = vld [vmem:[#allocation5 + $0x164] ss:$16 sps:$4 sm:$0xff]   ;;  %s6402_s11 = smov 112   ;;  %s6403_s24 = smov 104  }
  0xbf   : > { %v5735_v42 = vld [vmem:[#allocation5 + $0x160] ss:$16 sps:$4 sm:$0xff]   ;;  %v5739_v43 = vld [vmem:[#allocation5 + $0x184] ss:$16 sps:$4 sm:$0xff]   ;;  %s6404_s7 = smov 8   ;;  %s6405_s13 = smov 16  }
  0xc0   : > { %1228 = vmatpush1.bf16.msra.mxu1 %v5708_v16  ;;  %v5741_v44 = vld [vmem:[#allocation5 + $0x180] ss:$16 sps:$4 sm:$0xff]   ;;  %v5745_v45 = vld [vmem:[#allocation5 + $0x1a4] ss:$16 sps:$4 sm:$0xff]   ;;  %s6406_s29 = smov 24   ;;  %vm3581_vm0 = vcmask 64512  }
  0xc1   : > { %1229 = vmatprep.subr.bf16.mxu1 %v5709_v18  ;;  %1409 = vmatpush1.bf16.msra.mxu0 %v5744_v27  ;;  %v5747_v47 = vld [vmem:[#allocation5 + $0x1a0] ss:$16 sps:$4 sm:$0xff]   ;;  %v5751_v48 = vld [vmem:[#allocation5 + $0x1c4] ss:$16 sps:$4 sm:$0xff]   ;;  %v5835_v27 = vld [vmem:[#allocation5 + $0x14c] ss:$16 sps:$4 sm:$0xff]  }
  0xc2   : > { %1410 = vmatprep.subr.bf16.mxu0 %v5748_v28  ;;  %v5753_v49 = vld [vmem:[#allocation5 + $0x1c0] ss:$16 sps:$4 sm:$0xff]   ;;  %v5757_v50 = vld [vmem:[#allocation5 + $0x1e4] ss:$16 sps:$4 sm:$0xff]   ;;  %vm3612_vm1 = vcmask 130048   ;;  %vm3643_vm2 = vcmask 195584  }
  0xc3   : > { %v5783_v51 = vld [vmem:[%s6672_s14 + $0x38] ss:$12 sps:$4 sm:$0xff]   ;;  %v6697_v54 = vld [vmem:[%s6672_s14] ss:$12 sps:$4 sm:$0xff]   ;;  %v6700_v56 = vld [vmem:[%s6672_s14 + $0x1c] ss:$12 sps:$4 sm:$0xff]  }
  0xc4   : > { %1230 = vmatpush1.bf16.msra.mxu1 %v5711_v21  ;;  %v5759_v52 = vld [vmem:[#allocation5 + $0x1e0] ss:$16 sps:$4 sm:$0xff]   ;;  %v5819_v21 = vld [vmem:[#allocation5 + $0x108] ss:$16 sps:$4 sm:$0xff]   ;;  %vm4754_vm3 = vcmask 392192   ;;  %s5573_s17 = smul.u32 7680, %s6379_s21 }
  0xc5   : > { %1231 = vmatprep.subr.bf16.mxu1 %v5712_v22  ;;  %1411 = vmatpush1.bf16.msra.mxu0 %v5750_v31  ;;  %v5790_v58 = vld [vmem:[%s6672_s14 + $0x50] ss:$12 sps:$4 sm:$0xff]   ;;  %v6707_v61 = vld [vmem:[%s6672_s14 + $0x18] ss:$12 sps:$4 sm:$0xff]   ;;  %v6710_v62 = vld [vmem:[%s6672_s14 + $0x34] ss:$12 sps:$4 sm:$0xff]  }
  0xc6   : > { %1412 = vmatprep.subr.bf16.mxu0 %v5754_v32  ;;  %v5797_v2 = vld [vmem:[%s6672_s14 + $0x68] ss:$12 sps:$4 sm:$0xff]   ;;  %v6717_v5 = vld [vmem:[%s6672_s14 + $0x30] ss:$12 sps:$4 sm:$0xff]   ;;  %v6720_v6 = vld [vmem:[%s6672_s14 + $0x4c] ss:$12 sps:$4 sm:$0xff]   ;;  %s9686_s10 = scalar_lea.hbm %s9747_s5, %s5573_s17 }
  0xc7   : > { %v5804_v9 = vld [vmem:[%s6672_s14 + $0x80] ss:$12 sps:$4 sm:$0xff]   ;;  %v6727_v12 = vld [vmem:[%s6672_s14 + $0x48] ss:$12 sps:$4 sm:$0xff]   ;;  %v6730_v13 = vld [vmem:[%s6672_s14 + $0x64] ss:$12 sps:$4 sm:$0xff]  }
  0xc8   : > { %1232 = vmatpush1.bf16.msra.mxu1 %v5714_v25  ;;  %v5811_v16 = vld [vmem:[%s6672_s14 + $0x98] ss:$12 sps:$4 sm:$0xff]   ;;  %v6737_v18 = vld [vmem:[%s6672_s14 + $0x60] ss:$12 sps:$4 sm:$0xff]   ;;  %v6740_v20 = vld [vmem:[%s6672_s14 + $0x7c] ss:$12 sps:$4 sm:$0xff]  }
  0xc9   : > { %1233 = vmatprep.subr.bf16.mxu1 %v5715_v26  ;;  %1413 = vmatpush1.bf16.msra.mxu0 %v5756_v35  ;;  %v5828_v22 = vld [vmem:[#allocation5 + $0x12c] ss:$16 sps:$4 sm:$0xff]   ;;  %v5882_v24 = vld [vmem:[#allocation8 + $0x4] ss:$8 sps:$4 sm:$0xff]   ;;  %v5885_v28 = vld [vmem:[#allocation8 + $0x14] ss:$8 sps:$4 sm:$0xff]  }
  0xca   : > { %1414 = vmatprep.subr.bf16.mxu0 %v5760_v37  ;;  %v5818_v23 = vld [vmem:[%s6672_s14 + $0xb0] ss:$12 sps:$4 sm:$0xff]   ;;  %v6750_v31 = vld [vmem:[%s6672_s14 + $0x94] ss:$12 sps:$4 sm:$0xff]   ;;  %s4862_s27 = sshll.u32 %s7206_s28, 4  ;;  %s4846_s21 = scalar_lea.sflag [#allocation4], %s6668_s6  ;;  %s9690_s27 = int_to_ptr.vmem [resolvable:$true] %s4862_s27 }
  0xcb   : > { %v5880_v25 = vld [vmem:[#allocation8] ss:$8 sps:$4 sm:$0xff]   ;;  %v5826_v26 = vld [vmem:[#allocation5 + $0x128] ss:$16 sps:$4 sm:$0xff]   ;;  %s6297_s1 = scalar_lea.vmem %s9690_s27, 7680  ;;  %s6407_s15 = smov [#allocation11]  }
  0xcc   : > { %1234 = vmatpush1.bf16.msra.mxu1 %v5717_v29  ;;  %v5883_v29 = vld [vmem:[#allocation8 + $0x10] ss:$8 sps:$4 sm:$0xff]   ;;  %v5833_v32 = vld [vmem:[#allocation5 + $0x148] ss:$16 sps:$4 sm:$0xff]   ;;  %p6298_p10 = scmp.ne.s32.totalorder %s9690_s27, %s6297_s1 }
  0xcd   : > { %1235 = vmatprep.subr.bf16.mxu1 %v5721_v30  ;;  %1415 = vmatpush1.bf16.msra.mxu0 %v5765_v39  ;;  %v6747_v30 = vld [vmem:[%s6672_s14 + $0x78] ss:$12 sps:$4 sm:$0xff]   ;;  %v5825_v35 = vld [vmem:[%s6672_s14 + $0xc8] ss:$12 sps:$4 sm:$0xff]  }
  0xce   : > { %2525 = vmatprep.subr.bf16.mxu0 %v5882_v24  ;;  %v5840_v37 = vld [vmem:[#allocation5 + $0x168] ss:$16 sps:$4 sm:$0xff]   ;;  %v5849_v39 = vld [vmem:[#allocation5 + $0x18c] ss:$16 sps:$4 sm:$0xff]   ;;  %p6299_p3 = pnand %p6298_p10, %p6615_p5 }
  0xcf   : > { %v5922_v24 = vld [vmem:[#allocation8 + $0xb0] ss:$8 sps:$4 sm:$0xff]  }
  0xd0   : > { %1236 = vmatpush1.bf16.msra.mxu1 %v5723_v34  ;;  %1433 = vmatmul.mubr.bf16.vlgmr.msra.gmra.mrb[0].mxu0 %v5769_v41  ;;  %v5842_v34 = vld [vmem:[#allocation5 + $0x16c] ss:$16 sps:$4 sm:$0xff]   ;;  %v5894_v41 = vld [vmem:[#allocation8 + $0x34] ss:$8 sps:$4 sm:$0xff]   ;;  %p6300_p2 = pneg %p6299_p3 }
  0xd1   : > { %1237 = vmatprep.subr.bf16.mxu1 %v5727_v36  ;;  %1442 = vmatprep.mubr.bf16.mxu0 %v6400_v0  ;;  %v5891_v36 = vld [vmem:[#allocation8 + $0x24] ss:$8 sps:$4 sm:$0xff]  }
  0xd2   : > { %2526 = vmatpush1.bf16.msra.mxu0 %v5880_v25  ;;  %v6797_v25 = vld [vmem:[%s6672_s14 + $0xf0] ss:$12 sps:$4 sm:$0xff]  }
  0xd3   : > { %2527 = vmatprep.subr.bf16.mxu0 %v5885_v28  ;;  %v5925_v28 = vld [vmem:[#allocation8 + $0xc0] ss:$8 sps:$4 sm:$0xff]  }
  0xd4   : > { %1238 = vmatpush1.bf16.msra.mxu1 %v5729_v38  ;;  %v5889_v38 = vld [vmem:[#allocation8 + $0x20] ss:$8 sps:$4 sm:$0xff]  }
  0xd5   : > { %1239 = vmatprep.subr.bf16.mxu1 %v5733_v40  ;;  %v5892_v40 = vld [vmem:[#allocation8 + $0x30] ss:$8 sps:$4 sm:$0xff]  }
  0xd6   : > { %2528 = vmatpush1.bf16.msra.mxu0 %v5883_v29  ;;  %v5863_v29 = vld [vmem:[%s6672_s14 + $0x140] ss:$12 sps:$4 sm:$0xff]  }
  0xd7   : > { %2529 = vmatprep.subr.bf16.mxu0 %v5891_v36  ;;  %v6810_v36 = vld [vmem:[%s6672_s14 + $0x124] ss:$12 sps:$4 sm:$0xff]  }
  0xd8   : > { %1240 = vmatpush1.bf16.msra.mxu1 %v5735_v42  ;;  %1443 = vmatmul.mubr.bf16.gmra.mrb[4].mxu0 %v5776_v46  ;;  %v6757_v42 = vld [vmem:[%s6672_s14 + $0x90] ss:$12 sps:$4 sm:$0xff]   ;;  %v5832_v46 = vld [vmem:[%s6672_s14 + $0xe0] ss:$12 sps:$4 sm:$0xff]  }
  0xd9   : > { %1241 = vmatprep.subr.bf16.mxu1 %v5739_v43  ;;  %1452 = vmatprep.mubr.bf16.mxu0 %v6400_v0  ;;  %v6760_v43 = vld [vmem:[%s6672_s14 + $0xac] ss:$12 sps:$4 sm:$0xff]  }
  0xda   : > { %2530 = vmatpush1.bf16.msra.mxu0 %v5889_v38  ;;  %v5934_v38 = vld [vmem:[#allocation8 + $0xe0] ss:$8 sps:$4 sm:$0xff]  }
  0xdb   : > { %2531 = vmatprep.subr.bf16.mxu0 %v5894_v41  ;;  %v5937_v41 = vld [vmem:[#allocation8 + $0xf0] ss:$8 sps:$4 sm:$0xff]  }
  0xdc   : > { %1242 = vmatpush1.bf16.msra.mxu1 %v5741_v44  ;;  %v5847_v44 = vld [vmem:[#allocation5 + $0x188] ss:$16 sps:$4 sm:$0xff]  }
  0xdd   : > { %1243 = vmatprep.subr.bf16.mxu1 %v5745_v45  ;;  %v5856_v45 = vld [vmem:[#allocation5 + $0x1ac] ss:$16 sps:$4 sm:$0xff]  }
  0xde   : > { %2532 = vmatpush1.bf16.msra.mxu0 %v5892_v40  ;;  %v5939_v40 = vld [vmem:[#allocation8 + $0xf4] ss:$8 sps:$4 sm:$0xff]  }
  0xe0   : > { %1244 = vmatpush1.bf16.msra.mxu1 %v5747_v47  ;;  %1453 = vmatmul.mubr.bf16.gmra.mrb[8].mxu0 %v5783_v51  ;;  %v5897_v47 = vld [vmem:[#allocation8 + $0x44] ss:$8 sps:$4 sm:$0xff]   ;;  %v5901_v51 = vld [vmem:[#allocation8 + $0x50] ss:$8 sps:$4 sm:$0xff]  }
  0xe1   : > { %1245 = vmatprep.subr.bf16.mxu1 %v5751_v48  ;;  %1462 = vmatprep.mubr.bf16.mxu0 %v6400_v0  ;;  %v5895_v48 = vld [vmem:[#allocation8 + $0x40] ss:$8 sps:$4 sm:$0xff]  }
  0xe2   : > { %2533 = vmatprep.subr.bf16.mxu0 %v5897_v47  ;;  %v6828_v47 = vld [vmem:[%s6672_s14 + $0x154] ss:$12 sps:$4 sm:$0xff]  }
  0xe3   : > { %2534 = vmatpush1.bf16.msra.mxu0 %v5895_v48  ;;  %v6833_v48 = vld [vmem:[%s6672_s14 + $0x150] ss:$12 sps:$4 sm:$0xff]  }
  0xe4   : > { %1246 = vmatpush1.bf16.msra.mxu1 %v5753_v49  ;;  %v5854_v49 = vld [vmem:[#allocation5 + $0x1a8] ss:$16 sps:$4 sm:$0xff]  }
  0xe5   : > { %1247 = vmatprep.subr.bf16.mxu1 %v5757_v50  ;;  %v5862_v50 = vld [vmem:[#allocation5 + $0x1cc] ss:$16 sps:$4 sm:$0xff]  }
  0xe8   : > { %1248 = vmatpush1.bf16.msra.mxu1 %v5759_v52  ;;  %1463 = vmatmul.mubr.bf16.gmra.mrb[12].mxu0 %v5790_v58  ;;  %v5903_v52 = vld [vmem:[#allocation8 + $0x54] ss:$8 sps:$4 sm:$0xff]   ;;  %v5869_v58 = vld [vmem:[#allocation5 + $0x1ec] ss:$16 sps:$4 sm:$0xff]  }
  0xe9   : > { %1583 = vmatprep.subr.bf16.mxu1 %v5768_v53  ;;  %1472 = vmatprep.mubr.bf16.mxu0 %v6400_v0  ;;  %v6767_v53 = vld [vmem:[%s6672_s14 + $0xa8] ss:$12 sps:$4 sm:$0xff]  }
  0xea   : > { %2535 = vmatprep.subr.bf16.mxu0 %v5903_v52  ;;  %v5879_v52 = vld [vmem:[#allocation5 + $0x24c] ss:$16 sps:$4 sm:$0xff]  }
  0xeb   : > { %1250 = vmatmul.mubr.bf16.vlgmr.msra.gmra.mrb[0].mxu1 %v6697_v54  ;;  %2536 = vmatpush1.bf16.msra.mxu0 %v5901_v51  ;;  %v5874_v51 = vld [vmem:[#allocation5 + $0x228] ss:$16 sps:$4 sm:$0xff]  }
  0xec   : > { %1584 = vmatpush1.bf16.msra.mxu1 %v5766_v55  ;;  %1259 = vmatprep.mubr.bf16.mxu1 %v6700_v56  ;;  %v6770_v55 = vld [vmem:[%s6672_s14 + $0xc4] ss:$12 sps:$4 sm:$0xff]  }
  0xed   : > { %1585 = vmatprep.subr.bf16.mxu1 %v5775_v57  ;;  %v5860_v57 = vld [vmem:[#allocation5 + $0x1c8] ss:$16 sps:$4 sm:$0xff]  }
  0xf0   : > { %1586 = vmatpush1.bf16.msra.mxu1 %v5773_v59  ;;  %1473 = vmatmul.mubr.bf16.gmra.mrb[16].mxu0 %v5797_v2  ;;  %v5906_v59 = vld [vmem:[#allocation8 + $0x64] ss:$8 sps:$4 sm:$0xff]  }
  0xf1   : > { %1587 = vmatprep.subr.bf16.mxu1 %v5781_v60  ;;  %1482 = vmatprep.mubr.bf16.mxu0 %v6400_v0  ;;  %v5904_v60 = vld [vmem:[#allocation8 + $0x60] ss:$8 sps:$4 sm:$0xff]   ;;  %v5867_v2 = vld [vmem:[#allocation5 + $0x1e8] ss:$16 sps:$4 sm:$0xff]  }
  0xf2   : > { %2537 = vmatprep.subr.bf16.mxu0 %v5906_v59  ;;  %v5900_v59 = vld [vmem:[#allocation5 + $0x28c] ss:$16 sps:$4 sm:$0xff]  }
  0xf3   : > { %1260 = vmatmul.mubr.bf16.gmra.mrb[4].mxu1 %v6707_v61  ;;  %2538 = vmatpush1.bf16.msra.mxu0 %v5904_v60  ;;  %v5915_v60 = vld [vmem:[#allocation5 + $0x2ac] ss:$16 sps:$4 sm:$0xff]  }
  0xf4   : > { %1269 = vmatprep.mubr.bf16.mxu1 %v6710_v62  ;;  %1588 = vmatpush1.bf16.msra.mxu1 %v5779_v63  ;;  %v5839_v63 = vld [vmem:[%s6672_s14 + $0xf8] ss:$12 sps:$4 sm:$0xff]  }
  0xf5   : > { %1589 = vmatprep.subr.bf16.mxu1 %v5788_v1  ;;  %v5909_v1 = vld [vmem:[#allocation8 + $0x74] ss:$8 sps:$4 sm:$0xff]  }
  0xf6   : > { %2539 = vmatprep.subr.bf16.mxu0 %v5909_v1  ;;  %v5940_v1 = vld [vmem:[#allocation5 + $0x2e8] ss:$16 sps:$4 sm:$0xff]  }
  0xf8   : > { %1590 = vmatpush1.bf16.msra.mxu1 %v5786_v3  ;;  %1483 = vmatmul.mubr.bf16.gmra.mrb[20].mxu0 %v5804_v9  ;;  %v5873_v3 = vld [vmem:[#allocation5 + $0x20c] ss:$16 sps:$4 sm:$0xff]   ;;  %v5912_v9 = vld [vmem:[#allocation8 + $0x84] ss:$8 sps:$4 sm:$0xff]  }
  0xf9   : > { %1591 = vmatprep.subr.bf16.mxu1 %v5793_v4  ;;  %1492 = vmatprep.mubr.bf16.mxu0 %v6400_v0  ;;  %v5907_v4 = vld [vmem:[#allocation8 + $0x70] ss:$8 sps:$4 sm:$0xff]  }
  0xfa   : > { %2540 = vmatpush1.bf16.msra.mxu0 %v5907_v4 }
  0xfb   : > { %1270 = vmatmul.mubr.bf16.gmra.mrb[8].mxu1 %v6717_v5  ;;  %2541 = vmatprep.subr.bf16.mxu0 %v5912_v9 }
  0xfc   : > { %1279 = vmatprep.mubr.bf16.mxu1 %v6720_v6  ;;  %1592 = vmatpush1.bf16.msra.mxu1 %v5791_v7  ;;  %v6777_v7 = vld [vmem:[%s6672_s14 + $0xc0] ss:$12 sps:$4 sm:$0xff]  }
  0xfd   : > { %1593 = vmatprep.subr.bf16.mxu1 %v5800_v8  ;;  %v6780_v8 = vld [vmem:[%s6672_s14 + $0xdc] ss:$12 sps:$4 sm:$0xff]  }
 0x100   : > { %1594 = vmatpush1.bf16.msra.mxu1 %v5798_v10  ;;  %1493 = vmatmul.mubr.bf16.gmra.mrb[24].mxu0 %v5811_v16  ;;  %v5910_v10 = vld [vmem:[#allocation8 + $0x80] ss:$8 sps:$4 sm:$0xff]   ;;  %v6787_v16 = vld [vmem:[%s6672_s14 + $0xd8] ss:$12 sps:$4 sm:$0xff]  }
 0x101   : > { %1595 = vmatprep.subr.bf16.mxu1 %v5807_v11  ;;  %1502 = vmatprep.mubr.bf16.mxu0 %v6400_v0  ;;  %v5846_v11 = vld [vmem:[%s6672_s14 + $0x110] ss:$12 sps:$4 sm:$0xff]  }
 0x102   : > { %2542 = vmatpush1.bf16.msra.mxu0 %v5910_v10 }
 0x103   : > { %1280 = vmatmul.mubr.bf16.gmra.mrb[12].mxu1 %v6727_v12 }
 0x104   : > { %1289 = vmatprep.mubr.bf16.mxu1 %v6730_v13  ;;  %1596 = vmatpush1.bf16.msra.mxu1 %v5805_v14  ;;  %v5918_v14 = vld [vmem:[#allocation8 + $0x94] ss:$8 sps:$4 sm:$0xff]  }
 0x105   : > { %1597 = vmatprep.subr.bf16.mxu1 %v5814_v15  ;;  %v5916_v15 = vld [vmem:[#allocation8 + $0x90] ss:$8 sps:$4 sm:$0xff]   ;;  %2543 = vmatprep.subr.bf16.mxu0 %v5918_v14 }
 0x106   : > { %2544 = vmatpush1.bf16.msra.mxu0 %v5916_v15 }
 0x108   : > { %1598 = vmatpush1.bf16.msra.mxu1 %v5812_v17  ;;  %1503 = vmatmul.mubr.bf16.gmra.mrb[28].mxu0 %v5818_v23  ;;  %v6790_v17 = vld [vmem:[%s6672_s14 + $0xf4] ss:$12 sps:$4 sm:$0xff]  }
 0x109   : > { %1599 = vmatprep.subr.bf16.mxu1 %v5821_v19  ;;  %1512 = vmatprep.mubr.bf16.mxu0 %v6400_v0  ;;  %v5921_v19 = vld [vmem:[#allocation8 + $0xa4] ss:$8 sps:$4 sm:$0xff]   ;;  %v5924_v23 = vld [vmem:[#allocation8 + $0xb4] ss:$8 sps:$4 sm:$0xff]  }
 0x10a   : > { %2545 = vmatprep.subr.bf16.mxu0 %v5921_v19 }
 0x10b   : > { %1290 = vmatmul.mubr.bf16.gmra.mrb[16].mxu1 %v6737_v18 }
 0x10c   : > { %1299 = vmatprep.mubr.bf16.mxu1 %v6740_v20  ;;  %1600 = vmatpush1.bf16.msra.mxu1 %v5819_v21  ;;  %v5919_v21 = vld [vmem:[#allocation8 + $0xa0] ss:$8 sps:$4 sm:$0xff]  }
 0x10d   : > { %1601 = vmatprep.subr.bf16.mxu1 %v5828_v22  ;;  %v5853_v22 = vld [vmem:[%s6672_s14 + $0x128] ss:$12 sps:$4 sm:$0xff]   ;;  %2546 = vmatpush1.bf16.msra.mxu0 %v5919_v21 }
 0x10e   : > { %2547 = vmatprep.subr.bf16.mxu0 %v5924_v23 }
 0x110   : > { %1602 = vmatpush1.bf16.msra.mxu1 %v5826_v26  ;;  %1513 = vmatmul.mubr.bf16.gmra.mrb[32].mxu0 %v5825_v35  ;;  %v6800_v26 = vld [vmem:[%s6672_s14 + $0x10c] ss:$12 sps:$4 sm:$0xff]   ;;  %v6807_v35 = vld [vmem:[%s6672_s14 + $0x108] ss:$12 sps:$4 sm:$0xff]  }
 0x111   : > { %1603 = vmatprep.subr.bf16.mxu1 %v5835_v27  ;;  %1522 = vmatprep.mubr.bf16.mxu0 %v6400_v0  ;;  %v5927_v27 = vld [vmem:[#allocation8 + $0xc4] ss:$8 sps:$4 sm:$0xff]  }
 0x112   : > { %2548 = vmatpush1.bf16.msra.mxu0 %v5922_v24 }
 0x113   : > { %1300 = vmatmul.mubr.bf16.gmra.mrb[20].mxu1 %v6747_v30  ;;  %2549 = vmatprep.subr.bf16.mxu0 %v5927_v27 }
 0x114   : > { %1309 = vmatprep.mubr.bf16.mxu1 %v6750_v31  ;;  %1604 = vmatpush1.bf16.msra.mxu1 %v5833_v32  ;;  %v5933_v32 = vld [vmem:[#allocation8 + $0xd4] ss:$8 sps:$4 sm:$0xff]  }
 0x115   : > { %1605 = vmatprep.subr.bf16.mxu1 %v5842_v34  ;;  %v5931_v34 = vld [vmem:[#allocation8 + $0xd0] ss:$8 sps:$4 sm:$0xff]  }
 0x116   : > { %2550 = vmatpush1.bf16.msra.mxu0 %v5925_v28 }
 0x117   : > { %2551 = vmatprep.subr.bf16.mxu0 %v5933_v32 }
 0x118   : > { %1606 = vmatpush1.bf16.msra.mxu1 %v5840_v37  ;;  %1523 = vmatmul.mubr.bf16.gmra.mrb[36].mxu0 %v5832_v46  ;;  %v5936_v37 = vld [vmem:[#allocation8 + $0xe4] ss:$8 sps:$4 sm:$0xff]  }
 0x119   : > { %1607 = vmatprep.subr.bf16.mxu1 %v5849_v39  ;;  %1532 = vmatprep.mubr.bf16.mxu0 %v6400_v0  ;;  %v5870_v39 = vld [vmem:[%s6672_s14 + $0x158] ss:$12 sps:$4 sm:$0xff]  }
 0x11a   : > { %2552 = vmatpush1.bf16.msra.mxu0 %v5931_v34  ;;  %v6825_v46 = vld [vmem:[%s6672_s14 + $0x138] ss:$12 sps:$4 sm:$0xff]  }
 0x11b   : > { %1310 = vmatmul.mubr.bf16.gmra.mrb[24].mxu1 %v6757_v42  ;;  %2553 = vmatprep.subr.bf16.mxu0 %v5936_v37 }
 0x11c   : > { %1319 = vmatprep.mubr.bf16.mxu1 %v6760_v43  ;;  %1608 = vmatpush1.bf16.msra.mxu1 %v5847_v44  ;;  %v6817_v44 = vld [vmem:[%s6672_s14 + $0x120] ss:$12 sps:$4 sm:$0xff]  }
 0x11d   : > { %1609 = vmatprep.subr.bf16.mxu1 %v5856_v45  ;;  %v6820_v45 = vld [vmem:[%s6672_s14 + $0x13c] ss:$12 sps:$4 sm:$0xff]  }
 0x11e   : > { %2554 = vmatpush1.bf16.msra.mxu0 %v5934_v38 }
 0x11f   : > { %2555 = vmatprep.subr.bf16.mxu0 %v5939_v40 }
 0x120   : > { %1610 = vmatpush1.bf16.msra.mxu1 %v5854_v49  ;;  %1533 = vmatmul.mubr.bf16.gmra.mrb[40].mxu0 %v5839_v63  ;;  %v5871_v49 = vld [vmem:[#allocation5 + $0x208] ss:$16 sps:$4 sm:$0xff]   ;;  %v5930_v63 = vld [vmem:[#allocation5 + $0x2cc] ss:$16 sps:$4 sm:$0xff]  }
 0x121   : > { %1611 = vmatprep.subr.bf16.mxu1 %v5862_v50  ;;  %1542 = vmatprep.mubr.bf16.mxu0 %v6400_v0  ;;  %v5876_v50 = vld [vmem:[#allocation5 + $0x22c] ss:$16 sps:$4 sm:$0xff]  }
 0x122   : > { %2556 = vmatpush1.bf16.msra.mxu0 %v5937_v41 }
 0x123   : > { %1320 = vmatmul.mubr.bf16.gmra.mrb[28].mxu1 %v6767_v53 }
 0x124   : > { %1329 = vmatprep.mubr.bf16.mxu1 %v6770_v55  ;;  %1612 = vmatpush1.bf16.msra.mxu1 %v5860_v57  ;;  %v5877_v57 = vld [vmem:[#allocation5 + $0x248] ss:$16 sps:$4 sm:$0xff]  }
 0x125   : > { %1613 = vmatprep.subr.bf16.mxu1 %v5869_v58  ;;  %v5888_v58 = vld [vmem:[#allocation5 + $0x26c] ss:$16 sps:$4 sm:$0xff]  }
 0x128   : > { %1614 = vmatpush1.bf16.msra.mxu1 %v5867_v2  ;;  %1543 = vmatmul.mubr.bf16.gmra.mrb[44].mxu0 %v5846_v11 }
 0x129   : > { %1766 = vmatprep.subr.bf16.mxu1 %v5873_v3  ;;  %1552 = vmatprep.mubr.bf16.mxu0 %v6400_v0 }
 0x12b   : > { %1330 = vmatmul.mubr.bf16.gmra.mrb[32].mxu1 %v6777_v7 }
 0x12c   : > { %1339 = vmatprep.mubr.bf16.mxu1 %v6780_v8 }
 0x130   : > { %1553 = vmatmul.mubr.bf16.gmra.mrb[48].mxu0 %v5853_v22 }
 0x131   : > { %1562 = vmatprep.mubr.bf16.mxu0 %v6400_v0 }
 0x133   : > { %1340 = vmatmul.mubr.bf16.gmra.mrb[36].mxu1 %v6787_v16 }
 0x134   : > { %1349 = vmatprep.mubr.bf16.mxu1 %v6790_v17 }
 0x138   : > { %1563 = vmatmul.mubr.bf16.gmra.mrb[52].mxu0 %v5863_v29 }
 0x139   : > { %1572 = vmatprep.mubr.bf16.mxu0 %v6400_v0 }
 0x13b   : > { %1350 = vmatmul.mubr.bf16.gmra.mrb[40].mxu1 %v6797_v25 }
 0x13c   : > { %1359 = vmatprep.mubr.bf16.mxu1 %v6800_v26 }
 0x140   : > { %1573 = vmatmul.mubr.bf16.gmra.mrb[56].mxu0 %v5870_v39 }
 0x143   : > { %1360 = vmatmul.mubr.bf16.gmra.mrb[44].mxu1 %v6807_v35 }
 0x144   : > { %1369 = vmatprep.mubr.bf16.mxu1 %v6810_v36 }
 0x14b   : > { %1370 = vmatmul.mubr.bf16.gmra.mrb[48].mxu1 %v6817_v44 }
 0x14c   : > { %1379 = vmatprep.mubr.bf16.mxu1 %v6820_v45 }
 0x153   : > { %1380 = vmatmul.mubr.bf16.gmra.mrb[52].mxu1 %v6825_v46 }
 0x154   : > { %1389 = vmatprep.mubr.bf16.mxu1 %v6828_v47 }
 0x15b   : > { %1390 = vmatmul.mubr.bf16.gmra.mrb[56].mxu1 %v6833_v48 }
 0x15c   : > { %1615 = vmatprep.mubr.bf16.mxu1 %v6688_v33  ;;  %v5886_v33 = vld [vmem:[#allocation5 + $0x268] ss:$16 sps:$4 sm:$0xff]  }
 0x163   : > { %1616 = vmatmul.mubr.bf16.vlgmr.msra.gmra.mrb[60].mxu1 %v6697_v54  ;;  %v5898_v54 = vld [vmem:[#allocation5 + $0x288] ss:$16 sps:$4 sm:$0xff]  }
 0x164   : > { %1767 = vmatpush1.bf16.msra.mxu1 %v5871_v49  ;;  %1625 = vmatprep.mubr.bf16.mxu1 %v6700_v56  ;;  %v5913_v56 = vld [vmem:[#allocation5 + $0x2a8] ss:$16 sps:$4 sm:$0xff]  }
 0x165   : > { %1768 = vmatprep.subr.bf16.mxu1 %v5876_v50 }
 0x168   : > { %1769 = vmatpush1.bf16.msra.mxu1 %v5874_v51 }
 0x169   : > { %1770 = vmatprep.subr.bf16.mxu1 %v5879_v52  ;;  %v5943_v52 = vld [vmem:[#allocation8 + $0x100] ss:$8 sps:$4 sm:$0xff]  }
 0x16b   : > { %1626 = vmatmul.mubr.bf16.gmra.mrb[64].mxu1 %v6707_v61  ;;  %v5928_v61 = vld [vmem:[#allocation5 + $0x2c8] ss:$16 sps:$4 sm:$0xff]  }
 0x16c   : > { %1635 = vmatprep.mubr.bf16.mxu1 %v6710_v62  ;;  %1771 = vmatpush1.bf16.msra.mxu1 %v5877_v57  ;;  %v5942_v62 = vld [vmem:[#allocation5 + $0x2ec] ss:$16 sps:$4 sm:$0xff]  }
 0x16d   : > { %1772 = vmatprep.subr.bf16.mxu1 %v5888_v58 }
 0x170   : > { %1773 = vmatpush1.bf16.msra.mxu1 %v5886_v33  ;;  %v5948_v33 = vld [vmem:[#allocation8 + $0x114] ss:$8 sps:$4 sm:$0xff]  }
 0x171   : > { %1774 = vmatprep.subr.bf16.mxu1 %v5900_v59 }
 0x173   : > { %1636 = vmatmul.mubr.bf16.gmra.mrb[68].mxu1 %v6717_v5 }
 0x174   : > { %1645 = vmatprep.mubr.bf16.mxu1 %v6720_v6  ;;  %1775 = vmatpush1.bf16.msra.mxu1 %v5898_v54 }
 0x175   : > { %1776 = vmatprep.subr.bf16.mxu1 %v5915_v60 }
 0x178   : > { %1777 = vmatpush1.bf16.msra.mxu1 %v5913_v56 }
 0x179   : > { %1778 = vmatprep.subr.bf16.mxu1 %v5930_v63 }
 0x17b   : > { %1646 = vmatmul.mubr.bf16.gmra.mrb[72].mxu1 %v6727_v12 }
 0x17c   : > { %1655 = vmatprep.mubr.bf16.mxu1 %v6730_v13  ;;  %1779 = vmatpush1.bf16.msra.mxu1 %v5928_v61 }
 0x17d   : > { %1780 = vmatprep.subr.bf16.mxu1 %v5942_v62 }
 0x180   : > { %1781 = vmatpush1.bf16.msra.mxu1 %v5940_v1  ;;  %v5946_v1 = vld [vmem:[#allocation8 + $0x110] ss:$8 sps:$4 sm:$0xff]  }
 0x183   : > { %1656 = vmatmul.mubr.bf16.gmra.mrb[76].mxu1 %v6737_v18  ;;  %v477_v18 = vlaneseq }
 0x184   : > { %1665 = vmatprep.mubr.bf16.mxu1 %v6740_v20 }
 0x18b   : > { %1666 = vmatmul.mubr.bf16.gmra.mrb[80].mxu1 %v6747_v30  ;;  %v6858_v30 = vshrl.u32 %v477_v18, 7 }
 0x18c   : > { %1675 = vmatprep.mubr.bf16.mxu1 %v6750_v31 }
 0x18d   : > { %9812 = vst [vmem:[#allocation17_spill] sm:$0xff] %v6858_v30  ;;  %v9753_v2 = vsub.s32 1, %v6858_v30 }
 0x193   : > { %1676 = vmatmul.mubr.bf16.gmra.mrb[84].mxu1 %v6757_v42 }
 0x194   : > { %1685 = vmatprep.mubr.bf16.mxu1 %v6760_v43 }
 0x19b   : > { %1686 = vmatmul.mubr.bf16.gmra.mrb[88].mxu1 %v6767_v53  ;;  %v479_v53 = vsub.s32 0, %v6858_v30 }
 0x19c   : > { %1695 = vmatprep.mubr.bf16.mxu1 %v6770_v55  ;;  %v6862_v55 = vld [vmem:[#allocation7] sm:$0xf] }
 0x19d   : > { %v6871_v4 = vrot.slane %v6862_v55, %v479_v53  ;;  %v6878_v9 = vrot.slane %v6862_v55, %v9753_v2 }
 0x1a3   : > { %1696 = vmatmul.mubr.bf16.gmra.mrb[92].mxu1 %v6777_v7  ;;  %v1434_v5 = vpop.f32.mrb[0].mxu0 }
 0x1a4   : > { %1705 = vmatprep.mubr.bf16.mxu1 %v6780_v8  ;;  %v1436_v6 = vpop.f32.mrb[1].mxu0  ;;  %v5945_v8 = vld [vmem:[#allocation8 + $0x104] ss:$8 sps:$4 sm:$0xff]  }
 0x1a5   : > { %v1438_v12 = vpop.f32.mrb[2].mxu0  ;;  %2708 = vmatprep.subr.bf16.mxu0 %v5945_v8 }
 0x1a6   : > { %v1440_v13 = vpop.f32.mrb[3].mxu0 }
 0x1ab   : > { %1706 = vmatmul.mubr.bf16.gmra.mrb[96].mxu1 %v6787_v16  ;;  %v1444_v20 = vpop.f32.mrb[4].mxu0 }
 0x1ac   : > { %1715 = vmatprep.mubr.bf16.mxu1 %v6790_v17  ;;  %v1446_v31 = vpop.f32.mrb[5].mxu0 }
 0x1ad   : > { %v1448_v42 = vpop.f32.mrb[6].mxu0 }
 0x1ae   : > { %v1450_v43 = vpop.f32.mrb[7].mxu0 }
 0x1b3   : > { %1716 = vmatmul.mubr.bf16.gmra.mrb[100].mxu1 %v6797_v25  ;;  %v6865_v3 = vpop.f32.mrb[8].mxu0 }
 0x1b4   : > { %1725 = vmatprep.mubr.bf16.mxu1 %v6800_v26  ;;  %v6873_v7 = vpop.f32.mrb[9].mxu0 }
 0x1b5   : > { %v6881_v10 = vpop.f32.mrb[10].mxu0 }
 0x1b6   : > { %v6883_v11 = vpop.f32.mrb[11].mxu0 }
 0x1bb   : > { %1726 = vmatmul.mubr.bf16.gmra.mrb[104].mxu1 %v6807_v35  ;;  %v6889_v26 = vpop.f32.mrb[12].mxu0 }
 0x1bc   : > { %1735 = vmatprep.mubr.bf16.mxu1 %v6810_v36  ;;  %v6892_v28 = vpop.f32.mrb[13].mxu0 }
 0x1bd   : > { %v6895_v32 = vpop.f32.mrb[14].mxu0 }
 0x1be   : > { %v1251_v14 = vpop.f32.mrb[0].mxu1  ;;  %v6897_v36 = vpop.f32.mrb[15].mxu0 }
 0x1bf   : > { %v1252_v15 = vadd.f32 %v1251_v14, %v6871_v4  ;;  %v1253_v16 = vpop.f32.mrb[1].mxu1 }
 0x1c0   : > { %v1254_v17 = vadd.f32 %v1253_v16, %v6878_v9  ;;  %v1255_v19 = vpop.f32.mrb[2].mxu1 }
 0x1c1   : > { %v1256_v21 = vadd.f32 %v1255_v19, %v6871_v4  ;;  %v1435_v22 = vadd.f32 %v1434_v5, %v1252_v15  ;;  %v1257_v23 = vpop.f32.mrb[3].mxu1  ;;  %v5949_v15 = vld [vmem:[#allocation8 + $0x120] ss:$8 sps:$4 sm:$0xff]  }
 0x1c2   : > { %v1258_v24 = vadd.f32 %v1257_v23, %v6878_v9  ;;  %v1437_v25 = vadd.f32 %v1436_v6, %v1254_v17 }
 0x1c3   : > { %v1439_v27 = vadd.f32 %v1438_v12, %v1256_v21  ;;  %1736 = vmatmul.mubr.bf16.gmra.mrb[108].mxu1 %v6817_v44  ;;  %v1949_v34 = vmax.f32 %v1435_v22, 0.0  ;;  %v6903_v60 = vpop.f32.mrb[16].mxu0  ;;  %v5954_v21 = vld [vmem:[#allocation8 + $0x134] ss:$8 sps:$4 sm:$0xff]  }
 0x1c4   : > { %v1441_v29 = vadd.f32 %v1440_v13, %v1258_v24  ;;  %1745 = vmatprep.mubr.bf16.mxu1 %v6820_v45  ;;  %v1950_v37 = vmax.f32 %v1437_v25, 0.0  ;;  %v6906_v63 = vpop.f32.mrb[17].mxu0  ;;  %v5951_v13 = vld [vmem:[#allocation8 + $0x124] ss:$8 sps:$4 sm:$0xff]  }
 0x1c5   : > { %v1953_v35 = vmax.f32 %v1439_v27, 0.0  ;;  %v6909_v62 = vpop.f32.mrb[18].mxu0 }
 0x1c6   : > { %v1954_v38 = vmax.f32 %v1441_v29, 0.0  ;;  %v1261_v39 = vpop.f32.mrb[4].mxu1  ;;  %v6911_v12 = vpop.f32.mrb[19].mxu0 }
 0x1c7   : > { %v2133_v40 = vpack.c.bf16 %v1953_v35, %v1949_v34  ;;  %v1262_v41 = vadd.f32 %v1261_v39, %v6871_v4  ;;  %v1263_v49 = vpop.f32.mrb[5].mxu1  ;;  %v5952_v34 = vld [vmem:[#allocation8 + $0x130] ss:$8 sps:$4 sm:$0xff]  }
 0x1c8   : > { %v2134_v50 = vpack.c.bf16 %v1954_v38, %v1950_v37  ;;  %v1264_v44 = vadd.f32 %v1263_v49, %v6878_v9  ;;  %v1265_v51 = vpop.f32.mrb[6].mxu1  ;;  %v5957_v38 = vld [vmem:[#allocation8 + $0x144] ss:$8 sps:$4 sm:$0xff]  }
 0x1c9   : > { %v1266_v45 = vadd.f32 %v1265_v51, %v6871_v4  ;;  %v1445_v57 = vadd.f32 %v1444_v20, %v1262_v41  ;;  %v1267_v58 = vpop.f32.mrb[7].mxu1  ;;  %v5955_v51 = vld [vmem:[#allocation8 + $0x140] ss:$8 sps:$4 sm:$0xff]  }
 0x1ca   : > { %v1268_v59 = vadd.f32 %v1267_v58, %v6878_v9  ;;  %v1447_v54 = vadd.f32 %v1446_v31, %v1264_v44  ;;  %2557 = vmatprep.mubr.bf16.mxu0 %v2134_v50  ;;  %v5960_v58 = vld [vmem:[#allocation8 + $0x154] ss:$8 sps:$4 sm:$0xff]  }
 0x1cb   : > { %v1449_v56 = vadd.f32 %v1448_v42, %v1266_v45  ;;  %1746 = vmatmul.mubr.bf16.gmra.mrb[112].mxu1 %v6825_v46  ;;  %2558 = vmatmul.mubr.bf16.vlgmr.msra.gmra.mrb[60].mxu0 %v2133_v40  ;;  %v1957_v5 = vmax.f32 %v1445_v57, 0.0  ;;  %v6919_v24 = vpop.f32.mrb[20].mxu0 }
 0x1cc   : > { %v1451_v61 = vadd.f32 %v1450_v43, %v1268_v59  ;;  %1755 = vmatprep.mubr.bf16.mxu1 %v6828_v47  ;;  %2709 = vmatpush1.bf16.msra.mxu0 %v5943_v52  ;;  %v1958_v18 = vmax.f32 %v1447_v54, 0.0  ;;  %v6923_v27 = vpop.f32.mrb[21].mxu0 }
 0x1cd   : > { %v1961_v6 = vmax.f32 %v1449_v56, 0.0  ;;  %2710 = vmatprep.subr.bf16.mxu0 %v5948_v33 }
 0x1ce   : > { %v1962_v20 = vmax.f32 %v1451_v61, 0.0  ;;  %v1271_v31 = vpop.f32.mrb[8].mxu1  ;;  %v6111_v61 = vld [vmem:[%s6672_s14 + $0x8] ss:$12 sps:$4 sm:$0xff]  }
 0x1cf   : > { %v2137_v46 = vpack.c.bf16 %v1961_v6, %v1957_v5  ;;  %v1272_v42 = vadd.f32 %v1271_v31, %v6871_v4  ;;  %v1273_v8 = vpop.f32.mrb[9].mxu1  ;;  %v5958_v6 = vld [vmem:[#allocation8 + $0x150] ss:$8 sps:$4 sm:$0xff]  }
 0x1d0   : > { %v2138_v43 = vpack.c.bf16 %v1962_v20, %v1958_v18  ;;  %v1274_v47 = vadd.f32 %v1273_v8, %v6878_v9  ;;  %v1275_v14 = vpop.f32.mrb[10].mxu1  ;;  %2711 = vmatpush1.bf16.msra.mxu0 %v5946_v1  ;;  %v5963_v20 = vld [vmem:[#allocation8 + $0x164] ss:$8 sps:$4 sm:$0xff]  }
 0x1d1   : > { %v1276_v16 = vadd.f32 %v1275_v14, %v6871_v4  ;;  %v1455_v17 = vadd.f32 %v6865_v3, %v1272_v42  ;;  %v1277_v19 = vpop.f32.mrb[11].mxu1  ;;  %2712 = vmatprep.subr.bf16.mxu0 %v5951_v13  ;;  %v6927_v3 = vpop.f32.mrb[22].mxu0 }
 0x1d2   : > { %v1278_v22 = vadd.f32 %v1277_v19, %v6878_v9  ;;  %v1457_v23 = vadd.f32 %v6873_v7, %v1274_v47  ;;  %2567 = vmatprep.mubr.bf16.mxu0 %v2138_v43  ;;  %v6929_v37 = vpop.f32.mrb[23].mxu0 }
 0x1d3   : > { %v1459_v25 = vadd.f32 %v6881_v10, %v1276_v16  ;;  %1756 = vmatmul.mubr.bf16.gmra.mrb[116].mxu1 %v6833_v48  ;;  %2568 = vmatmul.mubr.bf16.gmra.mrb[64].mxu0 %v2137_v46  ;;  %v1965_v35 = vmax.f32 %v1455_v17, 0.0  ;;  %v6937_v54 = vpop.f32.mrb[24].mxu0 }
 0x1d4   : > { %v1461_v29 = vadd.f32 %v6883_v11, %v1278_v22  ;;  %1798 = vmatprep.mubr.bf16.mxu1 %v6400_v0  ;;  %2713 = vmatpush1.bf16.msra.mxu0 %v5949_v15  ;;  %v1966_v10 = vmax.f32 %v1457_v23, 0.0  ;;  %v6941_v1 = vpop.f32.mrb[25].mxu0  ;;  %v5961_v15 = vld [vmem:[#allocation8 + $0x160] ss:$8 sps:$4 sm:$0xff]  }
 0x1d5   : > { %v1969_v7 = vmax.f32 %v1459_v25, 0.0  ;;  %2714 = vmatprep.subr.bf16.mxu0 %v5954_v21  ;;  %v5966_v21 = vld [vmem:[#allocation8 + $0x174] ss:$8 sps:$4 sm:$0xff]  }
 0x1d6   : > { %v1970_v39 = vmax.f32 %v1461_v29, 0.0  ;;  %v1281_v48 = vpop.f32.mrb[12].mxu1 }
 0x1d7   : > { %v2141_v40 = vpack.c.bf16 %v1969_v7, %v1965_v35  ;;  %v1282_v41 = vadd.f32 %v1281_v48, %v6871_v4  ;;  %v1283_v49 = vpop.f32.mrb[13].mxu1  ;;  %v5969_v48 = vld [vmem:[#allocation8 + $0x184] ss:$8 sps:$4 sm:$0xff]  }
 0x1d8   : > { %v2142_v11 = vpack.c.bf16 %v1970_v39, %v1966_v10  ;;  %v1284_v50 = vadd.f32 %v1283_v49, %v6878_v9  ;;  %v1285_v44 = vpop.f32.mrb[14].mxu1  ;;  %2715 = vmatpush1.bf16.msra.mxu0 %v5952_v34  ;;  %v6112_v34 = vld [vmem:[%s6672_s14 + $0x20] ss:$12 sps:$4 sm:$0xff]  }
 0x1d9   : > { %v1286_v52 = vadd.f32 %v1285_v44, %v6871_v4  ;;  %v1465_v45 = vadd.f32 %v6889_v26, %v1282_v41  ;;  %v1287_v57 = vpop.f32.mrb[15].mxu1  ;;  %2716 = vmatprep.subr.bf16.mxu0 %v5957_v38  ;;  %v6945_v26 = vpop.f32.mrb[26].mxu0  ;;  %v5964_v38 = vld [vmem:[#allocation8 + $0x170] ss:$8 sps:$4 sm:$0xff]  }
 0x1da   : > { %v1288_v33 = vadd.f32 %v1287_v57, %v6878_v9  ;;  %v1467_v59 = vadd.f32 %v6892_v28, %v1284_v50  ;;  %2577 = vmatprep.mubr.bf16.mxu0 %v2142_v11  ;;  %v6947_v18 = vpop.f32.mrb[27].mxu0 }
 0x1db   : > { %v1469_v56 = vadd.f32 %v6895_v32, %v1286_v52  ;;  %1799 = vmatmul.mubr.bf16.vlgmr.msra.gmra.mrb[60].mxu1 %v6111_v61  ;;  %2578 = vmatmul.mubr.bf16.gmra.mrb[68].mxu0 %v2141_v40  ;;  %v1973_v13 = vmax.f32 %v1465_v45, 0.0  ;;  %v6955_v25 = vpop.f32.mrb[28].mxu0  ;;  %v5967_v52 = vld [vmem:[#allocation8 + $0x180] ss:$8 sps:$4 sm:$0xff]  }
 0x1dc   : > { %v1471_v5 = vadd.f32 %v6897_v36, %v1288_v33  ;;  %1808 = vmatprep.mubr.bf16.mxu1 %v6400_v0  ;;  %2717 = vmatpush1.bf16.msra.mxu0 %v5955_v51  ;;  %v1974_v32 = vmax.f32 %v1467_v59, 0.0  ;;  %v6959_v35 = vpop.f32.mrb[29].mxu0  ;;  %v5972_v33 = vld [vmem:[#allocation8 + $0x194] ss:$8 sps:$4 sm:$0xff]  }
 0x1dd   : > { %v1977_v28 = vmax.f32 %v1469_v56, 0.0  ;;  %2718 = vmatprep.subr.bf16.mxu0 %v5960_v58 }
 0x1de   : > { %v1978_v31 = vmax.f32 %v1471_v5, 0.0  ;;  %v1291_v46 = vpop.f32.mrb[16].mxu1 }
 0x1df   : > { %v2145_v42 = vpack.c.bf16 %v1977_v28, %v1973_v13  ;;  %v1292_v8 = vadd.f32 %v1291_v46, %v6871_v4  ;;  %v1293_v43 = vpop.f32.mrb[17].mxu1  ;;  %v5975_v46 = vld [vmem:[#allocation8 + $0x1a4] ss:$8 sps:$4 sm:$0xff]  }
 0x1e0   : > { %v2146_v36 = vpack.c.bf16 %v1978_v31, %v1974_v32  ;;  %v1294_v47 = vadd.f32 %v1293_v43, %v6878_v9  ;;  %v1295_v14 = vpop.f32.mrb[18].mxu1  ;;  %2719 = vmatpush1.bf16.msra.mxu0 %v5958_v6  ;;  %v6113_v6 = vld [vmem:[%s6672_s14 + $0x38] ss:$12 sps:$4 sm:$0xff]  }
 0x1e1   : > { %v1296_v16 = vadd.f32 %v1295_v14, %v6871_v4  ;;  %v1475_v17 = vadd.f32 %v6903_v60, %v1292_v8  ;;  %v1297_v19 = vpop.f32.mrb[19].mxu1  ;;  %2720 = vmatprep.subr.bf16.mxu0 %v5963_v20  ;;  %v6963_v60 = vpop.f32.mrb[30].mxu0  ;;  %v5970_v20 = vld [vmem:[#allocation8 + $0x190] ss:$8 sps:$4 sm:$0xff]  }
 0x1e2   : > { %v1298_v22 = vadd.f32 %v1297_v19, %v6878_v9  ;;  %v1477_v23 = vadd.f32 %v6906_v63, %v1294_v47  ;;  %2587 = vmatprep.mubr.bf16.mxu0 %v2146_v36  ;;  %v6965_v39 = vpop.f32.mrb[31].mxu0 }
 0x1e3   : > { %v1479_v29 = vadd.f32 %v6909_v62, %v1296_v16  ;;  %1809 = vmatmul.mubr.bf16.gmra.mrb[64].mxu1 %v6112_v34  ;;  %2588 = vmatmul.mubr.bf16.gmra.mrb[72].mxu0 %v2145_v42  ;;  %v1981_v10 = vmax.f32 %v1475_v17, 0.0  ;;  %v6973_v61 = vpop.f32.mrb[32].mxu0  ;;  %v5973_v16 = vld [vmem:[#allocation8 + $0x1a0] ss:$8 sps:$4 sm:$0xff]  }
 0x1e4   : > { %v1481_v7 = vadd.f32 %v6911_v12, %v1298_v22  ;;  %1818 = vmatprep.mubr.bf16.mxu1 %v6400_v0  ;;  %2721 = vmatpush1.bf16.msra.mxu0 %v5961_v15  ;;  %v1982_v62 = vmax.f32 %v1477_v23, 0.0  ;;  %v6977_v13 = vpop.f32.mrb[33].mxu0  ;;  %v5978_v22 = vld [vmem:[#allocation8 + $0x1b4] ss:$8 sps:$4 sm:$0xff]  }
 0x1e5   : > { %v1985_v63 = vmax.f32 %v1479_v29, 0.0  ;;  %2722 = vmatprep.subr.bf16.mxu0 %v5966_v21 }
 0x1e6   : > { %v1986_v40 = vmax.f32 %v1481_v7, 0.0  ;;  %v1301_v41 = vpop.f32.mrb[20].mxu1 }
 0x1e7   : > { %v2149_v49 = vpack.c.bf16 %v1985_v63, %v1981_v10  ;;  %v1302_v11 = vadd.f32 %v1301_v41, %v6871_v4  ;;  %v1303_v50 = vpop.f32.mrb[21].mxu1  ;;  %v5981_v41 = vld [vmem:[#allocation8 + $0x1c4] ss:$8 sps:$4 sm:$0xff]  }
 0x1e8   : > { %v2150_v12 = vpack.c.bf16 %v1986_v40, %v1982_v62  ;;  %v1304_v44 = vadd.f32 %v1303_v50, %v6878_v9  ;;  %v1305_v51 = vpop.f32.mrb[22].mxu1  ;;  %2723 = vmatpush1.bf16.msra.mxu0 %v5964_v38  ;;  %v6114_v38 = vld [vmem:[%s6672_s14 + $0x50] ss:$12 sps:$4 sm:$0xff]  }
 0x1e9   : > { %v1306_v45 = vadd.f32 %v1305_v51, %v6871_v4  ;;  %v1485_v57 = vadd.f32 %v6919_v24, %v1302_v11  ;;  %v1307_v58 = vpop.f32.mrb[23].mxu1  ;;  %2724 = vmatprep.subr.bf16.mxu0 %v5969_v48  ;;  %v6981_v24 = vpop.f32.mrb[34].mxu0  ;;  %v5976_v48 = vld [vmem:[#allocation8 + $0x1b0] ss:$8 sps:$4 sm:$0xff]  }
 0x1ea   : > { %v1308_v59 = vadd.f32 %v1307_v58, %v6878_v9  ;;  %v1487_v56 = vadd.f32 %v6923_v27, %v1304_v44  ;;  %2597 = vmatprep.mubr.bf16.mxu0 %v2150_v12  ;;  %v6983_v31 = vpop.f32.mrb[35].mxu0 }
 0x1eb   : > { %v1489_v5 = vadd.f32 %v6927_v3, %v1306_v45  ;;  %1819 = vmatmul.mubr.bf16.gmra.mrb[68].mxu1 %v6113_v6  ;;  %2598 = vmatmul.mubr.bf16.gmra.mrb[76].mxu0 %v2149_v49  ;;  %v1989_v32 = vmax.f32 %v1485_v57, 0.0  ;;  %v6991_v34 = vpop.f32.mrb[36].mxu0  ;;  %v5979_v45 = vld [vmem:[#allocation8 + $0x1c0] ss:$8 sps:$4 sm:$0xff]  }
 0x1ec   : > { %v1491_v28 = vadd.f32 %v6929_v37, %v1308_v59  ;;  %1828 = vmatprep.mubr.bf16.mxu1 %v6400_v0  ;;  %2725 = vmatpush1.bf16.msra.mxu0 %v5967_v52  ;;  %v1990_v3 = vmax.f32 %v1487_v56, 0.0  ;;  %v6995_v10 = vpop.f32.mrb[37].mxu0  ;;  %v5984_v59 = vld [vmem:[#allocation8 + $0x1d4] ss:$8 sps:$4 sm:$0xff]  }
 0x1ed   : > { %v1993_v27 = vmax.f32 %v1489_v5, 0.0  ;;  %2726 = vmatprep.subr.bf16.mxu0 %v5972_v33 }
 0x1ee   : > { %v1994_v42 = vmax.f32 %v1491_v28, 0.0  ;;  %v1311_v8 = vpop.f32.mrb[24].mxu1 }
 0x1ef   : > { %v2153_v43 = vpack.c.bf16 %v1993_v27, %v1989_v32  ;;  %v1312_v36 = vadd.f32 %v1311_v8, %v6871_v4  ;;  %v1313_v47 = vpop.f32.mrb[25].mxu1  ;;  %v5987_v8 = vld [vmem:[#allocation8 + $0x1e4] ss:$8 sps:$4 sm:$0xff]  }
 0x1f0   : > { %v2154_v37 = vpack.c.bf16 %v1994_v42, %v1990_v3  ;;  %v1314_v14 = vadd.f32 %v1313_v47, %v6878_v9  ;;  %v1315_v15 = vpop.f32.mrb[26].mxu1  ;;  %2727 = vmatpush1.bf16.msra.mxu0 %v5970_v20  ;;  %v6115_v20 = vld [vmem:[%s6672_s14 + $0x68] ss:$12 sps:$4 sm:$0xff]  }
 0x1f1   : > { %v1316_v17 = vadd.f32 %v1315_v15, %v6871_v4  ;;  %v1495_v19 = vadd.f32 %v6937_v54, %v1312_v36  ;;  %v1317_v21 = vpop.f32.mrb[27].mxu1  ;;  %2728 = vmatprep.subr.bf16.mxu0 %v5975_v46  ;;  %v6999_v54 = vpop.f32.mrb[38].mxu0  ;;  %v5982_v46 = vld [vmem:[#allocation8 + $0x1d0] ss:$8 sps:$4 sm:$0xff]  }
 0x1f2   : > { %v1318_v23 = vadd.f32 %v1317_v21, %v6878_v9  ;;  %v1497_v29 = vadd.f32 %v6941_v1, %v1314_v14  ;;  %2607 = vmatprep.mubr.bf16.mxu0 %v2154_v37  ;;  %v7001_v40 = vpop.f32.mrb[39].mxu0 }
 0x1f3   : > { %v1499_v7 = vadd.f32 %v6945_v26, %v1316_v17  ;;  %1829 = vmatmul.mubr.bf16.gmra.mrb[72].mxu1 %v6114_v38  ;;  %2608 = vmatmul.mubr.bf16.gmra.mrb[80].mxu0 %v2153_v43  ;;  %v1997_v62 = vmax.f32 %v1495_v19, 0.0  ;;  %v7009_v6 = vpop.f32.mrb[40].mxu0  ;;  %v5985_v17 = vld [vmem:[#allocation8 + $0x1e0] ss:$8 sps:$4 sm:$0xff]  }
 0x1f4   : > { %v1501_v63 = vadd.f32 %v6947_v18, %v1318_v23  ;;  %1838 = vmatprep.mubr.bf16.mxu1 %v6400_v0  ;;  %2729 = vmatpush1.bf16.msra.mxu0 %v5973_v16  ;;  %v1998_v26 = vmax.f32 %v1497_v29, 0.0  ;;  %v7013_v32 = vpop.f32.mrb[41].mxu0 }
 0x1f5   : > { %v2001_v1 = vmax.f32 %v1499_v7, 0.0  ;;  %2730 = vmatprep.subr.bf16.mxu0 %v5978_v22 }
 0x1f6   : > { %v2002_v49 = vmax.f32 %v1501_v63, 0.0  ;;  %v1321_v11 = vpop.f32.mrb[28].mxu1  ;;  %v6116_v63 = vld [vmem:[%s6672_s14 + $0x80] ss:$12 sps:$4 sm:$0xff]  }
 0x1f7   : > { %v2157_v50 = vpack.c.bf16 %v2001_v1, %v1997_v62  ;;  %v1322_v12 = vadd.f32 %v1321_v11, %v6871_v4  ;;  %v1323_v44 = vpop.f32.mrb[29].mxu1 }
 0x1f8   : > { %v2158_v18 = vpack.c.bf16 %v2002_v49, %v1998_v26  ;;  %v1324_v51 = vadd.f32 %v1323_v44, %v6878_v9  ;;  %v1325_v52 = vpop.f32.mrb[30].mxu1  ;;  %2731 = vmatpush1.bf16.msra.mxu0 %v5976_v48 }
 0x1f9   : > { %v1326_v57 = vadd.f32 %v1325_v52, %v6871_v4  ;;  %v1505_v58 = vadd.f32 %v6955_v25, %v1322_v12  ;;  %v1327_v33 = vpop.f32.mrb[31].mxu1  ;;  %2732 = vmatprep.subr.bf16.mxu0 %v5981_v41  ;;  %v7017_v25 = vpop.f32.mrb[42].mxu0 }
 0x1fa   : > { %v1328_v56 = vadd.f32 %v1327_v33, %v6878_v9  ;;  %v1507_v5 = vadd.f32 %v6959_v35, %v1324_v51  ;;  %2617 = vmatprep.mubr.bf16.mxu0 %v2158_v18  ;;  %v7019_v42 = vpop.f32.mrb[43].mxu0 }
 0x1fb   : > { %v1509_v28 = vadd.f32 %v6963_v60, %v1326_v57  ;;  %1839 = vmatmul.mubr.bf16.gmra.mrb[76].mxu1 %v6115_v20  ;;  %2618 = vmatmul.mubr.bf16.gmra.mrb[84].mxu0 %v2157_v50  ;;  %v2005_v3 = vmax.f32 %v1505_v58, 0.0  ;;  %v7027_v7 = vpop.f32.mrb[44].mxu0 }
 0x1fc   : > { %v1511_v27 = vadd.f32 %v6965_v39, %v1328_v56  ;;  %1848 = vmatprep.mubr.bf16.mxu1 %v6400_v0  ;;  %2733 = vmatpush1.bf16.msra.mxu0 %v5979_v45  ;;  %v2006_v60 = vmax.f32 %v1507_v5, 0.0  ;;  %v7031_v48 = vpop.f32.mrb[45].mxu0  ;;  %v6117_v56 = vld [vmem:[%s6672_s14 + $0x98] ss:$12 sps:$4 sm:$0xff]  }
 0x1fd   : > { %v2009_v35 = vmax.f32 %v1509_v28, 0.0  ;;  %2734 = vmatprep.subr.bf16.mxu0 %v5984_v59 }
 0x1fe   : > { %v2010_v43 = vmax.f32 %v1511_v27, 0.0  ;;  %v1331_v36 = vpop.f32.mrb[32].mxu1 }
 0x1ff   : > { %v2161_v47 = vpack.c.bf16 %v2009_v35, %v2005_v3  ;;  %v1332_v37 = vadd.f32 %v1331_v36, %v6871_v4  ;;  %v1333_v39 = vpop.f32.mrb[33].mxu1 }
 0x200   : > { %v2162_v14 = vpack.c.bf16 %v2010_v43, %v2006_v60  ;;  %v1334_v15 = vadd.f32 %v1333_v39, %v6878_v9  ;;  %v1335_v16 = vpop.f32.mrb[34].mxu1  ;;  %2735 = vmatpush1.bf16.msra.mxu0 %v5982_v46 }
 0x201   : > { %v1336_v19 = vadd.f32 %v1335_v16, %v6871_v4  ;;  %v1515_v21 = vadd.f32 %v6973_v61, %v1332_v37  ;;  %v1337_v22 = vpop.f32.mrb[35].mxu1  ;;  %2736 = vmatprep.subr.bf16.mxu0 %v5987_v8  ;;  %v7035_v61 = vpop.f32.mrb[46].mxu0 }
 0x202   : > { %v1338_v23 = vadd.f32 %v1337_v22, %v6878_v9  ;;  %v1517_v29 = vadd.f32 %v6977_v13, %v1334_v15  ;;  %2627 = vmatprep.mubr.bf16.mxu0 %v2162_v14  ;;  %v7037_v13 = vpop.f32.mrb[47].mxu0 }
 0x203   : > { %v1519_v38 = vadd.f32 %v6981_v24, %v1336_v19  ;;  %1849 = vmatmul.mubr.bf16.gmra.mrb[80].mxu1 %v6116_v63  ;;  %2628 = vmatmul.mubr.bf16.gmra.mrb[88].mxu0 %v2161_v47  ;;  %v2013_v1 = vmax.f32 %v1515_v21, 0.0  ;;  %v7045_v33 = vpop.f32.mrb[48].mxu0  ;;  %v6118_v19 = vld [vmem:[%s6672_s14 + $0xb0] ss:$12 sps:$4 sm:$0xff]  }
 0x204   : > { %v1521_v62 = vadd.f32 %v6983_v31, %v1338_v23  ;;  %1858 = vmatprep.mubr.bf16.mxu1 %v6400_v0  ;;  %2737 = vmatpush1.bf16.msra.mxu0 %v5985_v17  ;;  %v2014_v26 = vmax.f32 %v1517_v29, 0.0  ;;  %v7049_v5 = vpop.f32.mrb[49].mxu0 }
 0x205   : > { %v2017_v41 = vmax.f32 %v1519_v38, 0.0 }
 0x206   : > { %v2018_v49 = vmax.f32 %v1521_v62, 0.0  ;;  %v1341_v24 = vpop.f32.mrb[36].mxu1 }
 0x207   : > { %v2165_v11 = vpack.c.bf16 %v2017_v41, %v2013_v1  ;;  %v1342_v50 = vadd.f32 %v1341_v24, %v6871_v4  ;;  %v1343_v12 = vpop.f32.mrb[37].mxu1 }
 0x208   : > { %v2166_v44 = vpack.c.bf16 %v2018_v49, %v2014_v26  ;;  %v1344_v31 = vadd.f32 %v1343_v12, %v6878_v9  ;;  %v1345_v18 = vpop.f32.mrb[38].mxu1 }
 0x209   : > { %v1346_v51 = vadd.f32 %v1345_v18, %v6871_v4  ;;  %v1525_v52 = vadd.f32 %v6991_v34, %v1342_v50  ;;  %v1347_v45 = vpop.f32.mrb[39].mxu1  ;;  %v7053_v34 = vpop.f32.mrb[50].mxu0 }
 0x20a   : > { %v1348_v57 = vadd.f32 %v1347_v45, %v6878_v9  ;;  %v1527_v58 = vadd.f32 %v6995_v10, %v1344_v31  ;;  %2637 = vmatprep.mubr.bf16.mxu0 %v2166_v44  ;;  %v7055_v46 = vpop.f32.mrb[51].mxu0 }
 0x20b   : > { %v1529_v59 = vadd.f32 %v6999_v54, %v1346_v51  ;;  %1859 = vmatmul.mubr.bf16.gmra.mrb[84].mxu1 %v6117_v56  ;;  %2638 = vmatmul.mubr.bf16.gmra.mrb[92].mxu0 %v2165_v11  ;;  %v2021_v20 = vmax.f32 %v1525_v52, 0.0  ;;  %v7063_v16 = vpop.f32.mrb[52].mxu0  ;;  %v6119_v51 = vld [vmem:[%s6672_s14 + $0xc8] ss:$12 sps:$4 sm:$0xff]  }
 0x20c   : > { %v1531_v28 = vadd.f32 %v7001_v40, %v1348_v57  ;;  %1868 = vmatprep.mubr.bf16.mxu1 %v6400_v0  ;;  %v2022_v10 = vmax.f32 %v1527_v58, 0.0  ;;  %v7067_v21 = vpop.f32.mrb[53].mxu0 }
 0x20d   : > { %v2025_v27 = vmax.f32 %v1529_v59, 0.0 }
 0x20e   : > { %v2026_v3 = vmax.f32 %v1531_v28, 0.0  ;;  %v1351_v35 = vpop.f32.mrb[40].mxu1 }
 0x20f   : > { %v2169_v54 = vpack.c.bf16 %v2025_v27, %v2021_v20  ;;  %v1352_v8 = vadd.f32 %v1351_v35, %v6871_v4  ;;  %v1353_v60 = vpop.f32.mrb[41].mxu1 }
 0x210   : > { %v2170_v43 = vpack.c.bf16 %v2026_v3, %v2022_v10  ;;  %v1354_v36 = vadd.f32 %v1353_v60, %v6878_v9  ;;  %v1355_v40 = vpop.f32.mrb[42].mxu1 }
 0x211   : > { %v1356_v47 = vadd.f32 %v1355_v40, %v6871_v4  ;;  %v1535_v37 = vadd.f32 %v7009_v6, %v1352_v8  ;;  %v1357_v39 = vpop.f32.mrb[43].mxu1  ;;  %v7071_v6 = vpop.f32.mrb[54].mxu0  ;;  %v6120_v40 = vld [vmem:[%s6672_s14 + $0xe0] ss:$12 sps:$4 sm:$0xff]  }
 0x212   : > { %v1358_v14 = vadd.f32 %v1357_v39, %v6878_v9  ;;  %v1537_v15 = vadd.f32 %v7013_v32, %v1354_v36  ;;  %2647 = vmatprep.mubr.bf16.mxu0 %v2170_v43  ;;  %v7073_v38 = vpop.f32.mrb[55].mxu0 }
 0x213   : > { %v1539_v17 = vadd.f32 %v7017_v25, %v1356_v47  ;;  %1869 = vmatmul.mubr.bf16.gmra.mrb[88].mxu1 %v6118_v19  ;;  %2648 = vmatmul.mubr.bf16.gmra.mrb[96].mxu0 %v2169_v54  ;;  %v2029_v23 = vmax.f32 %v1535_v37, 0.0  ;;  %v7081_v31 = vpop.f32.mrb[56].mxu0 }
 0x214   : > { %v1541_v22 = vadd.f32 %v7019_v42, %v1358_v14  ;;  %1878 = vmatprep.mubr.bf16.mxu1 %v6400_v0  ;;  %v2030_v32 = vmax.f32 %v1537_v15, 0.0  ;;  %v7085_v52 = vpop.f32.mrb[57].mxu0 }
 0x215   : > { %v2033_v29 = vmax.f32 %v1539_v17, 0.0 }
 0x216   : > { %v2034_v63 = vmax.f32 %v1541_v22, 0.0  ;;  %v1361_v62 = vpop.f32.mrb[44].mxu1 }
 0x217   : > { %v2173_v25 = vpack.c.bf16 %v2033_v29, %v2029_v23  ;;  %v1362_v1 = vadd.f32 %v1361_v62, %v6871_v4  ;;  %v1363_v41 = vpop.f32.mrb[45].mxu1 }
 0x218   : > { %v2174_v26 = vpack.c.bf16 %v2034_v63, %v2030_v32  ;;  %v1364_v49 = vadd.f32 %v1363_v41, %v6878_v9  ;;  %v1365_v42 = vpop.f32.mrb[46].mxu1 }
 0x219   : > { %v1366_v24 = vadd.f32 %v1365_v42, %v6871_v4  ;;  %v1545_v11 = vadd.f32 %v7027_v7, %v1362_v1  ;;  %v1367_v50 = vpop.f32.mrb[47].mxu1  ;;  %v7089_v7 = vpop.f32.mrb[58].mxu0  ;;  %v6121_v1 = vld [vmem:[%s6672_s14 + $0xf8] ss:$12 sps:$4 sm:$0xff]  }
 0x21a   : > { %v1368_v12 = vadd.f32 %v1367_v50, %v6878_v9  ;;  %v1547_v44 = vadd.f32 %v7031_v48, %v1364_v49  ;;  %2657 = vmatprep.mubr.bf16.mxu0 %v2174_v26  ;;  %v7091_v59 = vpop.f32.mrb[59].mxu0 }
 0x21b   : > { %v1549_v18 = vadd.f32 %v7035_v61, %v1366_v24  ;;  %1879 = vmatmul.mubr.bf16.gmra.mrb[92].mxu1 %v6119_v51  ;;  %2658 = vmatmul.mubr.bf16.gmra.mrb[100].mxu0 %v2173_v25  ;;  %v2037_v57 = vmax.f32 %v1545_v11, 0.0 }
 0x21c   : > { %v1551_v45 = vadd.f32 %v7037_v13, %v1368_v12  ;;  %1888 = vmatprep.mubr.bf16.mxu1 %v6400_v0  ;;  %v2038_v48 = vmax.f32 %v1547_v44, 0.0 }
 0x21d   : > { %v2041_v58 = vmax.f32 %v1549_v18, 0.0 }
 0x21e   : > { %v2042_v56 = vmax.f32 %v1551_v45, 0.0  ;;  %v1371_v28 = vpop.f32.mrb[48].mxu1 }
 0x21f   : > { %v2177_v61 = vpack.c.bf16 %v2041_v58, %v2037_v57  ;;  %v1372_v20 = vadd.f32 %v1371_v28, %v6871_v4  ;;  %v1373_v27 = vpop.f32.mrb[49].mxu1 }
 0x220   : > { %v2178_v10 = vpack.c.bf16 %v2042_v56, %v2038_v48  ;;  %v1374_v3 = vadd.f32 %v1373_v27, %v6878_v9  ;;  %v1375_v13 = vpop.f32.mrb[50].mxu1  ;;  %v6122_v48 = vld [vmem:[%s6672_s14 + $0x110] ss:$12 sps:$4 sm:$0xff]   ;;  %v6123_v27 = vld [vmem:[%s6672_s14 + $0x128] ss:$12 sps:$4 sm:$0xff]  }
 0x221   : > { %v1376_v35 = vadd.f32 %v1375_v13, %v6871_v4  ;;  %v1555_v54 = vadd.f32 %v7045_v33, %v1372_v20  ;;  %v1377_v8 = vpop.f32.mrb[51].mxu1  ;;  %v5990_v56 = vld [vmem:[#allocation8 + $0x1f4] ss:$8 sps:$4 sm:$0xff]   ;;  %v491_v13 = vsub.s32 3, %v6858_v30 }
 0x222   : > { %v1378_v60 = vadd.f32 %v1377_v8, %v6878_v9  ;;  %v1557_v43 = vadd.f32 %v7049_v5, %v1374_v3  ;;  %2667 = vmatprep.mubr.bf16.mxu0 %v2178_v10  ;;  %2738 = vmatprep.subr.bf16.mxu0 %v5990_v56  ;;  %v6125_v10 = vld [vmem:[%s6672_s14 + $0x158] ss:$12 sps:$4 sm:$0xff]   ;;  %v487_v3 = vsub.s32 2, %v6858_v30 }
 0x223   : > { %v1559_v36 = vadd.f32 %v7053_v34, %v1376_v35  ;;  %1889 = vmatmul.mubr.bf16.gmra.mrb[96].mxu1 %v6120_v40  ;;  %2668 = vmatmul.mubr.bf16.gmra.mrb[104].mxu0 %v2177_v61  ;;  %v2045_v37 = vmax.f32 %v1555_v54, 0.0  ;;  %v7134_v54 = vrot.slane %v6862_v55, %v491_v13 }
 0x224   : > { %v1561_v47 = vadd.f32 %v7055_v46, %v1378_v60  ;;  %1898 = vmatprep.mubr.bf16.mxu1 %v6400_v0  ;;  %v2046_v14 = vmax.f32 %v1557_v43, 0.0  ;;  %v7131_v35 = vrot.slane %v6862_v55, %v487_v3 }
 0x225   : > { %v2049_v39 = vmax.f32 %v1559_v36, 0.0 }
 0x226   : > { %v2050_v33 = vmax.f32 %v1561_v47, 0.0  ;;  %v1381_v15 = vpop.f32.mrb[52].mxu1 }
 0x227   : > { %v2181_v17 = vpack.c.bf16 %v2049_v39, %v2045_v37  ;;  %v1382_v19 = vadd.f32 %v1381_v15, %v6871_v4  ;;  %v1383_v5 = vpop.f32.mrb[53].mxu1 }
 0x228   : > { %v2182_v22 = vpack.c.bf16 %v2050_v33, %v2046_v14  ;;  %v1384_v34 = vadd.f32 %v1383_v5, %v6878_v9  ;;  %v1385_v23 = vpop.f32.mrb[54].mxu1 }
 0x229   : > { %v1386_v29 = vadd.f32 %v1385_v23, %v6871_v4  ;;  %v1565_v46 = vadd.f32 %v7063_v16, %v1382_v19  ;;  %v1387_v32 = vpop.f32.mrb[55].mxu1 }
 0x22a   : > { %v1388_v63 = vadd.f32 %v1387_v32, %v6878_v9  ;;  %v1567_v62 = vadd.f32 %v7067_v21, %v1384_v34  ;;  %2677 = vmatprep.mubr.bf16.mxu0 %v2182_v22 }
 0x22b   : > { %v1569_v25 = vadd.f32 %v7071_v6, %v1386_v29  ;;  %1899 = vmatmul.mubr.bf16.gmra.mrb[100].mxu1 %v6121_v1  ;;  %2678 = vmatmul.mubr.bf16.gmra.mrb[108].mxu0 %v2181_v17  ;;  %v2053_v26 = vmax.f32 %v1565_v46, 0.0 }
 0x22c   : > { %v1571_v41 = vadd.f32 %v7073_v38, %v1388_v63  ;;  %1908 = vmatprep.mubr.bf16.mxu1 %v6400_v0  ;;  %v2054_v42 = vmax.f32 %v1567_v62, 0.0 }
 0x22d   : > { %v2057_v49 = vmax.f32 %v1569_v25, 0.0 }
 0x22e   : > { %v2058_v16 = vmax.f32 %v1571_v41, 0.0  ;;  %v1391_v24 = vpop.f32.mrb[56].mxu1 }
 0x22f   : > { %v2185_v11 = vpack.c.bf16 %v2057_v49, %v2053_v26  ;;  %v1392_v50 = vadd.f32 %v1391_v24, %v6871_v4  ;;  %v1393_v21 = vpop.f32.mrb[57].mxu1 }
 0x230   : > { %v2186_v12 = vpack.c.bf16 %v2058_v16, %v2054_v42  ;;  %v1394_v6 = vadd.f32 %v1393_v21, %v6878_v9  ;;  %v1395_v44 = vpop.f32.mrb[58].mxu1 }
 0x231   : > { %v1396_v18 = vadd.f32 %v1395_v44, %v6871_v4  ;;  %v1575_v38 = vadd.f32 %v7081_v31, %v1392_v50  ;;  %v1397_v51 = vpop.f32.mrb[59].mxu1  ;;  %v5988_v4 = vld [vmem:[#allocation8 + $0x1f0] ss:$8 sps:$4 sm:$0xff]  }
 0x232   : > { %v1398_v45 = vadd.f32 %v1397_v51, %v6878_v9  ;;  %v1577_v57 = vadd.f32 %v7085_v52, %v1394_v6  ;;  %2687 = vmatprep.mubr.bf16.mxu0 %v2186_v12  ;;  %2739 = vmatpush1.bf16.msra.mxu0 %v5988_v4 }
 0x233   : > { %v1579_v58 = vadd.f32 %v7089_v7, %v1396_v18  ;;  %1909 = vmatmul.mubr.bf16.gmra.mrb[104].mxu1 %v6122_v48  ;;  %2688 = vmatmul.mubr.bf16.gmra.mrb[112].mxu0 %v2185_v11  ;;  %v2061_v31 = vmax.f32 %v1575_v38, 0.0 }
 0x234   : > { %v1581_v28 = vadd.f32 %v7091_v59, %v1398_v45  ;;  %1918 = vmatprep.mubr.bf16.mxu1 %v6400_v0  ;;  %v2062_v9 = vmax.f32 %v1577_v57, 0.0  ;;  %v6124_v59 = vld [vmem:[%s6672_s14 + $0x140] ss:$12 sps:$4 sm:$0xff]   ;;  %s6301_s14 = sshll.u32 %s6407_s15, 4  ;;  %s6302_s14 = int_to_ptr.vmem [resolvable:$false] %s6301_s14 }
 0x235   : > { %v2065_v61 = vmax.f32 %v1579_v58, 0.0  ;;  %s6303_s26 = scalar_lea.vmem %s6302_s14, 15360  ;;  %p6304_p8 = scmp.lt.s32.totalorder %s9690_s27, %s6302_s14 }
 0x236   : > { %v2066_v52 = vmax.f32 %v1581_v28, 0.0  ;;  %p6305_p7 = scmp.lt.s32.totalorder %s6303_s26, %s6297_s1 }
 0x237   : > { %v2189_v20 = vpack.c.bf16 %v2065_v61, %v2061_v31 }
 0x238   : > { %v2190_v7 = vpack.c.bf16 %v2066_v52, %v2062_v9  ;;  %p6306_p9 = por %p6305_p7, %p6304_p8 }
 0x23a   : > { %2697 = vmatprep.mubr.bf16.mxu0 %v2190_v7  ;;  %p6307_p0 = pnand %p6306_p9, %p6300_p2 }
 0x23b   : > { %1919 = vmatmul.mubr.bf16.gmra.mrb[108].mxu1 %v6123_v27  ;;  %2698 = vmatmul.mubr.bf16.gmra.mrb[116].mxu0 %v2189_v20 }
 0x23c   : > { %1928 = vmatprep.mubr.bf16.mxu1 %v6400_v0 }
 0x243   : > { %1929 = vmatmul.mubr.bf16.gmra.mrb[112].mxu1 %v6124_v59 }
 0x244   : > { %1938 = vmatprep.mubr.bf16.mxu1 %v6400_v0 }
 0x24b   : > { %1939 = vmatmul.mubr.bf16.gmra.mrb[116].mxu1 %v6125_v10 }
 0x2ae   : > { %v1800_v8 = vpop.f32.mrb[60].mxu1 }
 0x2af   : > { %v5329_v60 = vadd.f32 %v1800_v8, %v7131_v35  ;;  %v1802_v43 = vpop.f32.mrb[61].mxu1 }
 0x2b0   : > { %v5330_v36 = vadd.f32 %v1802_v43, %v7134_v54  ;;  %v1804_v40 = vpop.f32.mrb[62].mxu1 }
 0x2b1   : > { %v5331_v0 = vadd.f32 %v1804_v40, %v7131_v35  ;;  %v1806_v47 = vpop.f32.mrb[63].mxu1  ;;  %v1951_v39 = vmax.f32 %v5329_v60, 0.0 }
 0x2b2   : > { %v5332_v37 = vadd.f32 %v1806_v47, %v7134_v54  ;;  %v1952_v33 = vmax.f32 %v5330_v36, 0.0 }
 0x2b3   : > { %v1955_v14 = vmax.f32 %v5331_v0, 0.0 }
 0x2b4   : > { %v1956_v15 = vmax.f32 %v5332_v37, 0.0 }
 0x2b5   : > { %v2135_v17 = vpack.c.bf16 %v1955_v14, %v1951_v39 }
 0x2b6   : > { %v2136_v19 = vpack.c.bf16 %v1956_v15, %v1952_v33  ;;  %v1810_v55 = vpop.f32.mrb[64].mxu1 }
 0x2b7   : > { %v5333_v5 = vadd.f32 %v1810_v55, %v7131_v35  ;;  %v1812_v22 = vpop.f32.mrb[65].mxu1 }
 0x2b8   : > { %v5334_v34 = vadd.f32 %v1812_v22, %v7134_v54  ;;  %v1814_v23 = vpop.f32.mrb[66].mxu1  ;;  %2740 = vmatprep.mubr.bf16.mxu0 %v2136_v19 }
 0x2b9   : > { %v5335_v29 = vadd.f32 %v1814_v23, %v7131_v35  ;;  %v1816_v46 = vpop.f32.mrb[67].mxu1  ;;  %2741 = vmatmul.mubr.bf16.vlgmr.msra.gmra.mrb[60].mxu0 %v2135_v17  ;;  %v1959_v63 = vmax.f32 %v5333_v5, 0.0 }
 0x2ba   : > { %v5336_v32 = vadd.f32 %v1816_v46, %v7134_v54  ;;  %v1960_v25 = vmax.f32 %v5334_v34, 0.0 }
 0x2bb   : > { %v1963_v62 = vmax.f32 %v5335_v29, 0.0 }
 0x2bc   : > { %v1964_v1 = vmax.f32 %v5336_v32, 0.0 }
 0x2bd   : > { %v2139_v41 = vpack.c.bf16 %v1963_v62, %v1959_v63 }
 0x2be   : > { %v2140_v26 = vpack.c.bf16 %v1964_v1, %v1960_v25  ;;  %v1820_v49 = vpop.f32.mrb[68].mxu1 }
 0x2bf   : > { %v5337_v42 = vadd.f32 %v1820_v49, %v7131_v35  ;;  %v1822_v16 = vpop.f32.mrb[69].mxu1 }
 0x2c0   : > { %v5338_v24 = vadd.f32 %v1822_v16, %v7134_v54  ;;  %v1824_v11 = vpop.f32.mrb[70].mxu1  ;;  %2750 = vmatprep.mubr.bf16.mxu0 %v2140_v26 }
 0x2c1   : > { %v5339_v50 = vadd.f32 %v1824_v11, %v7131_v35  ;;  %v1826_v21 = vpop.f32.mrb[71].mxu1  ;;  %2751 = vmatmul.mubr.bf16.gmra.mrb[64].mxu0 %v2139_v41  ;;  %v1967_v6 = vmax.f32 %v5337_v42, 0.0 }
 0x2c2   : > { %v5340_v12 = vadd.f32 %v1826_v21, %v7134_v54  ;;  %v1968_v18 = vmax.f32 %v5338_v24, 0.0 }
 0x2c3   : > { %v1971_v44 = vmax.f32 %v5339_v50, 0.0 }
 0x2c4   : > { %v1972_v38 = vmax.f32 %v5340_v12, 0.0 }
 0x2c5   : > { %v2143_v51 = vpack.c.bf16 %v1971_v44, %v1967_v6 }
 0x2c6   : > { %v2144_v45 = vpack.c.bf16 %v1972_v38, %v1968_v18  ;;  %v1830_v57 = vpop.f32.mrb[72].mxu1 }
 0x2c7   : > { %v5341_v58 = vadd.f32 %v1830_v57, %v7131_v35  ;;  %v1832_v48 = vpop.f32.mrb[73].mxu1 }
 0x2c8   : > { %v5342_v56 = vadd.f32 %v1832_v48, %v7134_v54  ;;  %v1834_v28 = vpop.f32.mrb[74].mxu1  ;;  %2760 = vmatprep.mubr.bf16.mxu0 %v2144_v45 }
 0x2c9   : > { %v5343_v4 = vadd.f32 %v1834_v28, %v7131_v35  ;;  %v1836_v31 = vpop.f32.mrb[75].mxu1  ;;  %2761 = vmatmul.mubr.bf16.gmra.mrb[68].mxu0 %v2143_v51  ;;  %v1975_v9 = vmax.f32 %v5341_v58, 0.0 }
 0x2ca   : > { %v5344_v61 = vadd.f32 %v1836_v31, %v7134_v54  ;;  %v1976_v20 = vmax.f32 %v5342_v56, 0.0 }
 0x2cb   : > { %v1979_v52 = vmax.f32 %v5343_v4, 0.0 }
 0x2cc   : > { %v1980_v7 = vmax.f32 %v5344_v61, 0.0 }
 0x2cd   : > { %v2147_v27 = vpack.c.bf16 %v1979_v52, %v1975_v9 }
 0x2ce   : > { %v2148_v59 = vpack.c.bf16 %v1980_v7, %v1976_v20  ;;  %v1840_v10 = vpop.f32.mrb[76].mxu1 }
 0x2cf   : > { %v5345_v3 = vadd.f32 %v1840_v10, %v7131_v35  ;;  %v1842_v13 = vpop.f32.mrb[77].mxu1 }
 0x2d0   : > { %v5346_v8 = vadd.f32 %v1842_v13, %v7134_v54  ;;  %v1844_v60 = vpop.f32.mrb[78].mxu1  ;;  %2770 = vmatprep.mubr.bf16.mxu0 %v2148_v59 }
 0x2d1   : > { %v5347_v43 = vadd.f32 %v1844_v60, %v7131_v35  ;;  %v1846_v36 = vpop.f32.mrb[79].mxu1  ;;  %2771 = vmatmul.mubr.bf16.gmra.mrb[72].mxu0 %v2147_v27  ;;  %v1983_v0 = vmax.f32 %v5345_v3, 0.0 }
 0x2d2   : > { %v5348_v40 = vadd.f32 %v1846_v36, %v7134_v54  ;;  %v1984_v37 = vmax.f32 %v5346_v8, 0.0 }
 0x2d3   : > { %v1987_v47 = vmax.f32 %v5347_v43, 0.0 }
 0x2d4   : > { %v1988_v39 = vmax.f32 %v5348_v40, 0.0 }
 0x2d5   : > { %v2151_v14 = vpack.c.bf16 %v1987_v47, %v1983_v0 }
 0x2d6   : > { %v2152_v33 = vpack.c.bf16 %v1988_v39, %v1984_v37  ;;  %v1850_v15 = vpop.f32.mrb[80].mxu1 }
 0x2d7   : > { %v5349_v17 = vadd.f32 %v1850_v15, %v7131_v35  ;;  %v1852_v19 = vpop.f32.mrb[81].mxu1 }
 0x2d8   : > { %v5350_v55 = vadd.f32 %v1852_v19, %v7134_v54  ;;  %v1854_v5 = vpop.f32.mrb[82].mxu1  ;;  %2780 = vmatprep.mubr.bf16.mxu0 %v2152_v33 }
 0x2d9   : > { %v5351_v22 = vadd.f32 %v1854_v5, %v7131_v35  ;;  %v1856_v34 = vpop.f32.mrb[83].mxu1  ;;  %2781 = vmatmul.mubr.bf16.gmra.mrb[76].mxu0 %v2151_v14  ;;  %v1991_v29 = vmax.f32 %v5349_v17, 0.0 }
 0x2da   : > { %v5352_v23 = vadd.f32 %v1856_v34, %v7134_v54  ;;  %v1992_v32 = vmax.f32 %v5350_v55, 0.0 }
 0x2db   : > { %v1995_v46 = vmax.f32 %v5351_v22, 0.0 }
 0x2dc   : > { %v1996_v63 = vmax.f32 %v5352_v23, 0.0 }
 0x2dd   : > { %v2155_v62 = vpack.c.bf16 %v1995_v46, %v1991_v29 }
 0x2de   : > { %v2156_v25 = vpack.c.bf16 %v1996_v63, %v1992_v32  ;;  %v1860_v1 = vpop.f32.mrb[84].mxu1 }
 0x2df   : > { %v5353_v41 = vadd.f32 %v1860_v1, %v7131_v35  ;;  %v1862_v26 = vpop.f32.mrb[85].mxu1 }
 0x2e0   : > { %v5354_v49 = vadd.f32 %v1862_v26, %v7134_v54  ;;  %v1864_v42 = vpop.f32.mrb[86].mxu1  ;;  %2790 = vmatprep.mubr.bf16.mxu0 %v2156_v25 }
 0x2e1   : > { %v5355_v16 = vadd.f32 %v1864_v42, %v7131_v35  ;;  %v1866_v24 = vpop.f32.mrb[87].mxu1  ;;  %2791 = vmatmul.mubr.bf16.gmra.mrb[80].mxu0 %v2155_v62  ;;  %v1999_v50 = vmax.f32 %v5353_v41, 0.0 }
 0x2e2   : > { %v5356_v11 = vadd.f32 %v1866_v24, %v7134_v54  ;;  %v2000_v12 = vmax.f32 %v5354_v49, 0.0 }
 0x2e3   : > { %v2003_v21 = vmax.f32 %v5355_v16, 0.0 }
 0x2e4   : > { %v2004_v6 = vmax.f32 %v5356_v11, 0.0 }
 0x2e5   : > { %v2159_v44 = vpack.c.bf16 %v2003_v21, %v1999_v50 }
 0x2e6   : > { %v2160_v18 = vpack.c.bf16 %v2004_v6, %v2000_v12  ;;  %v1870_v38 = vpop.f32.mrb[88].mxu1 }
 0x2e7   : > { %v5357_v51 = vadd.f32 %v1870_v38, %v7131_v35  ;;  %v1872_v45 = vpop.f32.mrb[89].mxu1 }
 0x2e8   : > { %v5358_v57 = vadd.f32 %v1872_v45, %v7134_v54  ;;  %v1874_v58 = vpop.f32.mrb[90].mxu1  ;;  %2800 = vmatprep.mubr.bf16.mxu0 %v2160_v18 }
 0x2e9   : > { %v5359_v48 = vadd.f32 %v1874_v58, %v7131_v35  ;;  %v1876_v56 = vpop.f32.mrb[91].mxu1  ;;  %2801 = vmatmul.mubr.bf16.gmra.mrb[84].mxu0 %v2159_v44  ;;  %v2007_v4 = vmax.f32 %v5357_v51, 0.0 }
 0x2ea   : > { %v5360_v28 = vadd.f32 %v1876_v56, %v7134_v54  ;;  %v2008_v61 = vmax.f32 %v5358_v57, 0.0 }
 0x2eb   : > { %v2011_v31 = vmax.f32 %v5359_v48, 0.0 }
 0x2ec   : > { %v2012_v9 = vmax.f32 %v5360_v28, 0.0 }
 0x2ed   : > { %v2163_v52 = vpack.c.bf16 %v2011_v31, %v2007_v4 }
 0x2ee   : > { %v2164_v20 = vpack.c.bf16 %v2012_v9, %v2008_v61  ;;  %v1880_v7 = vpop.f32.mrb[92].mxu1 }
 0x2ef   : > { %v5361_v27 = vadd.f32 %v1880_v7, %v7131_v35  ;;  %v1882_v59 = vpop.f32.mrb[93].mxu1 }
 0x2f0   : > { %v5362_v10 = vadd.f32 %v1882_v59, %v7134_v54  ;;  %v1884_v3 = vpop.f32.mrb[94].mxu1  ;;  %2810 = vmatprep.mubr.bf16.mxu0 %v2164_v20 }
 0x2f1   : > { %v5363_v13 = vadd.f32 %v1884_v3, %v7131_v35  ;;  %v1886_v8 = vpop.f32.mrb[95].mxu1  ;;  %2811 = vmatmul.mubr.bf16.gmra.mrb[88].mxu0 %v2163_v52  ;;  %v2015_v43 = vmax.f32 %v5361_v27, 0.0 }
 0x2f2   : > { %v5364_v60 = vadd.f32 %v1886_v8, %v7134_v54  ;;  %v2016_v40 = vmax.f32 %v5362_v10, 0.0 }
 0x2f3   : > { %v2019_v36 = vmax.f32 %v5363_v13, 0.0 }
 0x2f4   : > { %v2020_v0 = vmax.f32 %v5364_v60, 0.0 }
 0x2f5   : > { %v2167_v47 = vpack.c.bf16 %v2019_v36, %v2015_v43 }
 0x2f6   : > { %v2168_v37 = vpack.c.bf16 %v2020_v0, %v2016_v40  ;;  %v1890_v39 = vpop.f32.mrb[96].mxu1 }
 0x2f7   : > { %v5365_v14 = vadd.f32 %v1890_v39, %v7131_v35  ;;  %v1892_v33 = vpop.f32.mrb[97].mxu1 }
 0x2f8   : > { %v5366_v15 = vadd.f32 %v1892_v33, %v7134_v54  ;;  %v1894_v17 = vpop.f32.mrb[98].mxu1  ;;  %2820 = vmatprep.mubr.bf16.mxu0 %v2168_v37 }
 0x2f9   : > { %v5367_v19 = vadd.f32 %v1894_v17, %v7131_v35  ;;  %v1896_v55 = vpop.f32.mrb[99].mxu1  ;;  %2821 = vmatmul.mubr.bf16.gmra.mrb[92].mxu0 %v2167_v47  ;;  %v2023_v22 = vmax.f32 %v5365_v14, 0.0 }
 0x2fa   : > { %v5368_v5 = vadd.f32 %v1896_v55, %v7134_v54  ;;  %v2024_v23 = vmax.f32 %v5366_v15, 0.0 }
 0x2fb   : > { %v2027_v34 = vmax.f32 %v5367_v19, 0.0 }
 0x2fc   : > { %v2028_v29 = vmax.f32 %v5368_v5, 0.0 }
 0x2fd   : > { %v2171_v46 = vpack.c.bf16 %v2027_v34, %v2023_v22 }
 0x2fe   : > { %v2172_v32 = vpack.c.bf16 %v2028_v29, %v2024_v23  ;;  %v1900_v63 = vpop.f32.mrb[100].mxu1 }
 0x2ff   : > { %v5369_v62 = vadd.f32 %v1900_v63, %v7131_v35  ;;  %v1902_v25 = vpop.f32.mrb[101].mxu1 }
 0x300   : > { %v5370_v1 = vadd.f32 %v1902_v25, %v7134_v54  ;;  %v1904_v41 = vpop.f32.mrb[102].mxu1  ;;  %2830 = vmatprep.mubr.bf16.mxu0 %v2172_v32 }
 0x301   : > { %v5371_v26 = vadd.f32 %v1904_v41, %v7131_v35  ;;  %v1906_v49 = vpop.f32.mrb[103].mxu1  ;;  %2831 = vmatmul.mubr.bf16.gmra.mrb[96].mxu0 %v2171_v46  ;;  %v2031_v16 = vmax.f32 %v5369_v62, 0.0 }
 0x302   : > { %v5372_v42 = vadd.f32 %v1906_v49, %v7134_v54  ;;  %v2032_v11 = vmax.f32 %v5370_v1, 0.0 }
 0x303   : > { %v2035_v24 = vmax.f32 %v5371_v26, 0.0 }
 0x304   : > { %v2036_v50 = vmax.f32 %v5372_v42, 0.0 }
 0x305   : > { %v2175_v21 = vpack.c.bf16 %v2035_v24, %v2031_v16 }
 0x306   : > { %v2176_v12 = vpack.c.bf16 %v2036_v50, %v2032_v11  ;;  %v1910_v6 = vpop.f32.mrb[104].mxu1  ;;  %v2193_v50 = vld [vmem:[#allocation10] sm:$0x3] }
 0x307   : > { %v5373_v44 = vadd.f32 %v1910_v6, %v7131_v35  ;;  %v1912_v18 = vpop.f32.mrb[105].mxu1 }
 0x308   : > { %v5374_v38 = vadd.f32 %v1912_v18, %v7134_v54  ;;  %v1914_v51 = vpop.f32.mrb[106].mxu1  ;;  %2840 = vmatprep.mubr.bf16.mxu0 %v2176_v12 }
 0x309   : > { %v5375_v45 = vadd.f32 %v1914_v51, %v7131_v35  ;;  %v1916_v57 = vpop.f32.mrb[107].mxu1  ;;  %2841 = vmatmul.mubr.bf16.gmra.mrb[100].mxu0 %v2175_v21  ;;  %v2039_v48 = vmax.f32 %v5373_v44, 0.0  ;;  %v7199_v21 = vrot.slane %v2193_v50, %v479_v53 }
 0x30a   : > { %v5376_v58 = vadd.f32 %v1916_v57, %v7134_v54  ;;  %v2040_v28 = vmax.f32 %v5374_v38, 0.0 }
 0x30b   : > { %v2043_v56 = vmax.f32 %v5375_v45, 0.0 }
 0x30c   : > { %v2044_v4 = vmax.f32 %v5376_v58, 0.0 }
 0x30d   : > { %v2179_v31 = vpack.c.bf16 %v2043_v56, %v2039_v48 }
 0x30e   : > { %v2180_v61 = vpack.c.bf16 %v2044_v4, %v2040_v28  ;;  %v1920_v9 = vpop.f32.mrb[108].mxu1 }
 0x30f   : > { %v5377_v52 = vadd.f32 %v1920_v9, %v7131_v35  ;;  %v1922_v20 = vpop.f32.mrb[109].mxu1 }
 0x310   : > { %v5378_v7 = vadd.f32 %v1922_v20, %v7134_v54  ;;  %v1924_v27 = vpop.f32.mrb[110].mxu1  ;;  %2850 = vmatprep.mubr.bf16.mxu0 %v2180_v61 }
 0x311   : > { %v5379_v59 = vadd.f32 %v1924_v27, %v7131_v35  ;;  %v1926_v10 = vpop.f32.mrb[111].mxu1  ;;  %2851 = vmatmul.mubr.bf16.gmra.mrb[104].mxu0 %v2179_v31  ;;  %v2047_v13 = vmax.f32 %v5377_v52, 0.0 }
 0x312   : > { %v5380_v3 = vadd.f32 %v1926_v10, %v7134_v54  ;;  %v2048_v60 = vmax.f32 %v5378_v7, 0.0 }
 0x313   : > { %v2051_v8 = vmax.f32 %v5379_v59, 0.0 }
 0x314   : > { %v2052_v43 = vmax.f32 %v5380_v3, 0.0 }
 0x315   : > { %v2183_v36 = vpack.c.bf16 %v2051_v8, %v2047_v13 }
 0x316   : > { %v2184_v40 = vpack.c.bf16 %v2052_v43, %v2048_v60  ;;  %v1930_v0 = vpop.f32.mrb[112].mxu1 }
 0x317   : > { %v5381_v47 = vadd.f32 %v1930_v0, %v7131_v35  ;;  %v1932_v37 = vpop.f32.mrb[113].mxu1 }
 0x318   : > { %v5382_v39 = vadd.f32 %v1932_v37, %v7134_v54  ;;  %v1934_v14 = vpop.f32.mrb[114].mxu1  ;;  %2860 = vmatprep.mubr.bf16.mxu0 %v2184_v40 }
 0x319   : > { %v5383_v33 = vadd.f32 %v1934_v14, %v7131_v35  ;;  %v1936_v15 = vpop.f32.mrb[115].mxu1  ;;  %2861 = vmatmul.mubr.bf16.gmra.mrb[108].mxu0 %v2183_v36  ;;  %v2055_v19 = vmax.f32 %v5381_v47, 0.0 }
 0x31a   : > { %v5384_v17 = vadd.f32 %v1936_v15, %v7134_v54  ;;  %v2056_v5 = vmax.f32 %v5382_v39, 0.0 }
 0x31b   : > { %v2059_v55 = vmax.f32 %v5383_v33, 0.0 }
 0x31c   : > { %v2060_v22 = vmax.f32 %v5384_v17, 0.0 }
 0x31d   : > { %v2187_v34 = vpack.c.bf16 %v2059_v55, %v2055_v19 }
 0x31e   : > { %v2188_v23 = vpack.c.bf16 %v2060_v22, %v2056_v5  ;;  %v1940_v29 = vpop.f32.mrb[116].mxu1 }
 0x31f   : > { %v5385_v46 = vadd.f32 %v1940_v29, %v7131_v35  ;;  %v1942_v32 = vpop.f32.mrb[117].mxu1 }
 0x320   : > { %v5386_v63 = vadd.f32 %v1942_v32, %v7134_v54  ;;  %v1944_v62 = vpop.f32.mrb[118].mxu1  ;;  %2870 = vmatprep.mubr.bf16.mxu0 %v2188_v23 }
 0x321   : > { %v5387_v25 = vadd.f32 %v1944_v62, %v7131_v35  ;;  %v1946_v1 = vpop.f32.mrb[119].mxu1  ;;  %2871 = vmatmul.mubr.bf16.gmra.mrb[112].mxu0 %v2187_v34  ;;  %v2063_v26 = vmax.f32 %v5385_v46, 0.0 }
 0x322   : > { %v5388_v41 = vadd.f32 %v1946_v1, %v7134_v54  ;;  %v2064_v42 = vmax.f32 %v5386_v63, 0.0 }
 0x323   : > { %v2067_v49 = vmax.f32 %v5387_v25, 0.0 }
 0x324   : > { %v2068_v16 = vmax.f32 %v5388_v41, 0.0 }
 0x325   : > { %v2191_v24 = vpack.c.bf16 %v2067_v49, %v2063_v26 }
 0x326   : > { %v2192_v11 = vpack.c.bf16 %v2068_v16, %v2064_v42 }
 0x328   : > { %2880 = vmatprep.mubr.bf16.mxu0 %v2192_v11 }
 0x329   : > { %2881 = vmatmul.mubr.bf16.gmra.mrb[116].mxu0 %v2191_v24 }
 0x38c   : > { %v2742_v12 = vpop.f32.mrb[60].mxu0 }
 0x38d   : > { %v7202_v35 = vadd.f32 %v2742_v12, %v7199_v21  ;;  %v7204_v6 = vpop.f32.mrb[61].mxu0 }
 0x38e   : > { %9814 = vst [vmem:[#allocation19_spill] sm:$0xff] %v7204_v6  ;;  %v2746_v54 = vpop.f32.mrb[62].mxu0 }
 0x38f   : > { %9813 = vst [vmem:[#allocation18_spill] sm:$0xff] %v7202_v35  ;;  %4785 = vst [vmem:[%s7206_s28] sm:$0xff] %v7202_v35  ;;  %v7211_v44 = vadd.f32 %v2746_v54, %v7199_v21  ;;  %v7213_v18 = vpop.f32.mrb[63].mxu0  ;;  %2921 = vrot.lane.b32.xlu0 %v7202_v35, %s6401_s30 }
 0x390   : > { %9816 = vst [vmem:[#allocation21_spill] sm:$0xff] %v7213_v18 }
 0x391   : > { %9815 = vst [vmem:[#allocation20_spill] sm:$0xff] %v7211_v44  ;;  %4787 = vst [vmem:[%s7206_s28 + $0x10] sm:$0xff] %v7211_v44  ;;  %3043 = vrot.lane.b32.xlu1 %v7211_v44, %s6402_s11 }
 0x393   : > { %3041 = vrot.lane.b32.xlu0 %v7202_v35, %s6402_s11 }
 0x394   : > { %v2752_v53 = vpop.f32.mrb[64].mxu0 }
 0x395   : > { %v7224_v38 = vadd.f32 %v2752_v53, %v7199_v21  ;;  %v7226_v51 = vpop.f32.mrb[65].mxu0  ;;  %3163 = vrot.lane.b32.xlu1 %v7211_v44, %s6403_s24 }
 0x396   : > { %9817 = vst [vmem:[#allocation22_spill] sm:$0xff] %v7226_v51  ;;  %v2756_v45 = vpop.f32.mrb[66].mxu0 }
 0x397   : > { %4789 = vst [vmem:[%s7206_s28 + $0x20] sm:$0xff] %v7224_v38  ;;  %v7233_v57 = vadd.f32 %v2756_v45, %v7199_v21  ;;  %v7235_v58 = vpop.f32.mrb[67].mxu0  ;;  %3161 = vrot.lane.b32.xlu0 %v7202_v35, %s6403_s24 }
 0x398   : > { %9818 = vst [vmem:[#allocation23_spill] sm:$0xff] %v7235_v58 }
 0x399   : > { %4791 = vst [vmem:[%s7206_s28 + $0x30] sm:$0xff] %v7233_v57  ;;  %2925 = vrot.lane.b32.xlu1 %v7224_v38, %s6401_s30 }
 0x39b   : > { %2923 = vrot.lane.b32.xlu0 %v7211_v44, %s6401_s30 }
 0x39c   : > { %v2762_v48 = vpop.f32.mrb[68].mxu0 }
 0x39d   : > { %v7246_v56 = vadd.f32 %v2762_v48, %v7199_v21  ;;  %v7248_v28 = vpop.f32.mrb[69].mxu0  ;;  %2927 = vrot.lane.b32.xlu1 %v7233_v57, %s6401_s30 }
 0x39e   : > { %9819 = vst [vmem:[#allocation24_spill] sm:$0xff] %v7248_v28  ;;  %v2766_v4 = vpop.f32.mrb[70].mxu0 }
 0x39f   : > { %4793 = vst [vmem:[%s7206_s28 + $0x40] sm:$0xff] %v7246_v56  ;;  %v7255_v31 = vadd.f32 %v2766_v4, %v7199_v21  ;;  %v7257_v61 = vpop.f32.mrb[71].mxu0  ;;  %3045 = vrot.lane.b32.xlu0 %v7224_v38, %s6402_s11 }
 0x3a0   : > { %9820 = vst [vmem:[#allocation25_spill] sm:$0xff] %v7257_v61 }
 0x3a1   : > { %4795 = vst [vmem:[%s7206_s28 + $0x50] sm:$0xff] %v7255_v31  ;;  %3047 = vrot.lane.b32.xlu1 %v7233_v57, %s6402_s11 }
 0x3a3   : > { %3165 = vrot.lane.b32.xlu0 %v7224_v38, %s6403_s24 }
 0x3a4   : > { %v2772_v9 = vpop.f32.mrb[72].mxu0 }
 0x3a5   : > { %v7268_v52 = vadd.f32 %v2772_v9, %v7199_v21  ;;  %v7270_v20 = vpop.f32.mrb[73].mxu0  ;;  %3167 = vrot.lane.b32.xlu1 %v7233_v57, %s6403_s24 }
 0x3a6   : > { %9821 = vst [vmem:[#allocation26_spill] sm:$0xff] %v7270_v20  ;;  %v2776_v7 = vpop.f32.mrb[74].mxu0 }
 0x3a7   : > { %4797 = vst [vmem:[%s7206_s28 + $0x60] sm:$0xff] %v7268_v52  ;;  %v7277_v27 = vadd.f32 %v2776_v7, %v7199_v21  ;;  %v7279_v59 = vpop.f32.mrb[75].mxu0  ;;  %2929 = vrot.lane.b32.xlu0 %v7246_v56, %s6401_s30 }
 0x3a8   : > { %9822 = vst [vmem:[#allocation27_spill] sm:$0xff] %v7279_v59 }
 0x3a9   : > { %4799 = vst [vmem:[%s7206_s28 + $0x70] sm:$0xff] %v7277_v27  ;;  %2931 = vrot.lane.b32.xlu1 %v7255_v31, %s6401_s30 }
 0x3ab   : > { %3049 = vrot.lane.b32.xlu0 %v7246_v56, %s6402_s11 }
 0x3ac   : > { %v2782_v10 = vpop.f32.mrb[76].mxu0 }
 0x3ad   : > { %v7290_v3 = vadd.f32 %v2782_v10, %v7199_v21  ;;  %v7292_v13 = vpop.f32.mrb[77].mxu0  ;;  %3051 = vrot.lane.b32.xlu1 %v7255_v31, %s6402_s11 }
 0x3ae   : > { %9823 = vst [vmem:[#allocation28_spill] sm:$0xff] %v7292_v13  ;;  %v2786_v8 = vpop.f32.mrb[78].mxu0 }
 0x3af   : > { %4801 = vst [vmem:[%s7206_s28 + $0x80] sm:$0xff] %v7290_v3  ;;  %v7299_v60 = vadd.f32 %v2786_v8, %v7199_v21  ;;  %v7301_v43 = vpop.f32.mrb[79].mxu0  ;;  %3169 = vrot.lane.b32.xlu0 %v7246_v56, %s6403_s24 }
 0x3b0   : > { %9824 = vst [vmem:[#allocation29_spill] sm:$0xff] %v7301_v43 }
 0x3b1   : > { %4803 = vst [vmem:[%s7206_s28 + $0x90] sm:$0xff] %v7299_v60  ;;  %3171 = vrot.lane.b32.xlu1 %v7255_v31, %s6403_s24 }
 0x3b3   : > { %2933 = vrot.lane.b32.xlu0 %v7268_v52, %s6401_s30 }
 0x3b4   : > { %v2792_v36 = vpop.f32.mrb[80].mxu0 }
 0x3b5   : > { %v7312_v40 = vadd.f32 %v2792_v36, %v7199_v21  ;;  %v7314_v0 = vpop.f32.mrb[81].mxu0  ;;  %2935 = vrot.lane.b32.xlu1 %v7277_v27, %s6401_s30 }
 0x3b6   : > { %9825 = vst [vmem:[#allocation30_spill] sm:$0xff] %v7314_v0  ;;  %v2796_v47 = vpop.f32.mrb[82].mxu0 }
 0x3b7   : > { %4805 = vst [vmem:[%s7206_s28 + $0xa0] sm:$0xff] %v7312_v40  ;;  %v7321_v37 = vadd.f32 %v2796_v47, %v7199_v21  ;;  %v7323_v39 = vpop.f32.mrb[83].mxu0  ;;  %3053 = vrot.lane.b32.xlu0 %v7268_v52, %s6402_s11 }
 0x3b8   : > { %9826 = vst [vmem:[#allocation31_spill] sm:$0xff] %v7323_v39 }
 0x3b9   : > { %4807 = vst [vmem:[%s7206_s28 + $0xb0] sm:$0xff] %v7321_v37  ;;  %3055 = vrot.lane.b32.xlu1 %v7277_v27, %s6402_s11 }
 0x3bb   : > { %3173 = vrot.lane.b32.xlu0 %v7268_v52, %s6403_s24 }
 0x3bc   : > { %v2802_v14 = vpop.f32.mrb[84].mxu0 }
 0x3bd   : > { %v7334_v33 = vadd.f32 %v2802_v14, %v7199_v21  ;;  %v7336_v15 = vpop.f32.mrb[85].mxu0  ;;  %3175 = vrot.lane.b32.xlu1 %v7277_v27, %s6403_s24 }
 0x3be   : > { %9827 = vst [vmem:[#allocation32_spill] sm:$0xff] %v7336_v15  ;;  %v2806_v17 = vpop.f32.mrb[86].mxu0 }
 0x3bf   : > { %4809 = vst [vmem:[%s7206_s28 + $0xc0] sm:$0xff] %v7334_v33  ;;  %v7343_v19 = vadd.f32 %v2806_v17, %v7199_v21  ;;  %v7345_v55 = vpop.f32.mrb[87].mxu0  ;;  %2937 = vrot.lane.b32.xlu0 %v7290_v3, %s6401_s30 }
 0x3c0   : > { %9828 = vst [vmem:[#allocation33_spill] sm:$0xff] %v7345_v55 }
 0x3c1   : > { %4811 = vst [vmem:[%s7206_s28 + $0xd0] sm:$0xff] %v7343_v19  ;;  %2939 = vrot.lane.b32.xlu1 %v7299_v60, %s6401_s30 }
 0x3c3   : > { %3057 = vrot.lane.b32.xlu0 %v7290_v3, %s6402_s11 }
 0x3c4   : > { %v2812_v5 = vpop.f32.mrb[88].mxu0 }
 0x3c5   : > { %v7356_v22 = vadd.f32 %v2812_v5, %v7199_v21  ;;  %v7358_v34 = vpop.f32.mrb[89].mxu0  ;;  %3059 = vrot.lane.b32.xlu1 %v7299_v60, %s6402_s11 }
 0x3c6   : > { %9829 = vst [vmem:[#allocation34_spill] sm:$0xff] %v7358_v34  ;;  %v2816_v23 = vpop.f32.mrb[90].mxu0 }
 0x3c7   : > { %4813 = vst [vmem:[%s7206_s28 + $0xe0] sm:$0xff] %v7356_v22  ;;  %v7365_v29 = vadd.f32 %v2816_v23, %v7199_v21  ;;  %v7367_v46 = vpop.f32.mrb[91].mxu0  ;;  %3177 = vrot.lane.b32.xlu0 %v7290_v3, %s6403_s24 }
 0x3c8   : > { %9830 = vst [vmem:[#allocation35_spill] sm:$0xff] %v7367_v46 }
 0x3c9   : > { %4815 = vst [vmem:[%s7206_s28 + $0xf0] sm:$0xff] %v7365_v29  ;;  %3179 = vrot.lane.b32.xlu1 %v7299_v60, %s6403_s24 }
 0x3cb   : > { %2941 = vrot.lane.b32.xlu0 %v7312_v40, %s6401_s30 }
 0x3cc   : > { %v2822_v32 = vpop.f32.mrb[92].mxu0 }
 0x3cd   : > { %v7378_v63 = vadd.f32 %v2822_v32, %v7199_v21  ;;  %v7380_v62 = vpop.f32.mrb[93].mxu0  ;;  %2943 = vrot.lane.b32.xlu1 %v7321_v37, %s6401_s30 }
 0x3ce   : > { %9831 = vst [vmem:[#allocation36_spill] sm:$0xff] %v7380_v62  ;;  %v2826_v25 = vpop.f32.mrb[94].mxu0 }
 0x3cf   : > { %4817 = vst [vmem:[%s7206_s28 + $0x100] sm:$0xff] %v7378_v63  ;;  %v7387_v1 = vadd.f32 %v2826_v25, %v7199_v21  ;;  %v7389_v41 = vpop.f32.mrb[95].mxu0  ;;  %3061 = vrot.lane.b32.xlu0 %v7312_v40, %s6402_s11 }
 0x3d0   : > { %9832 = vst [vmem:[#allocation37_spill] sm:$0xff] %v7389_v41 }
 0x3d1   : > { %4819 = vst [vmem:[%s7206_s28 + $0x110] sm:$0xff] %v7387_v1  ;;  %3063 = vrot.lane.b32.xlu1 %v7321_v37, %s6402_s11 }
 0x3d3   : > { %3181 = vrot.lane.b32.xlu0 %v7312_v40, %s6403_s24 }
 0x3d4   : > { %v2832_v26 = vpop.f32.mrb[96].mxu0 }
 0x3d5   : > { %v7400_v49 = vadd.f32 %v2832_v26, %v7199_v21  ;;  %v7402_v42 = vpop.f32.mrb[97].mxu0  ;;  %3183 = vrot.lane.b32.xlu1 %v7321_v37, %s6403_s24 }
 0x3d6   : > { %9833 = vst [vmem:[#allocation38_spill] sm:$0xff] %v7402_v42  ;;  %v2836_v16 = vpop.f32.mrb[98].mxu0 }
 0x3d7   : > { %4821 = vst [vmem:[%s7206_s28 + $0x120] sm:$0xff] %v7400_v49  ;;  %v7409_v24 = vadd.f32 %v2836_v16, %v7199_v21  ;;  %v7411_v11 = vpop.f32.mrb[99].mxu0  ;;  %2945 = vrot.lane.b32.xlu0 %v7334_v33, %s6401_s30 }
 0x3d8   : > { %9834 = vst [vmem:[#allocation39_spill] sm:$0xff] %v7411_v11 }
 0x3d9   : > { %4823 = vst [vmem:[%s7206_s28 + $0x130] sm:$0xff] %v7409_v24  ;;  %2947 = vrot.lane.b32.xlu1 %v7343_v19, %s6401_s30 }
 0x3db   : > { %3065 = vrot.lane.b32.xlu0 %v7334_v33, %s6402_s11 }
 0x3dc   : > { %v2842_v50 = vpop.f32.mrb[100].mxu0 }
 0x3dd   : > { %v7422_v12 = vadd.f32 %v2842_v50, %v7199_v21  ;;  %v7424_v54 = vpop.f32.mrb[101].mxu0  ;;  %3067 = vrot.lane.b32.xlu1 %v7343_v19, %s6402_s11 }
 0x3de   : > { %9835 = vst [vmem:[#allocation40_spill] sm:$0xff] %v7424_v54  ;;  %v2846_v53 = vpop.f32.mrb[102].mxu0 }
 0x3df   : > { %4825 = vst [vmem:[%s7206_s28 + $0x140] sm:$0xff] %v7422_v12  ;;  %v7431_v45 = vadd.f32 %v2846_v53, %v7199_v21  ;;  %v7433_v48 = vpop.f32.mrb[103].mxu0  ;;  %3185 = vrot.lane.b32.xlu0 %v7334_v33, %s6403_s24 }
 0x3e0   : > { %9836 = vst [vmem:[#allocation41_spill] sm:$0xff] %v7433_v48 }
 0x3e1   : > { %4827 = vst [vmem:[%s7206_s28 + $0x150] sm:$0xff] %v7431_v45  ;;  %3187 = vrot.lane.b32.xlu1 %v7343_v19, %s6403_s24 }
 0x3e3   : > { %2949 = vrot.lane.b32.xlu0 %v7356_v22, %s6401_s30 }
 0x3e4   : > { %v2852_v4 = vpop.f32.mrb[104].mxu0 }
 0x3e5   : > { %v7444_v9 = vadd.f32 %v2852_v4, %v7199_v21  ;;  %v7446_v7 = vpop.f32.mrb[105].mxu0  ;;  %2951 = vrot.lane.b32.xlu1 %v7365_v29, %s6401_s30 }
 0x3e6   : > { %9837 = vst [vmem:[#allocation42_spill] sm:$0xff] %v7446_v7  ;;  %v2856_v10 = vpop.f32.mrb[106].mxu0 }
 0x3e7   : > { %4829 = vst [vmem:[%s7206_s28 + $0x160] sm:$0xff] %v7444_v9  ;;  %v7453_v8 = vadd.f32 %v2856_v10, %v7199_v21  ;;  %v7455_v36 = vpop.f32.mrb[107].mxu0  ;;  %3069 = vrot.lane.b32.xlu0 %v7356_v22, %s6402_s11 }
 0x3e8   : > { %9838 = vst [vmem:[#allocation43_spill] sm:$0xff] %v7455_v36 }
 0x3e9   : > { %4831 = vst [vmem:[%s7206_s28 + $0x170] sm:$0xff] %v7453_v8  ;;  %3071 = vrot.lane.b32.xlu1 %v7365_v29, %s6402_s11 }
 0x3eb   : > { %3189 = vrot.lane.b32.xlu0 %v7356_v22, %s6403_s24 }
 0x3ec   : > { %v2862_v47 = vpop.f32.mrb[108].mxu0 }
 0x3ed   : > { %v7466_v14 = vadd.f32 %v2862_v47, %v7199_v21  ;;  %v7468_v17 = vpop.f32.mrb[109].mxu0  ;;  %3191 = vrot.lane.b32.xlu1 %v7365_v29, %s6403_s24 }
 0x3ee   : > { %9839 = vst [vmem:[#allocation44_spill] sm:$0xff] %v7468_v17  ;;  %v2866_v5 = vpop.f32.mrb[110].mxu0 }
 0x3ef   : > { %4833 = vst [vmem:[%s7206_s28 + $0x180] sm:$0xff] %v7466_v14  ;;  %v7475_v23 = vadd.f32 %v2866_v5, %v7199_v21  ;;  %v7477_v32 = vpop.f32.mrb[111].mxu0  ;;  %2953 = vrot.lane.b32.xlu0 %v7378_v63, %s6401_s30 }
 0x3f0   : > { %9840 = vst [vmem:[#allocation45_spill] sm:$0xff] %v7477_v32 }
 0x3f1   : > { %4835 = vst [vmem:[%s7206_s28 + $0x190] sm:$0xff] %v7475_v23  ;;  %2955 = vrot.lane.b32.xlu1 %v7387_v1, %s6401_s30 }
 0x3f3   : > { %3073 = vrot.lane.b32.xlu0 %v7378_v63, %s6402_s11 }
 0x3f4   : > { %v2872_v25 = vpop.f32.mrb[112].mxu0 }
 0x3f5   : > { %v7488_v26 = vadd.f32 %v2872_v25, %v7199_v21  ;;  %v7490_v16 = vpop.f32.mrb[113].mxu0  ;;  %3075 = vrot.lane.b32.xlu1 %v7387_v1, %s6402_s11 }
 0x3f6   : > { %9842 = vst [vmem:[#allocation47_spill] sm:$0xff] %v7490_v16  ;;  %v2876_v50 = vpop.f32.mrb[114].mxu0 }
 0x3f7   : > { %9841 = vst [vmem:[#allocation46_spill] sm:$0xff] %v7488_v26  ;;  %4837 = vst [vmem:[%s7206_s28 + $0x1a0] sm:$0xff] %v7488_v26  ;;  %v7497_v53 = vadd.f32 %v2876_v50, %v7199_v21  ;;  %v7499_v4 = vpop.f32.mrb[115].mxu0  ;;  %3193 = vrot.lane.b32.xlu0 %v7378_v63, %s6403_s24 }
 0x3f8   : > { %9844 = vst [vmem:[#allocation49_spill] sm:$0xff] %v7499_v4 }
 0x3f9   : > { %9843 = vst [vmem:[#allocation48_spill] sm:$0xff] %v7497_v53  ;;  %4839 = vst [vmem:[%s7206_s28 + $0x1b0] sm:$0xff] %v7497_v53  ;;  %3195 = vrot.lane.b32.xlu1 %v7387_v1, %s6403_s24 }
 0x3fb   : > { %2957 = vrot.lane.b32.xlu0 %v7400_v49, %s6401_s30 }
 0x3fc   : > { %v2882_v10 = vpop.f32.mrb[116].mxu0 }
 0x3fd   : > { %v7510_v47 = vadd.f32 %v2882_v10, %v7199_v21  ;;  %v7512_v5 = vpop.f32.mrb[117].mxu0  ;;  %2959 = vrot.lane.b32.xlu1 %v7409_v24, %s6401_s30 }
 0x3fe   : > { %9845 = vst [vmem:[#allocation50_spill] sm:$0xff] %v7512_v5  ;;  %v2886_v25 = vpop.f32.mrb[118].mxu0 }
 0x3ff   : > { %4841 = vst [vmem:[%s7206_s28 + $0x1c0] sm:$0xff] %v7510_v47  ;;  %v7519_v50 = vadd.f32 %v2886_v25, %v7199_v21  ;;  %v7521_v2 = vpop.f32.mrb[119].mxu0  ;;  %3077 = vrot.lane.b32.xlu0 %v7400_v49, %s6402_s11 }
 0x400   : > { %9847 = vst [vmem:[#allocation52_spill] sm:$0xff] %v7521_v2 }
 0x401   : > { %9846 = vst [vmem:[#allocation51_spill] sm:$0xff] %v7519_v50  ;;  %4843 = vst [vmem:[%s7206_s28 + $0x1d0] sm:$0xff] %v7519_v50  ;;  %3079 = vrot.lane.b32.xlu1 %v7409_v24, %s6402_s11  ;;  %v7529_v10 = vpop.permute.xlu0 %2921 }
 0x402   : > { %v3011_v18 = vmax.f32 %v7202_v35, %v7529_v10 }
 0x403   : > { %v7531_v5 = vpop.permute.xlu1 %3043  ;;  %3197 = vrot.lane.b32.xlu0 %v7400_v49, %s6403_s24 }
 0x405   : > { %3199 = vrot.lane.b32.xlu1 %v7409_v24, %s6403_s24  ;;  %v3042_v21 = vpop.permute.xlu0 %3041 }
 0x406   : > { %v3131_v30 = vmax.f32 %v3011_v18, %v3042_v21 }
 0x407   : > { %v7537_v25 = vpop.permute.xlu1 %3163  ;;  %2961 = vrot.lane.b32.xlu0 %v7422_v12, %s6401_s30 }
 0x409   : > { %2963 = vrot.lane.b32.xlu1 %v7431_v45, %s6401_s30  ;;  %v3162_v2 = vpop.permute.xlu0 %3161 }
 0x40b   : > { %v7543_v4 = vpop.permute.xlu1 %2925  ;;  %3081 = vrot.lane.b32.xlu0 %v7422_v12, %s6402_s11 }
 0x40d   : > { %3083 = vrot.lane.b32.xlu1 %v7431_v45, %s6402_s11  ;;  %v2924_v16 = vpop.permute.xlu0 %2923 }
 0x40e   : > { %v3012_v58 = vmax.f32 %v7211_v44, %v2924_v16  ;;  %v7653_v16 = vmax.f32 %v3131_v30, %v3162_v2  ;;  %v3013_v2 = vmax.f32 %v7224_v38, %v7543_v4 }
 0x40f   : > { %v7549_v32 = vpop.permute.xlu1 %2927  ;;  %3201 = vrot.lane.b32.xlu0 %v7422_v12, %s6403_s24 }
 0x411   : > { %3203 = vrot.lane.b32.xlu1 %v7431_v45, %s6403_s24  ;;  %v7555_v17 = vpop.permute.xlu0 %3045 }
 0x413   : > { %v7557_v36 = vpop.permute.xlu1 %3047  ;;  %2965 = vrot.lane.b32.xlu0 %v7444_v9, %s6401_s30 }
 0x415   : > { %2967 = vrot.lane.b32.xlu1 %v7453_v8, %s6401_s30  ;;  %v7563_v7 = vpop.permute.xlu0 %3165 }
 0x417   : > { %v7565_v48 = vpop.permute.xlu1 %3167  ;;  %3085 = vrot.lane.b32.xlu0 %v7444_v9, %s6402_s11 }
 0x419   : > { %3087 = vrot.lane.b32.xlu1 %v7453_v8, %s6402_s11  ;;  %v7571_v54 = vpop.permute.xlu0 %2929 }
 0x41b   : > { %v7573_v11 = vpop.permute.xlu1 %2931  ;;  %3205 = vrot.lane.b32.xlu0 %v7444_v9, %s6403_s24 }
 0x41d   : > { %3207 = vrot.lane.b32.xlu1 %v7453_v8, %s6403_s24  ;;  %v7579_v42 = vpop.permute.xlu0 %3049 }
 0x41f   : > { %v7581_v41 = vpop.permute.xlu1 %3051  ;;  %2969 = vrot.lane.b32.xlu0 %v7466_v14, %s6401_s30 }
 0x421   : > { %2971 = vrot.lane.b32.xlu1 %v7475_v23, %s6401_s30  ;;  %v7587_v62 = vpop.permute.xlu0 %3169 }
 0x423   : > { %v7589_v46 = vpop.permute.xlu1 %3171  ;;  %3089 = vrot.lane.b32.xlu0 %v7466_v14, %s6402_s11 }
 0x425   : > { %3091 = vrot.lane.b32.xlu1 %v7475_v23, %s6402_s11  ;;  %v7595_v34 = vpop.permute.xlu0 %2933 }
 0x427   : > { %v7597_v55 = vpop.permute.xlu1 %2935  ;;  %3209 = vrot.lane.b32.xlu0 %v7466_v14, %s6403_s24 }
 0x429   : > { %3211 = vrot.lane.b32.xlu1 %v7475_v23, %s6403_s24  ;;  %v7603_v15 = vpop.permute.xlu0 %3053 }
 0x42b   : > { %v7605_v39 = vpop.permute.xlu1 %3055  ;;  %2973 = vrot.lane.b32.xlu0 %v7488_v26, %s6401_s30 }
 0x42d   : > { %2975 = vrot.lane.b32.xlu1 %v7497_v53, %s6401_s30  ;;  %v7611_v0 = vpop.permute.xlu0 %3173 }
 0x42f   : > { %v7613_v43 = vpop.permute.xlu1 %3175  ;;  %3093 = vrot.lane.b32.xlu0 %v7488_v26, %s6402_s11 }
 0x431   : > { %3095 = vrot.lane.b32.xlu1 %v7497_v53, %s6402_s11  ;;  %v7619_v13 = vpop.permute.xlu0 %2937 }
 0x433   : > { %v7621_v59 = vpop.permute.xlu1 %2939  ;;  %3213 = vrot.lane.b32.xlu0 %v7488_v26, %s6403_s24 }
 0x435   : > { %3215 = vrot.lane.b32.xlu1 %v7497_v53, %s6403_s24  ;;  %v7627_v20 = vpop.permute.xlu0 %3057  ;;  %v3132_v53 = vmax.f32 %v3012_v58, %v7531_v5  ;;  %v3133_v5 = vmax.f32 %v3013_v2, %v7555_v17  ;;  %v3016_v2 = vmax.f32 %v7255_v31, %v7573_v11  ;;  %v3018_v11 = vmax.f32 %v7277_v27, %v7597_v55 }
 0x436   : > { %v3020_v55 = vmax.f32 %v7299_v60, %v7621_v59 }
 0x437   : > { %v7629_v61 = vpop.permute.xlu1 %3059  ;;  %2977 = vrot.lane.b32.xlu0 %v7510_v47, %s6401_s30  ;;  %v7660_v10 = vmax.f32 %v3132_v53, %v7537_v25  ;;  %v3014_v53 = vmax.f32 %v7233_v57, %v7549_v32  ;;  %v7689_v38 = vmax.f32 %v3133_v5, %v7563_v7  ;;  %v3015_v32 = vmax.f32 %v7246_v56, %v7571_v54 }
 0x439   : > { %2979 = vrot.lane.b32.xlu1 %v7519_v50, %s6401_s30  ;;  %v7635_v28 = vpop.permute.xlu0 %3177  ;;  %v3134_v25 = vmax.f32 %v3014_v53, %v7557_v36  ;;  %v3135_v53 = vmax.f32 %v3015_v32, %v7579_v42  ;;  %v3017_v42 = vmax.f32 %v7268_v52, %v7595_v34 }
 0x43b   : > { %v7638_v51 = vpop.permute.xlu1 %3179  ;;  %3097 = vrot.lane.b32.xlu0 %v7510_v47, %s6402_s11  ;;  %v7696_v57 = vmax.f32 %v3134_v25, %v7565_v48  ;;  %v3136_v25 = vmax.f32 %v3016_v2, %v7581_v41  ;;  %v3137_v32 = vmax.f32 %v3017_v42, %v7603_v15  ;;  %v3019_v15 = vmax.f32 %v7290_v3, %v7619_v13 }
 0x43d   : > { %3099 = vrot.lane.b32.xlu1 %v7519_v50, %s6402_s11  ;;  %v7646_v6 = vpop.permute.xlu0 %2941  ;;  %v7732_v54 = vmax.f32 %v3136_v25, %v7589_v46  ;;  %v7761_v25 = vmax.f32 %v3137_v32, %v7611_v0  ;;  %v3139_v42 = vmax.f32 %v3019_v15, %v7627_v20  ;;  %v3140_v32 = vmax.f32 %v3020_v55, %v7629_v61 }
 0x43e   : > { %v3021_v20 = vmax.f32 %v7312_v40, %v7646_v6 }
 0x43f   : > { %v7649_v26 = vpop.permute.xlu1 %2943  ;;  %3217 = vrot.lane.b32.xlu0 %v7510_v47, %s6403_s24  ;;  %v7804_v13 = vmax.f32 %v3140_v32, %v7638_v51 }
 0x440   : > { %v3022_v60 = vmax.f32 %v7321_v37, %v7649_v26 }
 0x441   : > { %3219 = vrot.lane.b32.xlu1 %v7519_v50, %s6403_s24  ;;  %v7657_v44 = vpop.permute.xlu0 %3061  ;;  %v7725_v50 = vmax.f32 %v3135_v53, %v7587_v62  ;;  %v3138_v53 = vmax.f32 %v3018_v11, %v7605_v39 }
 0x442   : > { %v3141_v15 = vmax.f32 %v3021_v20, %v7657_v44 }
 0x443   : > { %v7662_v35 = vpop.permute.xlu1 %3063  ;;  %3311 = vrot.lane.b32.xlu0 %v7653_v16, %s6404_s7  ;;  %v7768_v34 = vmax.f32 %v3138_v53, %v7613_v43  ;;  %v7797_v53 = vmax.f32 %v3139_v42, %v7635_v28 }
 0x444   : > { %v3142_v42 = vmax.f32 %v3022_v60, %v7662_v35 }
 0x445   : > { %3313 = vrot.lane.b32.xlu1 %v7660_v10, %s6404_s7  ;;  %v7668_v18 = vpop.permute.xlu0 %3181 }
 0x446   : > { %v7833_v32 = vmax.f32 %v3141_v15, %v7668_v18 }
 0x447   : > { %v7670_v30 = vpop.permute.xlu1 %3183  ;;  %3401 = vrot.lane.b32.xlu0 %v7653_v16, %s6405_s13 }
 0x448   : > { %v7840_v40 = vmax.f32 %v3142_v42, %v7670_v30 }
 0x449   : > { %3403 = vrot.lane.b32.xlu1 %v7660_v10, %s6405_s13  ;;  %v7678_v58 = vpop.permute.xlu0 %2945 }
 0x44a   : > { %v3023_v26 = vmax.f32 %v7334_v33, %v7678_v58 }
 0x44b   : > { %v7683_v21 = vpop.permute.xlu1 %2947  ;;  %3491 = vrot.lane.b32.xlu0 %v7653_v16, %s6406_s29 }
 0x44c   : > { %v3024_v30 = vmax.f32 %v7343_v19, %v7683_v21 }
 0x44d   : > { %3493 = vrot.lane.b32.xlu1 %v7660_v10, %s6406_s29  ;;  %v7693_v4 = vpop.permute.xlu0 %3065 }
 0x44e   : > { %v3143_v20 = vmax.f32 %v3023_v26, %v7693_v4 }
 0x44f   : > { %v7698_v17 = vpop.permute.xlu1 %3067  ;;  %3315 = vrot.lane.b32.xlu0 %v7689_v38, %s6404_s7 }
 0x450   : > { %v3144_v15 = vmax.f32 %v3024_v30, %v7698_v17 }
 0x451   : > { %3317 = vrot.lane.b32.xlu1 %v7696_v57, %s6404_s7  ;;  %v7704_v36 = vpop.permute.xlu0 %3185 }
 0x452   : > { %v7869_v42 = vmax.f32 %v3143_v20, %v7704_v36 }
 0x453   : > { %v7706_v7 = vpop.permute.xlu1 %3187  ;;  %3405 = vrot.lane.b32.xlu0 %v7689_v38, %s6405_s13 }
 0x454   : > { %v7876_v58 = vmax.f32 %v3144_v15, %v7706_v7 }
 0x455   : > { %3407 = vrot.lane.b32.xlu1 %v7696_v57, %s6405_s13  ;;  %v7714_v48 = vpop.permute.xlu0 %2949 }
 0x456   : > { %v3025_v17 = vmax.f32 %v7356_v22, %v7714_v48 }
 0x457   : > { %v7719_v5 = vpop.permute.xlu1 %2951  ;;  %3495 = vrot.lane.b32.xlu0 %v7689_v38, %s6406_s29 }
 0x458   : > { %v3026_v7 = vmax.f32 %v7365_v29, %v7719_v5 }
 0x459   : > { %3497 = vrot.lane.b32.xlu1 %v7696_v57, %s6406_s29  ;;  %v7729_v56 = vpop.permute.xlu0 %3069 }
 0x45a   : > { %v3145_v26 = vmax.f32 %v3025_v17, %v7729_v56 }
 0x45b   : > { %v7734_v31 = vpop.permute.xlu1 %3071  ;;  %3319 = vrot.lane.b32.xlu0 %v7725_v50, %s6404_s7 }
 0x45c   : > { %v3146_v20 = vmax.f32 %v3026_v7, %v7734_v31 }
 0x45d   : > { %3321 = vrot.lane.b32.xlu1 %v7732_v54, %s6404_s7  ;;  %v7740_v41 = vpop.permute.xlu0 %3189 }
 0x45e   : > { %v7905_v15 = vmax.f32 %v3145_v26, %v7740_v41 }
 0x45f   : > { %v7742_v62 = vpop.permute.xlu1 %3191  ;;  %3409 = vrot.lane.b32.xlu0 %v7725_v50, %s6405_s13 }
 0x460   : > { %v7912_v48 = vmax.f32 %v3146_v20, %v7742_v62 }
 0x461   : > { %3411 = vrot.lane.b32.xlu1 %v7732_v54, %s6405_s13  ;;  %v7750_v46 = vpop.permute.xlu0 %2953 }
 0x462   : > { %v3027_v31 = vmax.f32 %v7378_v63, %v7750_v46 }
 0x463   : > { %v7755_v2 = vpop.permute.xlu1 %2955  ;;  %3499 = vrot.lane.b32.xlu0 %v7725_v50, %s6406_s29 }
 0x464   : > { %v3028_v62 = vmax.f32 %v7387_v1, %v7755_v2 }
 0x465   : > { %3501 = vrot.lane.b32.xlu1 %v7732_v54, %s6406_s29  ;;  %v7765_v52 = vpop.permute.xlu0 %3073 }
 0x466   : > { %v3147_v17 = vmax.f32 %v3027_v31, %v7765_v52 }
 0x467   : > { %v7770_v27 = vpop.permute.xlu1 %3075  ;;  %3323 = vrot.lane.b32.xlu0 %v7761_v25, %s6404_s7 }
 0x468   : > { %v3148_v26 = vmax.f32 %v3028_v62, %v7770_v27 }
 0x469   : > { %3325 = vrot.lane.b32.xlu1 %v7768_v34, %s6404_s7  ;;  %v7776_v39 = vpop.permute.xlu0 %3193 }
 0x46a   : > { %v7941_v20 = vmax.f32 %v3147_v17, %v7776_v39 }
 0x46b   : > { %v7778_v0 = vpop.permute.xlu1 %3195  ;;  %3413 = vrot.lane.b32.xlu0 %v7761_v25, %s6405_s13 }
 0x46c   : > { %v7948_v46 = vmax.f32 %v3148_v26, %v7778_v0 }
 0x46d   : > { %3415 = vrot.lane.b32.xlu1 %v7768_v34, %s6405_s13  ;;  %v7786_v43 = vpop.permute.xlu0 %2957 }
 0x46e   : > { %v3029_v27 = vmax.f32 %v7400_v49, %v7786_v43 }
 0x46f   : > { %v7791_v11 = vpop.permute.xlu1 %2959  ;;  %3503 = vrot.lane.b32.xlu0 %v7761_v25, %s6406_s29 }
 0x470   : > { %v3030_v0 = vmax.f32 %v7409_v24, %v7791_v11 }
 0x471   : > { %3505 = vrot.lane.b32.xlu1 %v7768_v34, %s6406_s29  ;;  %v7801_v3 = vpop.permute.xlu0 %3077 }
 0x472   : > { %v3149_v31 = vmax.f32 %v3029_v27, %v7801_v3 }
 0x473   : > { %v7806_v59 = vpop.permute.xlu1 %3079  ;;  %3327 = vrot.lane.b32.xlu0 %v7797_v53, %s6404_s7 }
 0x474   : > { %v3150_v17 = vmax.f32 %v3030_v0, %v7806_v59 }
 0x475   : > { %3329 = vrot.lane.b32.xlu1 %v7804_v13, %s6404_s7  ;;  %v7812_v61 = vpop.permute.xlu0 %3197 }
 0x476   : > { %v7977_v26 = vmax.f32 %v3149_v31, %v7812_v61 }
 0x477   : > { %v7814_v28 = vpop.permute.xlu1 %3199  ;;  %3417 = vrot.lane.b32.xlu0 %v7797_v53, %s6405_s13 }
 0x478   : > { %v7984_v43 = vmax.f32 %v3150_v17, %v7814_v28 }
 0x479   : > { %3419 = vrot.lane.b32.xlu1 %v7804_v13, %s6405_s13  ;;  %v7822_v51 = vpop.permute.xlu0 %2961 }
 0x47a   : > { %v3031_v59 = vmax.f32 %v7422_v12, %v7822_v51 }
 0x47b   : > { %v7827_v55 = vpop.permute.xlu1 %2963  ;;  %3507 = vrot.lane.b32.xlu0 %v7797_v53, %s6406_s29 }
 0x47c   : > { %v3032_v28 = vmax.f32 %v7431_v45, %v7827_v55 }
 0x47d   : > { %3509 = vrot.lane.b32.xlu1 %v7804_v13, %s6406_s29  ;;  %v7837_v6 = vpop.permute.xlu0 %3081 }
 0x47e   : > { %v3151_v27 = vmax.f32 %v3031_v59, %v7837_v6 }
 0x47f   : > { %v7842_v37 = vpop.permute.xlu1 %3083  ;;  %3331 = vrot.lane.b32.xlu0 %v7833_v32, %s6404_s7 }
 0x480   : > { %v3152_v31 = vmax.f32 %v3032_v28, %v7842_v37 }
 0x481   : > { %3333 = vrot.lane.b32.xlu1 %v7840_v40, %s6404_s7  ;;  %v7848_v35 = vpop.permute.xlu0 %3201 }
 0x482   : > { %v8013_v17 = vmax.f32 %v3151_v27, %v7848_v35 }
 0x483   : > { %v7850_v44 = vpop.permute.xlu1 %3203  ;;  %3421 = vrot.lane.b32.xlu0 %v7833_v32, %s6405_s13 }
 0x484   : > { %v8020_v51 = vmax.f32 %v3152_v31, %v7850_v44 }
 0x485   : > { %3423 = vrot.lane.b32.xlu1 %v7840_v40, %s6405_s13  ;;  %v7858_v18 = vpop.permute.xlu0 %2965 }
 0x486   : > { %v3033_v37 = vmax.f32 %v7444_v9, %v7858_v18 }
 0x487   : > { %v7863_v60 = vpop.permute.xlu1 %2967  ;;  %3511 = vrot.lane.b32.xlu0 %v7833_v32, %s6406_s29 }
 0x488   : > { %v3034_v44 = vmax.f32 %v7453_v8, %v7863_v60 }
 0x489   : > { %3513 = vrot.lane.b32.xlu1 %v7840_v40, %s6406_s29  ;;  %v7873_v33 = vpop.permute.xlu0 %3085 }
 0x48a   : > { %v3153_v59 = vmax.f32 %v3033_v37, %v7873_v33 }
 0x48b   : > { %v7878_v19 = vpop.permute.xlu1 %3087  ;;  %3335 = vrot.lane.b32.xlu0 %v7869_v42, %s6404_s7 }
 0x48c   : > { %v3154_v27 = vmax.f32 %v3034_v44, %v7878_v19 }
 0x48d   : > { %3337 = vrot.lane.b32.xlu1 %v7876_v58, %s6404_s7  ;;  %v7884_v21 = vpop.permute.xlu0 %3205 }
 0x48e   : > { %v8047_v31 = vmax.f32 %v3153_v59, %v7884_v21 }
 0x48f   : > { %v7886_v4 = vpop.permute.xlu1 %3207  ;;  %3425 = vrot.lane.b32.xlu0 %v7869_v42, %s6405_s13 }
 0x490   : > { %v8054_v18 = vmax.f32 %v3154_v27, %v7886_v4 }
 0x491   : > { %3427 = vrot.lane.b32.xlu1 %v7876_v58, %s6405_s13  ;;  %v7894_v36 = vpop.permute.xlu0 %2969 }
 0x492   : > { %9848 = vst [vmem:[#allocation53_spill] sm:$0xff] %v8054_v18  ;;  %v3035_v19 = vmax.f32 %v7466_v14, %v7894_v36 }
 0x493   : > { %v7899_v30 = vpop.permute.xlu1 %2971  ;;  %3515 = vrot.lane.b32.xlu0 %v7869_v42, %s6406_s29 }
 0x494   : > { %v3036_v4 = vmax.f32 %v7475_v23, %v7899_v30 }
 0x495   : > { %3517 = vrot.lane.b32.xlu1 %v7876_v58, %s6406_s29  ;;  %v7909_v22 = vpop.permute.xlu0 %3089 }
 0x496   : > { %v3155_v37 = vmax.f32 %v3035_v19, %v7909_v22  ;;  %v9850_v19 = vld [vmem:[#allocation48_spill] sm:$0xff] }
 0x497   : > { %v7914_v29 = vpop.permute.xlu1 %3091  ;;  %3339 = vrot.lane.b32.xlu0 %v7905_v15, %s6404_s7 }
 0x498   : > { %v3156_v59 = vmax.f32 %v3036_v4, %v7914_v29  ;;  %v9849_v29 = vld [vmem:[#allocation46_spill] sm:$0xff] }
 0x499   : > { %3341 = vrot.lane.b32.xlu1 %v7912_v48, %s6404_s7  ;;  %v7920_v5 = vpop.permute.xlu0 %3209 }
 0x49a   : > { %v8083_v27 = vmax.f32 %v3155_v37, %v7920_v5 }
 0x49b   : > { %v7922_v56 = vpop.permute.xlu1 %3211  ;;  %3429 = vrot.lane.b32.xlu0 %v7905_v15, %s6405_s13 }
 0x49c   : > { %v8090_v36 = vmax.f32 %v3156_v59, %v7922_v56 }
 0x49d   : > { %3431 = vrot.lane.b32.xlu1 %v7912_v48, %s6405_s13  ;;  %v7930_v41 = vpop.permute.xlu0 %2973 }
 0x49e   : > { %v3037_v5 = vmax.f32 %v9849_v29, %v7930_v41 }
 0x49f   : > { %v7935_v7 = vpop.permute.xlu1 %2975  ;;  %3519 = vrot.lane.b32.xlu0 %v7905_v15, %s6406_s29 }
 0x4a0   : > { %v3038_v4 = vmax.f32 %v9850_v19, %v7935_v7 }
 0x4a1   : > { %3521 = vrot.lane.b32.xlu1 %v7912_v48, %s6406_s29  ;;  %v7945_v63 = vpop.permute.xlu0 %3093 }
 0x4a2   : > { %v3157_v37 = vmax.f32 %v3037_v5, %v7945_v63 }
 0x4a3   : > { %v7950_v1 = vpop.permute.xlu1 %3095  ;;  %3343 = vrot.lane.b32.xlu0 %v7941_v20, %s6404_s7 }
 0x4a5   : > { %3345 = vrot.lane.b32.xlu1 %v7948_v46, %s6404_s7  ;;  %v7956_v2 = vpop.permute.xlu0 %3213 }
 0x4a6   : > { %v8119_v41 = vmax.f32 %v3157_v37, %v7956_v2  ;;  %v9853_v37 = vld [vmem:[#allocation51_spill] sm:$0xff] }
 0x4a7   : > { %v7958_v52 = vpop.permute.xlu1 %3215  ;;  %3433 = vrot.lane.b32.xlu0 %v7941_v20, %s6405_s13 }
 0x4a9   : > { %3435 = vrot.lane.b32.xlu1 %v7948_v46, %s6405_s13  ;;  %v7966_v39 = vpop.permute.xlu0 %2977 }
 0x4ab   : > { %v7971_v62 = vpop.permute.xlu1 %2979  ;;  %3523 = vrot.lane.b32.xlu0 %v7941_v20, %s6406_s29 }
 0x4ad   : > { %3525 = vrot.lane.b32.xlu1 %v7948_v46, %s6406_s29  ;;  %v7981_v49 = vpop.permute.xlu0 %3097 }
 0x4af   : > { %v7986_v24 = vpop.permute.xlu1 %3099  ;;  %3347 = vrot.lane.b32.xlu0 %v7977_v26, %s6404_s7 }
 0x4b1   : > { %3349 = vrot.lane.b32.xlu1 %v7984_v43, %s6404_s7  ;;  %v7992_v11 = vpop.permute.xlu0 %3217 }
 0x4b3   : > { %v7994_v3 = vpop.permute.xlu1 %3219  ;;  %3437 = vrot.lane.b32.xlu0 %v7977_v26, %s6405_s13 }
 0x4b5   : > { %3439 = vrot.lane.b32.xlu1 %v7984_v43, %s6405_s13  ;;  %v8002_v61 = vpop.permute.xlu0 %3311 }
 0x4b6   : > { %v3582_v63 = vsel %vm3581_vm0, %v7653_v16, %v8002_v61 }
 0x4b7   : > { %v8007_v0 = vpop.permute.xlu1 %3313  ;;  %3527 = vrot.lane.b32.xlu0 %v7977_v26, %s6406_s29 }
 0x4b8   : > { %v3583_v2 = vsel %vm3581_vm0, %v7660_v10, %v8007_v0  ;;  %v3039_v0 = vmax.f32 %v7510_v47, %v7966_v39 }
 0x4b9   : > { %3529 = vrot.lane.b32.xlu1 %v7984_v43, %s6406_s29  ;;  %v8017_v12 = vpop.permute.xlu0 %3401 }
 0x4bb   : > { %v8022_v45 = vpop.permute.xlu1 %3403  ;;  %3351 = vrot.lane.b32.xlu0 %v8013_v17, %s6404_s7 }
 0x4bc   : > { %v3614_v16 = vsel %vm3612_vm1, %v3583_v2, %v8022_v45 }
 0x4bd   : > { %3353 = vrot.lane.b32.xlu1 %v8020_v51, %s6404_s7  ;;  %v3492_v55 = vpop.permute.xlu0 %3491 }
 0x4bf   : > { %v8028_v6 = vpop.permute.xlu1 %3493  ;;  %3441 = vrot.lane.b32.xlu0 %v8013_v17, %s6405_s13 }
 0x4c0   : > { %v3645_v61 = vsel %vm3643_vm2, %v3614_v16, %v8028_v6  ;;  %v3040_v6 = vmax.f32 %v9853_v37, %v7971_v62 }
 0x4c1   : > { %3443 = vrot.lane.b32.xlu1 %v8020_v51, %s6405_s13  ;;  %v8036_v35 = vpop.permute.xlu0 %3315 }
 0x4c2   : > { %v3160_v47 = vmax.f32 %v3040_v6, %v7986_v24 }
 0x4c3   : > { %v8041_v28 = vpop.permute.xlu1 %3317  ;;  %3531 = vrot.lane.b32.xlu0 %v8013_v17, %s6406_s29 }
 0x4c4   : > { %v8177_v62 = vmax.f32 %v3160_v47, %v7994_v3 }
 0x4c5   : > { %3533 = vrot.lane.b32.xlu1 %v8020_v51, %s6406_s29  ;;  %v8051_v9 = vpop.permute.xlu0 %3405 }
 0x4c7   : > { %v8056_v8 = vpop.permute.xlu1 %3407  ;;  %3355 = vrot.lane.b32.xlu0 %v8047_v31, %s6404_s7 }
 0x4c9   : > { %3357 = vrot.lane.b32.xlu1 %v8054_v18, %s6404_s7  ;;  %v8062_v60 = vpop.permute.xlu0 %3495 }
 0x4cb   : > { %v8064_v33 = vpop.permute.xlu1 %3497  ;;  %3445 = vrot.lane.b32.xlu0 %v8047_v31, %s6405_s13 }
 0x4cd   : > { %3447 = vrot.lane.b32.xlu1 %v8054_v18, %s6405_s13  ;;  %v8072_v21 = vpop.permute.xlu0 %3319 }
 0x4ce   : > { %v3586_v6 = vsel %vm3581_vm0, %v7725_v50, %v8072_v21 }
 0x4cf   : > { %v8077_v44 = vpop.permute.xlu1 %3321  ;;  %3535 = vrot.lane.b32.xlu0 %v8047_v31, %s6406_s29 }
 0x4d1   : > { %3537 = vrot.lane.b32.xlu1 %v8054_v18, %s6406_s29  ;;  %v8087_v14 = vpop.permute.xlu0 %3409  ;;  %v3158_v18 = vmax.f32 %v3038_v4, %v7950_v1  ;;  %v3613_v1 = vsel %vm3612_vm1, %v3582_v63, %v8017_v12  ;;  %v9851_v12 = vld [vmem:[#allocation18_spill] sm:$0xff]  ;;  %v9852_v4 = vld [vmem:[#allocation20_spill] sm:$0xff]  ;;  %v3159_v63 = vmax.f32 %v3039_v0, %v7981_v49  ;;  %v3584_v49 = vsel %vm3581_vm0, %v7689_v38, %v8036_v35 }
 0x4d2   : > { %v3644_v19 = vsel %vm3643_vm2, %v3613_v1, %v3492_v55  ;;  %v3675_v45 = vsub.f32 %v9852_v4, %v3645_v61  ;;  %v3615_v24 = vsel %vm3612_vm1, %v3584_v49, %v8051_v9  ;;  %v3617_v47 = vsel %vm3612_vm1, %v3586_v6, %v8087_v14 }
 0x4d3   : > { %v8092_v23 = vpop.permute.xlu1 %3411  ;;  %3359 = vrot.lane.b32.xlu0 %v8083_v27, %s6404_s7  ;;  %v8126_v7 = vmax.f32 %v3158_v18, %v7958_v52  ;;  %v3674_v10 = vsub.f32 %v9851_v12, %v3644_v19  ;;  %v8170_v39 = vmax.f32 %v3159_v63, %v7992_v11  ;;  %v3585_v11 = vsel %vm3581_vm0, %v7696_v57, %v8041_v28  ;;  %v6126_v57 = vld [vmem:[%s7206_s28 + $0x20] sm:$0xff] }
 0x4d4   : > { %v3706_v16 = vmul.f32 1.442695, %v3675_v45  ;;  %v3646_v3 = vsel %vm3643_vm2, %v3615_v24, %v8062_v60  ;;  %v3616_v35 = vsel %vm3612_vm1, %v3585_v11, %v8056_v8  ;;  %v6129_v11 = vld [vmem:[%s7206_s28 + $0x50] sm:$0xff] }
 0x4d5   : > { %3361 = vrot.lane.b32.xlu1 %v8090_v36, %s6404_s7  ;;  %v8098_v30 = vpop.permute.xlu0 %3499  ;;  %v3704_v2 = vmul.f32 1.442695, %v3674_v10  ;;  %v3647_v12 = vsel %vm3643_vm2, %v3616_v35, %v8064_v33  ;;  %v3676_v28 = vsub.f32 %v6126_v57, %v3646_v3  ;;  %v6127_v10 = vld [vmem:[%s7206_s28 + $0x30] sm:$0xff] }
 0x4d6   : > { %v3677_v0 = vsub.f32 %v6127_v10, %v3647_v12  ;;  %v3648_v49 = vsel %vm3643_vm2, %v3617_v47, %v8098_v30 }
 0x4d7   : > { %v8100_v22 = vpop.permute.xlu1 %3501  ;;  %3449 = vrot.lane.b32.xlu0 %v8083_v27, %s6405_s13  ;;  %5991 = vpow2.f32 %v3704_v2  ;;  %v3708_v8 = vmul.f32 1.442695, %v3676_v28 }
 0x4d8   : > { %5993 = vpow2.f32 %v3706_v16  ;;  %v3710_v37 = vmul.f32 1.442695, %v3677_v0  ;;  %v3587_v16 = vsel %vm3581_vm0, %v7732_v54, %v8077_v44  ;;  %v6128_v54 = vld [vmem:[%s7206_s28 + $0x40] sm:$0xff] }
 0x4d9   : > { %3451 = vrot.lane.b32.xlu1 %v8090_v36, %s6405_s13  ;;  %v8108_v56 = vpop.permute.xlu0 %3323  ;;  %5995 = vpow2.f32 %v3708_v8  ;;  %v3618_v21 = vsel %vm3612_vm1, %v3587_v16, %v8092_v23  ;;  %v3678_v44 = vsub.f32 %v6128_v54, %v3648_v49  ;;  %v6131_v16 = vld [vmem:[%s7206_s28 + $0x70] sm:$0xff] }
 0x4da   : > { %5997 = vpow2.f32 %v3710_v37  ;;  %v3649_v24 = vsel %vm3643_vm2, %v3618_v21, %v8100_v22  ;;  %v3588_v28 = vsel %vm3581_vm0, %v7761_v25, %v8108_v56 }
 0x4db   : > { %v8113_v59 = vpop.permute.xlu1 %3325  ;;  %3539 = vrot.lane.b32.xlu0 %v8083_v27, %s6406_s29  ;;  %v3679_v3 = vsub.f32 %v6129_v11, %v3649_v24  ;;  %v3712_v23 = vmul.f32 1.442695, %v3678_v44 }
 0x4dc   : > { %v3589_v37 = vsel %vm3581_vm0, %v7768_v34, %v8113_v59  ;;  %v6130_v34 = vld [vmem:[%s7206_s28 + $0x60] sm:$0xff] }
 0x4dd   : > { %3541 = vrot.lane.b32.xlu1 %v8090_v36, %s6406_s29  ;;  %v8123_v29 = vpop.permute.xlu0 %3413  ;;  %v3714_v57 = vmul.f32 1.442695, %v3679_v3  ;;  %5999 = vpow2.f32 %v3712_v23 }
 0x4de   : > { %v3619_v8 = vsel %vm3612_vm1, %v3588_v28, %v8123_v29 }
 0x4df   : > { %v8131_v5 = vpop.permute.xlu1 %3415  ;;  %3363 = vrot.lane.b32.xlu0 %v8119_v41, %s6404_s7  ;;  %6001 = vpow2.f32 %v3714_v57 }
 0x4e0   : > { %v3620_v56 = vsel %vm3612_vm1, %v3589_v37, %v8131_v5  ;;  %v6133_v37 = vld [vmem:[%s7206_s28 + $0x90] sm:$0xff] }
 0x4e1   : > { %3365 = vrot.lane.b32.xlu1 %v8126_v7, %s6404_s7  ;;  %v8143_v52 = vpop.permute.xlu0 %3503  ;;  %v8219_v45 = vpop.eup %5991 }
 0x4e2   : > { %9854 = vst [vmem:[#allocation46_spill] sm:$0xff] %v8219_v45  ;;  %v8228_v2 = vpop.eup %5993  ;;  %v3650_v6 = vsel %vm3643_vm2, %v3619_v8, %v8143_v52 }
 0x4e3   : > { %v8149_v18 = vpop.permute.xlu1 %3505  ;;  %3453 = vrot.lane.b32.xlu0 %v8119_v41, %s6405_s13  ;;  %9855 = vst [vmem:[#allocation48_spill] sm:$0xff] %v8228_v2  ;;  %v8263_v12 = vpop.eup %5995  ;;  %v3680_v59 = vsub.f32 %v6130_v34, %v3650_v6 }
 0x4e4   : > { %9856 = vst [vmem:[#allocation18_spill] sm:$0xff] %v8263_v12  ;;  %v8272_v0 = vpop.eup %5997  ;;  %v3651_v47 = vsel %vm3643_vm2, %v3620_v56, %v8149_v18 }
 0x4e5   : > { %3455 = vrot.lane.b32.xlu1 %v8126_v7, %s6405_s13  ;;  %v8158_v55 = vpop.permute.xlu0 %3327  ;;  %9857 = vst [vmem:[#allocation20_spill] sm:$0xff] %v8272_v0  ;;  %v3681_v49 = vsub.f32 %v6131_v16, %v3651_v47  ;;  %v3716_v5 = vmul.f32 1.442695, %v3680_v59 }
 0x4e6   : > { %v3590_v44 = vsel %vm3581_vm0, %v7797_v53, %v8158_v55 }
 0x4e7   : > { %v8164_v1 = vpop.permute.xlu1 %3329  ;;  %3543 = vrot.lane.b32.xlu0 %v8119_v41, %s6406_s29  ;;  %v8307_v24 = vpop.eup %5999  ;;  %v3718_v54 = vmul.f32 1.442695, %v3681_v49  ;;  %6003 = vpow2.f32 %v3716_v5 }
 0x4e8   : > { %9858 = vst [vmem:[#allocation51_spill] sm:$0xff] %v8307_v24  ;;  %v3591_v57 = vsel %vm3581_vm0, %v7804_v13, %v8164_v1  ;;  %v6132_v13 = vld [vmem:[%s7206_s28 + $0x80] sm:$0xff] }
 0x4e9   : > { %3545 = vrot.lane.b32.xlu1 %v8126_v7, %s6406_s29  ;;  %v8174_v19 = vpop.permute.xlu0 %3417  ;;  %v8316_v3 = vpop.eup %6001  ;;  %6005 = vpow2.f32 %v3718_v54 }
 0x4ea   : > { %9859 = vst [vmem:[#allocation54_spill] sm:$0xff] %v8316_v3  ;;  %v3621_v23 = vsel %vm3612_vm1, %v3590_v44, %v8174_v19 }
 0x4eb   : > { %v8182_v61 = vpop.permute.xlu1 %3419  ;;  %3367 = vrot.lane.b32.xlu0 %v8170_v39, %s6404_s7 }
 0x4ec   : > { %v3622_v55 = vsel %vm3612_vm1, %v3591_v57, %v8182_v61  ;;  %v6135_v57 = vld [vmem:[%s7206_s28 + $0xb0] sm:$0xff] }
 0x4ed   : > { %3369 = vrot.lane.b32.xlu1 %v8177_v62, %s6404_s7  ;;  %v8195_v38 = vpop.permute.xlu0 %3507 }
 0x4ee   : > { %v3652_v28 = vsel %vm3643_vm2, %v3621_v23, %v8195_v38 }
 0x4ef   : > { %v8201_v9 = vpop.permute.xlu1 %3509  ;;  %3457 = vrot.lane.b32.xlu0 %v8170_v39, %s6405_s13  ;;  %v3682_v1 = vsub.f32 %v6132_v13, %v3652_v28 }
 0x4f0   : > { %v3653_v8 = vsel %vm3643_vm2, %v3622_v55, %v8201_v9 }
 0x4f1   : > { %3459 = vrot.lane.b32.xlu1 %v8177_v62, %s6405_s13  ;;  %v8208_v60 = vpop.permute.xlu0 %3331  ;;  %v3683_v6 = vsub.f32 %v6133_v37, %v3653_v8  ;;  %v3720_v61 = vmul.f32 1.442695, %v3682_v1  ;;  %v8351_v47 = vpop.eup %6003 }
 0x4f2   : > { %9860 = vst [vmem:[#allocation55_spill] sm:$0xff] %v8351_v47  ;;  %v3592_v59 = vsel %vm3581_vm0, %v7833_v32, %v8208_v60 }
 0x4f3   : > { %v8211_v4 = vpop.permute.xlu1 %3333  ;;  %3547 = vrot.lane.b32.xlu0 %v8170_v39, %s6406_s29  ;;  %v3722_v34 = vmul.f32 1.442695, %v3683_v6  ;;  %v8360_v49 = vpop.eup %6005  ;;  %6007 = vpow2.f32 %v3720_v61 }
 0x4f4   : > { %9861 = vst [vmem:[#allocation56_spill] sm:$0xff] %v8360_v49  ;;  %v3593_v54 = vsel %vm3581_vm0, %v7840_v40, %v8211_v4  ;;  %v6134_v40 = vld [vmem:[%s7206_s28 + $0xa0] sm:$0xff] }
 0x4f5   : > { %3549 = vrot.lane.b32.xlu1 %v8177_v62, %s6406_s29  ;;  %v8217_v33 = vpop.permute.xlu0 %3421  ;;  %6009 = vpow2.f32 %v3722_v34 }
 0x4f6   : > { %v3623_v5 = vsel %vm3612_vm1, %v3592_v59, %v8217_v33 }
 0x4f7   : > { %v8224_v63 = vpop.permute.xlu1 %3423  ;;  %3794 = vrot.lane.b32.xlu0 %v8219_v45, %s6401_s30 }
 0x4f8   : > { %v3624_v60 = vsel %vm3612_vm1, %v3593_v54, %v8224_v63  ;;  %v6137_v54 = vld [vmem:[%s7206_s28 + $0xd0] sm:$0xff] }
 0x4f9   : > { %3796 = vrot.lane.b32.xlu1 %v8228_v2, %s6401_s30  ;;  %v8239_v50 = vpop.permute.xlu0 %3511 }
 0x4fa   : > { %v3654_v44 = vsel %vm3643_vm2, %v3623_v5, %v8239_v50 }
 0x4fb   : > { %v8245_v14 = vpop.permute.xlu1 %3513  ;;  %3914 = vrot.lane.b32.xlu0 %v8219_v45, %s6402_s11  ;;  %v3684_v4 = vsub.f32 %v6134_v40, %v3654_v44 }
 0x4fc   : > { %v3655_v23 = vsel %vm3643_vm2, %v3624_v60, %v8245_v14 }
 0x4fd   : > { %3916 = vrot.lane.b32.xlu1 %v8228_v2, %s6402_s11  ;;  %v8252_v30 = vpop.permute.xlu0 %3335  ;;  %v3685_v28 = vsub.f32 %v6135_v57, %v3655_v23  ;;  %v3724_v63 = vmul.f32 1.442695, %v3684_v4  ;;  %v8395_v8 = vpop.eup %6007 }
 0x4fe   : > { %9862 = vst [vmem:[#allocation57_spill] sm:$0xff] %v8395_v8  ;;  %v3594_v1 = vsel %vm3581_vm0, %v7869_v42, %v8252_v30 }
 0x4ff   : > { %v8255_v35 = vpop.permute.xlu1 %3337  ;;  %4034 = vrot.lane.b32.xlu0 %v8219_v45, %s6403_s24  ;;  %v3726_v13 = vmul.f32 1.442695, %v3685_v28  ;;  %v8404_v6 = vpop.eup %6009  ;;  %6011 = vpow2.f32 %v3724_v63 }
 0x500   : > { %9863 = vst [vmem:[#allocation58_spill] sm:$0xff] %v8404_v6  ;;  %v3595_v34 = vsel %vm3581_vm0, %v7876_v58, %v8255_v35  ;;  %v6136_v58 = vld [vmem:[%s7206_s28 + $0xc0] sm:$0xff] }
 0x501   : > { %4036 = vrot.lane.b32.xlu1 %v8228_v2, %s6403_s24  ;;  %v8261_v22 = vpop.permute.xlu0 %3425  ;;  %6013 = vpow2.f32 %v3726_v13 }
 0x502   : > { %v3625_v61 = vsel %vm3612_vm1, %v3594_v1, %v8261_v22 }
 0x503   : > { %v8268_v10 = vpop.permute.xlu1 %3427  ;;  %3798 = vrot.lane.b32.xlu0 %v8263_v12, %s6401_s30 }
 0x504   : > { %v3626_v30 = vsel %vm3612_vm1, %v3595_v34, %v8268_v10  ;;  %v6139_v34 = vld [vmem:[%s7206_s28 + $0xf0] sm:$0xff] }
 0x505   : > { %3800 = vrot.lane.b32.xlu1 %v8272_v0, %s6401_s30  ;;  %v8283_v25 = vpop.permute.xlu0 %3515 }
 0x506   : > { %v3656_v59 = vsel %vm3643_vm2, %v3625_v61, %v8283_v25 }
 0x507   : > { %v8289_v29 = vpop.permute.xlu1 %3517  ;;  %3918 = vrot.lane.b32.xlu0 %v8263_v12, %s6402_s11  ;;  %v3686_v35 = vsub.f32 %v6136_v58, %v3656_v59 }
 0x508   : > { %v3657_v5 = vsel %vm3643_vm2, %v3626_v30, %v8289_v29 }
 0x509   : > { %3920 = vrot.lane.b32.xlu1 %v8272_v0, %s6402_s11  ;;  %v8296_v52 = vpop.permute.xlu0 %3339  ;;  %v3687_v44 = vsub.f32 %v6137_v54, %v3657_v5  ;;  %v3728_v10 = vmul.f32 1.442695, %v3686_v35  ;;  %v8439_v23 = vpop.eup %6011 }
 0x50a   : > { %9864 = vst [vmem:[#allocation59_spill] sm:$0xff] %v8439_v23  ;;  %v3596_v4 = vsel %vm3581_vm0, %v7905_v15, %v8296_v52 }
 0x50b   : > { %v8299_v21 = vpop.permute.xlu1 %3341  ;;  %4038 = vrot.lane.b32.xlu0 %v8263_v12, %s6403_s24  ;;  %v3730_v40 = vmul.f32 1.442695, %v3687_v44  ;;  %v8448_v28 = vpop.eup %6013  ;;  %6015 = vpow2.f32 %v3728_v10 }
 0x50c   : > { %9865 = vst [vmem:[#allocation60_spill] sm:$0xff] %v8448_v28  ;;  %v3597_v13 = vsel %vm3581_vm0, %v7912_v48, %v8299_v21  ;;  %v6138_v48 = vld [vmem:[%s7206_s28 + $0xe0] sm:$0xff] }
 0x50d   : > { %4040 = vrot.lane.b32.xlu1 %v8272_v0, %s6403_s24  ;;  %v8305_v18 = vpop.permute.xlu0 %3429  ;;  %6017 = vpow2.f32 %v3730_v40 }
 0x50e   : > { %v3627_v63 = vsel %vm3612_vm1, %v3596_v4, %v8305_v18 }
 0x50f   : > { %v8312_v11 = vpop.permute.xlu1 %3431  ;;  %3802 = vrot.lane.b32.xlu0 %v8307_v24, %s6401_s30 }
 0x510   : > { %v3628_v52 = vsel %vm3612_vm1, %v3597_v13, %v8312_v11  ;;  %v6141_v13 = vld [vmem:[%s7206_s28 + $0x110] sm:$0xff] }
 0x511   : > { %3804 = vrot.lane.b32.xlu1 %v8316_v3, %s6401_s30  ;;  %v8327_v53 = vpop.permute.xlu0 %3519 }
 0x512   : > { %v3658_v1 = vsel %vm3643_vm2, %v3627_v63, %v8327_v53 }
 0x513   : > { %v8333_v19 = vpop.permute.xlu1 %3521  ;;  %3922 = vrot.lane.b32.xlu0 %v8307_v24, %s6402_s11  ;;  %v3688_v21 = vsub.f32 %v6138_v48, %v3658_v1 }
 0x514   : > { %v3659_v61 = vsel %vm3643_vm2, %v3628_v52, %v8333_v19 }
 0x515   : > { %3924 = vrot.lane.b32.xlu1 %v8316_v3, %s6402_s11  ;;  %v8340_v38 = vpop.permute.xlu0 %3343  ;;  %v3689_v59 = vsub.f32 %v6139_v34, %v3659_v61  ;;  %v3732_v11 = vmul.f32 1.442695, %v3688_v21  ;;  %v8483_v5 = vpop.eup %6015 }
 0x516   : > { %9866 = vst [vmem:[#allocation61_spill] sm:$0xff] %v8483_v5  ;;  %v3598_v35 = vsel %vm3581_vm0, %v7941_v20, %v8340_v38 }
 0x517   : > { %v8343_v56 = vpop.permute.xlu1 %3345  ;;  %4042 = vrot.lane.b32.xlu0 %v8307_v24, %s6403_s24  ;;  %v3734_v58 = vmul.f32 1.442695, %v3689_v59  ;;  %v8492_v44 = vpop.eup %6017  ;;  %6019 = vpow2.f32 %v3732_v11 }
 0x518   : > { %9867 = vst [vmem:[#allocation62_spill] sm:$0xff] %v8492_v44  ;;  %v3599_v40 = vsel %vm3581_vm0, %v7948_v46, %v8343_v56  ;;  %v6140_v46 = vld [vmem:[%s7206_s28 + $0x100] sm:$0xff] }
 0x519   : > { %4044 = vrot.lane.b32.xlu1 %v8316_v3, %s6403_s24  ;;  %v8349_v9 = vpop.permute.xlu0 %3433  ;;  %6021 = vpow2.f32 %v3734_v58 }
 0x51a   : > { %v3629_v10 = vsel %vm3612_vm1, %v3598_v35, %v8349_v9 }
 0x51b   : > { %v8356_v16 = vpop.permute.xlu1 %3435  ;;  %3806 = vrot.lane.b32.xlu0 %v8351_v47, %s6401_s30 }
 0x51c   : > { %v3630_v38 = vsel %vm3612_vm1, %v3599_v40, %v8356_v16  ;;  %v6143_v40 = vld [vmem:[%s7206_s28 + $0x130] sm:$0xff] }
 0x51d   : > { %3808 = vrot.lane.b32.xlu1 %v8360_v49, %s6401_s30  ;;  %v8371_v32 = vpop.permute.xlu0 %3523 }
 0x51e   : > { %v3660_v4 = vsel %vm3643_vm2, %v3629_v10, %v8371_v32 }
 0x51f   : > { %v8377_v33 = vpop.permute.xlu1 %3525  ;;  %3926 = vrot.lane.b32.xlu0 %v8351_v47, %s6402_s11  ;;  %v3690_v56 = vsub.f32 %v6140_v46, %v3660_v4 }
 0x520   : > { %v3661_v63 = vsel %vm3643_vm2, %v3630_v38, %v8377_v33 }
 0x521   : > { %3928 = vrot.lane.b32.xlu1 %v8360_v49, %s6402_s11  ;;  %v8384_v50 = vpop.permute.xlu0 %3347  ;;  %v3691_v1 = vsub.f32 %v6141_v13, %v3661_v63  ;;  %v3736_v16 = vmul.f32 1.442695, %v3690_v56  ;;  %v8527_v61 = vpop.eup %6019 }
 0x522   : > { %9868 = vst [vmem:[#allocation63_spill] sm:$0xff] %v8527_v61  ;;  %v3600_v21 = vsel %vm3581_vm0, %v7977_v26, %v8384_v50 }
 0x523   : > { %v8387_v55 = vpop.permute.xlu1 %3349  ;;  %4046 = vrot.lane.b32.xlu0 %v8351_v47, %s6403_s24  ;;  %v3738_v48 = vmul.f32 1.442695, %v3691_v1  ;;  %v8536_v59 = vpop.eup %6021  ;;  %6023 = vpow2.f32 %v3736_v16 }
 0x524   : > { %9869 = vst [vmem:[#allocation64_spill] sm:$0xff] %v8536_v59  ;;  %v3601_v58 = vsel %vm3581_vm0, %v7984_v43, %v8387_v55  ;;  %v6142_v43 = vld [vmem:[%s7206_s28 + $0x120] sm:$0xff] }
 0x525   : > { %4048 = vrot.lane.b32.xlu1 %v8360_v49, %s6403_s24  ;;  %v8393_v14 = vpop.permute.xlu0 %3437  ;;  %6025 = vpow2.f32 %v3738_v48 }
 0x526   : > { %v3631_v11 = vsel %vm3612_vm1, %v3600_v21, %v8393_v14 }
 0x527   : > { %v8400_v37 = vpop.permute.xlu1 %3439  ;;  %3810 = vrot.lane.b32.xlu0 %v8395_v8, %s6401_s30 }
 0x528   : > { %v3632_v50 = vsel %vm3612_vm1, %v3601_v58, %v8400_v37  ;;  %v6145_v58 = vld [vmem:[%s7206_s28 + $0x150] sm:$0xff] }
 0x529   : > { %3812 = vrot.lane.b32.xlu1 %v8404_v6, %s6401_s30  ;;  %v8415_v42 = vpop.permute.xlu0 %3527 }
 0x52a   : > { %v3662_v35 = vsel %vm3643_vm2, %v3631_v11, %v8415_v42 }
 0x52b   : > { %v8421_v22 = vpop.permute.xlu1 %3529  ;;  %3930 = vrot.lane.b32.xlu0 %v8395_v8, %s6402_s11  ;;  %v3692_v55 = vsub.f32 %v6142_v43, %v3662_v35 }
 0x52c   : > { %v3663_v10 = vsel %vm3643_vm2, %v3632_v50, %v8421_v22 }
 0x52d   : > { %3932 = vrot.lane.b32.xlu1 %v8404_v6, %s6402_s11  ;;  %v8428_v25 = vpop.permute.xlu0 %3351  ;;  %v3693_v4 = vsub.f32 %v6143_v40, %v3663_v10  ;;  %v3740_v37 = vmul.f32 1.442695, %v3692_v55  ;;  %v8571_v63 = vpop.eup %6023 }
 0x52e   : > { %9870 = vst [vmem:[#allocation65_spill] sm:$0xff] %v8571_v63  ;;  %v3602_v56 = vsel %vm3581_vm0, %v8013_v17, %v8428_v25 }
 0x52f   : > { %v8431_v60 = vpop.permute.xlu1 %3353  ;;  %4050 = vrot.lane.b32.xlu0 %v8395_v8, %s6403_s24  ;;  %v3742_v46 = vmul.f32 1.442695, %v3693_v4  ;;  %v8580_v1 = vpop.eup %6025  ;;  %6027 = vpow2.f32 %v3740_v37 }
 0x530   : > { %9871 = vst [vmem:[#allocation66_spill] sm:$0xff] %v8580_v1  ;;  %v3603_v48 = vsel %vm3581_vm0, %v8020_v51, %v8431_v60  ;;  %v6144_v51 = vld [vmem:[%s7206_s28 + $0x140] sm:$0xff] }
 0x531   : > { %4052 = vrot.lane.b32.xlu1 %v8404_v6, %s6403_s24  ;;  %v8437_v29 = vpop.permute.xlu0 %3441  ;;  %6029 = vpow2.f32 %v3742_v46  ;;  %v9874_v46 = vld [vmem:[#allocation53_spill] sm:$0xff] }
 0x532   : > { %v3633_v16 = vsel %vm3612_vm1, %v3602_v56, %v8437_v29 }
 0x533   : > { %v8444_v57 = vpop.permute.xlu1 %3443  ;;  %3814 = vrot.lane.b32.xlu0 %v8439_v23, %s6401_s30 }
 0x534   : > { %v3634_v25 = vsel %vm3612_vm1, %v3603_v48, %v8444_v57 }
 0x535   : > { %3816 = vrot.lane.b32.xlu1 %v8448_v28, %s6401_s30  ;;  %v8459_v15 = vpop.permute.xlu0 %3531 }
 0x536   : > { %v3664_v21 = vsel %vm3643_vm2, %v3633_v16, %v8459_v15 }
 0x537   : > { %v8465_v18 = vpop.permute.xlu1 %3533  ;;  %3934 = vrot.lane.b32.xlu0 %v8439_v23, %s6402_s11  ;;  %v3694_v60 = vsub.f32 %v6144_v51, %v3664_v21 }
 0x538   : > { %v3665_v11 = vsel %vm3643_vm2, %v3634_v25, %v8465_v18  ;;  %v6147_v25 = vld [vmem:[%s7206_s28 + $0x170] sm:$0xff] }
 0x539   : > { %3936 = vrot.lane.b32.xlu1 %v8448_v28, %s6402_s11  ;;  %v8472_v53 = vpop.permute.xlu0 %3355  ;;  %v3695_v35 = vsub.f32 %v6145_v58, %v3665_v11  ;;  %v3744_v57 = vmul.f32 1.442695, %v3694_v60  ;;  %v8615_v10 = vpop.eup %6027 }
 0x53a   : > { %9872 = vst [vmem:[#allocation67_spill] sm:$0xff] %v8615_v10  ;;  %v3604_v55 = vsel %vm3581_vm0, %v8047_v31, %v8472_v53 }
 0x53b   : > { %v8475_v30 = vpop.permute.xlu1 %3357  ;;  %4054 = vrot.lane.b32.xlu0 %v8439_v23, %s6403_s24  ;;  %v3746_v43 = vmul.f32 1.442695, %v3695_v35  ;;  %v8624_v4 = vpop.eup %6029  ;;  %6031 = vpow2.f32 %v3744_v57 }
 0x53c   : > { %9873 = vst [vmem:[#allocation68_spill] sm:$0xff] %v8624_v4  ;;  %v3605_v56 = vsel %vm3581_vm0, %v9874_v46, %v8475_v30  ;;  %v6146_v30 = vld [vmem:[%s7206_s28 + $0x160] sm:$0xff] }
 0x53d   : > { %4056 = vrot.lane.b32.xlu1 %v8448_v28, %s6403_s24  ;;  %v8481_v19 = vpop.permute.xlu0 %3445  ;;  %6033 = vpow2.f32 %v3746_v43 }
 0x53e   : > { %v3635_v37 = vsel %vm3612_vm1, %v3604_v55, %v8481_v19 }
 0x53f   : > { %v8488_v54 = vpop.permute.xlu1 %3447  ;;  %3818 = vrot.lane.b32.xlu0 %v8483_v5, %s6401_s30 }
 0x540   : > { %v3636_v53 = vsel %vm3612_vm1, %v3605_v56, %v8488_v54 }
 0x541   : > { %3820 = vrot.lane.b32.xlu1 %v8492_v44, %s6401_s30  ;;  %v8503_v20 = vpop.permute.xlu0 %3535 }
 0x542   : > { %v3666_v16 = vsel %vm3643_vm2, %v3635_v37, %v8503_v20 }
 0x543   : > { %v8509_v9 = vpop.permute.xlu1 %3537  ;;  %3938 = vrot.lane.b32.xlu0 %v8483_v5, %s6402_s11  ;;  %v3696_v21 = vsub.f32 %v6146_v30, %v3666_v16  ;;  %v6149_v16 = vld [vmem:[%s7206_s28 + $0x190] sm:$0xff] }
 0x544   : > { %v3667_v48 = vsel %vm3643_vm2, %v3636_v53, %v8509_v9 }
 0x545   : > { %3940 = vrot.lane.b32.xlu1 %v8492_v44, %s6402_s11  ;;  %v8516_v32 = vpop.permute.xlu0 %3359  ;;  %v3697_v11 = vsub.f32 %v6147_v25, %v3667_v48  ;;  %v3748_v54 = vmul.f32 1.442695, %v3696_v21  ;;  %v8659_v60 = vpop.eup %6031 }
 0x546   : > { %9875 = vst [vmem:[#allocation53_spill] sm:$0xff] %v8659_v60  ;;  %v3606_v35 = vsel %vm3581_vm0, %v8083_v27, %v8516_v32 }
 0x547   : > { %v8519_v52 = vpop.permute.xlu1 %3361  ;;  %4058 = vrot.lane.b32.xlu0 %v8483_v5, %s6403_s24  ;;  %v3750_v58 = vmul.f32 1.442695, %v3697_v11  ;;  %v8668_v43 = vpop.eup %6033  ;;  %6035 = vpow2.f32 %v3748_v54 }
 0x548   : > { %9876 = vst [vmem:[#allocation69_spill] sm:$0xff] %v8668_v43  ;;  %v3607_v37 = vsel %vm3581_vm0, %v8090_v36, %v8519_v52  ;;  %v6148_v36 = vld [vmem:[%s7206_s28 + $0x180] sm:$0xff] }
 0x549   : > { %4060 = vrot.lane.b32.xlu1 %v8492_v44, %s6403_s24  ;;  %v8525_v33 = vpop.permute.xlu0 %3449  ;;  %6037 = vpow2.f32 %v3750_v58 }
 0x54a   : > { %v3637_v55 = vsel %vm3612_vm1, %v3606_v35, %v8525_v33 }
 0x54b   : > { %v8532_v34 = vpop.permute.xlu1 %3451  ;;  %3822 = vrot.lane.b32.xlu0 %v8527_v61, %s6401_s30 }
 0x54c   : > { %v3638_v32 = vsel %vm3612_vm1, %v3607_v37, %v8532_v34 }
 0x54d   : > { %3824 = vrot.lane.b32.xlu1 %v8536_v59, %s6401_s30  ;;  %v8547_v26 = vpop.permute.xlu0 %3539 }
 0x54e   : > { %v3668_v46 = vsel %vm3643_vm2, %v3637_v55, %v8547_v26 }
 0x54f   : > { %v8553_v14 = vpop.permute.xlu1 %3541  ;;  %3942 = vrot.lane.b32.xlu0 %v8527_v61, %s6402_s11  ;;  %v3698_v52 = vsub.f32 %v6148_v36, %v3668_v46  ;;  %v6151_v46 = vld [vmem:[%s7206_s28 + $0x1b0] sm:$0xff] }
 0x550   : > { %v3669_v56 = vsel %vm3643_vm2, %v3638_v32, %v8553_v14 }
 0x551   : > { %3944 = vrot.lane.b32.xlu1 %v8536_v59, %s6402_s11  ;;  %v8560_v42 = vpop.permute.xlu0 %3363  ;;  %v3699_v53 = vsub.f32 %v6149_v16, %v3669_v56  ;;  %v3752_v34 = vmul.f32 1.442695, %v3698_v52  ;;  %v8703_v30 = vpop.eup %6035 }
 0x552   : > { %9877 = vst [vmem:[#allocation70_spill] sm:$0xff] %v8703_v30  ;;  %v3608_v25 = vsel %vm3581_vm0, %v8119_v41, %v8560_v42 }
 0x553   : > { %v8563_v38 = vpop.permute.xlu1 %3365  ;;  %4062 = vrot.lane.b32.xlu0 %v8527_v61, %s6403_s24  ;;  %v3754_v21 = vmul.f32 1.442695, %v3699_v53  ;;  %v8712_v54 = vpop.eup %6037  ;;  %6039 = vpow2.f32 %v3752_v34 }
 0x554   : > { %9878 = vst [vmem:[#allocation71_spill] sm:$0xff] %v8712_v54  ;;  %v3609_v35 = vsel %vm3581_vm0, %v8126_v7, %v8563_v38  ;;  %v6150_v7 = vld [vmem:[%s7206_s28 + $0x1a0] sm:$0xff] }
 0x555   : > { %4064 = vrot.lane.b32.xlu1 %v8536_v59, %s6403_s24  ;;  %v8569_v22 = vpop.permute.xlu0 %3453  ;;  %6041 = vpow2.f32 %v3754_v21 }
 0x556   : > { %v3639_v58 = vsel %vm3612_vm1, %v3608_v25, %v8569_v22 }
 0x557   : > { %v8576_v13 = vpop.permute.xlu1 %3455  ;;  %3826 = vrot.lane.b32.xlu0 %v8571_v63, %s6401_s30 }
 0x558   : > { %v3640_v42 = vsel %vm3612_vm1, %v3609_v35, %v8576_v13 }
 0x559   : > { %3828 = vrot.lane.b32.xlu1 %v8580_v1, %s6401_s30  ;;  %v8591_v17 = vpop.permute.xlu0 %3543 }
 0x55a   : > { %v3670_v55 = vsel %vm3643_vm2, %v3639_v58, %v8591_v17 }
 0x55b   : > { %v8597_v29 = vpop.permute.xlu1 %3545  ;;  %3946 = vrot.lane.b32.xlu0 %v8571_v63, %s6402_s11  ;;  %v3700_v38 = vsub.f32 %v6150_v7, %v3670_v55  ;;  %v6153_v55 = vld [vmem:[%s7206_s28 + $0x1d0] sm:$0xff] }
 0x55c   : > { %v3671_v37 = vsel %vm3643_vm2, %v3640_v42, %v8597_v29 }
 0x55d   : > { %3948 = vrot.lane.b32.xlu1 %v8580_v1, %s6402_s11  ;;  %v8604_v15 = vpop.permute.xlu0 %3367  ;;  %v3701_v32 = vsub.f32 %v6151_v46, %v3671_v37  ;;  %v3756_v13 = vmul.f32 1.442695, %v3700_v38  ;;  %v8747_v36 = vpop.eup %6039 }
 0x55e   : > { %9879 = vst [vmem:[#allocation72_spill] sm:$0xff] %v8747_v36  ;;  %v3610_v16 = vsel %vm3581_vm0, %v8170_v39, %v8604_v15 }
 0x55f   : > { %v8607_v50 = vpop.permute.xlu1 %3369  ;;  %4066 = vrot.lane.b32.xlu0 %v8571_v63, %s6403_s24  ;;  %v3758_v52 = vmul.f32 1.442695, %v3701_v32  ;;  %v8756_v34 = vpop.eup %6041  ;;  %6043 = vpow2.f32 %v3756_v13 }
 0x560   : > { %9880 = vst [vmem:[#allocation73_spill] sm:$0xff] %v8756_v34  ;;  %v3611_v25 = vsel %vm3581_vm0, %v8177_v62, %v8607_v50  ;;  %v6152_v62 = vld [vmem:[%s7206_s28 + $0x1c0] sm:$0xff] }
 0x561   : > { %4068 = vrot.lane.b32.xlu1 %v8580_v1, %s6403_s24  ;;  %v8613_v18 = vpop.permute.xlu0 %3457  ;;  %6045 = vpow2.f32 %v3758_v52 }
 0x562   : > { %v3641_v21 = vsel %vm3612_vm1, %v3610_v16, %v8613_v18 }
 0x563   : > { %v8620_v40 = vpop.permute.xlu1 %3459  ;;  %3830 = vrot.lane.b32.xlu0 %v8615_v10, %s6401_s30 }
 0x564   : > { %v3642_v15 = vsel %vm3612_vm1, %v3611_v25, %v8620_v40 }
 0x565   : > { %3832 = vrot.lane.b32.xlu1 %v8624_v4, %s6401_s30  ;;  %v8635_v31 = vpop.permute.xlu0 %3547 }
 0x566   : > { %v3672_v58 = vsel %vm3643_vm2, %v3641_v21, %v8635_v31 }
 0x567   : > { %v8641_v19 = vpop.permute.xlu1 %3549  ;;  %3950 = vrot.lane.b32.xlu0 %v8615_v10, %s6402_s11  ;;  %v3702_v50 = vsub.f32 %v6152_v62, %v3672_v58 }
 0x568   : > { %v3673_v35 = vsel %vm3643_vm2, %v3642_v15, %v8641_v19 }
 0x569   : > { %3952 = vrot.lane.b32.xlu1 %v8624_v4, %s6402_s11  ;;  %v8648_v20 = vpop.permute.xlu0 %3794  ;;  %v3703_v42 = vsub.f32 %v6153_v55, %v3673_v35  ;;  %v3760_v40 = vmul.f32 1.442695, %v3702_v50  ;;  %v8791_v7 = vpop.eup %6043 }
 0x56a   : > { %9881 = vst [vmem:[#allocation74_spill] sm:$0xff] %v8791_v7  ;;  %v3884_v55 = vadd.f32 %v8219_v45, %v8648_v20 }
 0x56b   : > { %v8651_v51 = vpop.permute.xlu1 %3796  ;;  %4070 = vrot.lane.b32.xlu0 %v8615_v10, %s6403_s24  ;;  %v3762_v38 = vmul.f32 1.442695, %v3703_v42  ;;  %v8797_v32 = vpop.eup %6045  ;;  %6047 = vpow2.f32 %v3760_v40 }
 0x56c   : > { %9882 = vst [vmem:[#allocation75_spill] sm:$0xff] %v8797_v32  ;;  %v3885_v40 = vadd.f32 %v8228_v2, %v8651_v51 }
 0x56d   : > { %4072 = vrot.lane.b32.xlu1 %v8624_v4, %s6403_s24  ;;  %v8657_v9 = vpop.permute.xlu0 %3914  ;;  %6049 = vpow2.f32 %v3762_v38 }
 0x56e   : > { %v4004_v38 = vadd.f32 %v8657_v9, %v3884_v55 }
 0x56f   : > { %v8664_v57 = vpop.permute.xlu1 %3916  ;;  %3834 = vrot.lane.b32.xlu0 %v8659_v60, %s6401_s30 }
 0x571   : > { %3836 = vrot.lane.b32.xlu1 %v8668_v43, %s6401_s30  ;;  %v8679_v27 = vpop.permute.xlu0 %4034 }
 0x573   : > { %v8685_v33 = vpop.permute.xlu1 %4036  ;;  %3954 = vrot.lane.b32.xlu0 %v8659_v60, %s6402_s11 }
 0x575   : > { %3956 = vrot.lane.b32.xlu1 %v8668_v43, %s6402_s11  ;;  %v8692_v26 = vpop.permute.xlu0 %3798  ;;  %v8819_v58 = vpop.eup %6047 }
 0x577   : > { %v8695_v48 = vpop.permute.xlu1 %3800  ;;  %4074 = vrot.lane.b32.xlu0 %v8659_v60, %s6403_s24  ;;  %v8825_v35 = vpop.eup %6049 }
 0x579   : > { %4076 = vrot.lane.b32.xlu1 %v8668_v43, %s6403_s24  ;;  %v8701_v14 = vpop.permute.xlu0 %3918 }
 0x57b   : > { %v8708_v11 = vpop.permute.xlu1 %3920  ;;  %3838 = vrot.lane.b32.xlu0 %v8703_v30, %s6401_s30 }
 0x57d   : > { %3840 = vrot.lane.b32.xlu1 %v8712_v54, %s6401_s30  ;;  %v8723_v41 = vpop.permute.xlu0 %4038 }
 0x57f   : > { %v8729_v22 = vpop.permute.xlu1 %4040  ;;  %3958 = vrot.lane.b32.xlu0 %v8703_v30, %s6402_s11 }
 0x581   : > { %3960 = vrot.lane.b32.xlu1 %v8712_v54, %s6402_s11  ;;  %v8736_v17 = vpop.permute.xlu0 %3802 }
 0x583   : > { %v8739_v56 = vpop.permute.xlu1 %3804  ;;  %4078 = vrot.lane.b32.xlu0 %v8703_v30, %s6403_s24 }
 0x585   : > { %4080 = vrot.lane.b32.xlu1 %v8712_v54, %s6403_s24  ;;  %v8745_v29 = vpop.permute.xlu0 %3922 }
 0x587   : > { %v8752_v53 = vpop.permute.xlu1 %3924  ;;  %3842 = vrot.lane.b32.xlu0 %v8747_v36, %s6401_s30 }
 0x589   : > { %3844 = vrot.lane.b32.xlu1 %v8756_v34, %s6401_s30  ;;  %v8767_v39 = vpop.permute.xlu0 %4042 }
 0x58b   : > { %v8773_v18 = vpop.permute.xlu1 %4044  ;;  %3962 = vrot.lane.b32.xlu0 %v8747_v36, %s6402_s11 }
 0x58d   : > { %3964 = vrot.lane.b32.xlu1 %v8756_v34, %s6402_s11  ;;  %v8780_v31 = vpop.permute.xlu0 %3806 }
 0x58f   : > { %v8783_v37 = vpop.permute.xlu1 %3808  ;;  %4082 = vrot.lane.b32.xlu0 %v8747_v36, %s6403_s24 }
 0x591   : > { %4084 = vrot.lane.b32.xlu1 %v8756_v34, %s6403_s24  ;;  %v8789_v19 = vpop.permute.xlu0 %3926  ;;  %v8850_v34 = vadd.f32 %v8679_v27, %v4004_v38  ;;  %v3886_v27 = vadd.f32 %v8263_v12, %v8692_v26 }
 0x593   : > { %v8793_v46 = vpop.permute.xlu1 %3928  ;;  %3846 = vrot.lane.b32.xlu0 %v8791_v7, %s6401_s30  ;;  %v4006_v55 = vadd.f32 %v8701_v14, %v3886_v27  ;;  %v3889_v27 = vadd.f32 %v8316_v3, %v8739_v56 }
 0x595   : > { %3848 = vrot.lane.b32.xlu1 %v8797_v32, %s6401_s30  ;;  %v8801_v13 = vpop.permute.xlu0 %4046  ;;  %v8886_v2 = vadd.f32 %v8723_v41, %v4006_v55  ;;  %v3888_v41 = vadd.f32 %v8307_v24, %v8736_v17 }
 0x597   : > { %v8803_v52 = vpop.permute.xlu1 %4048  ;;  %3966 = vrot.lane.b32.xlu0 %v8791_v7, %s6402_s11 }
 0x599   : > { %3968 = vrot.lane.b32.xlu1 %v8797_v32, %s6402_s11  ;;  %v8809_v16 = vpop.permute.xlu0 %3810 }
 0x59b   : > { %v8811_v21 = vpop.permute.xlu1 %3812  ;;  %4086 = vrot.lane.b32.xlu0 %v8791_v7, %s6403_s24  ;;  %v4005_v7 = vadd.f32 %v8664_v57, %v3885_v40 }
 0x59d   : > { %4088 = vrot.lane.b32.xlu1 %v8797_v32, %s6403_s24  ;;  %v8817_v25 = vpop.permute.xlu0 %3930  ;;  %v8857_v45 = vadd.f32 %v8685_v33, %v4005_v7  ;;  %v3887_v7 = vadd.f32 %v8272_v0, %v8695_v48 }
 0x59f   : > { %v8821_v15 = vpop.permute.xlu1 %3932  ;;  %3850 = vrot.lane.b32.xlu0 %v8819_v58, %s6401_s30  ;;  %v4007_v38 = vadd.f32 %v8708_v11, %v3887_v7  ;;  %v4008_v7 = vadd.f32 %v8745_v29, %v3888_v41  ;;  %v3891_v41 = vadd.f32 %v8360_v49, %v8783_v37 }
 0x5a1   : > { %3852 = vrot.lane.b32.xlu1 %v8825_v35, %s6401_s30  ;;  %v8829_v62 = vpop.permute.xlu0 %4050  ;;  %v8893_v12 = vadd.f32 %v8729_v22, %v4007_v38  ;;  %v4009_v38 = vadd.f32 %v8752_v53, %v3889_v27  ;;  %v8922_v0 = vadd.f32 %v8767_v39, %v4008_v7  ;;  %v3890_v39 = vadd.f32 %v8351_v47, %v8780_v31 }
 0x5a3   : > { %v8831_v50 = vpop.permute.xlu1 %4052  ;;  %3970 = vrot.lane.b32.xlu0 %v8819_v58, %s6402_s11  ;;  %v8929_v24 = vadd.f32 %v8773_v18, %v4009_v38  ;;  %v4010_v27 = vadd.f32 %v8789_v19, %v3890_v39  ;;  %v4011_v38 = vadd.f32 %v8793_v46, %v3891_v41  ;;  %v3893_v39 = vadd.f32 %v8404_v6, %v8811_v21 }
 0x5a5   : > { %3972 = vrot.lane.b32.xlu1 %v8825_v35, %s6402_s11  ;;  %v8839_v42 = vpop.permute.xlu0 %3814  ;;  %v8958_v3 = vadd.f32 %v8801_v13, %v4010_v27  ;;  %v8965_v47 = vadd.f32 %v8803_v52, %v4011_v38  ;;  %v3892_v13 = vadd.f32 %v8395_v8, %v8809_v16  ;;  %v4013_v38 = vadd.f32 %v8821_v15, %v3893_v39 }
 0x5a7   : > { %v8844_v32 = vpop.permute.xlu1 %3816  ;;  %4090 = vrot.lane.b32.xlu0 %v8819_v58, %s6403_s24  ;;  %v4012_v41 = vadd.f32 %v8817_v25, %v3892_v13  ;;  %v9001_v8 = vadd.f32 %v8831_v50, %v4013_v38 }
 0x5a8   : > { %v3895_v13 = vadd.f32 %v8448_v28, %v8844_v32 }
 0x5a9   : > { %4092 = vrot.lane.b32.xlu1 %v8825_v35, %s6403_s24  ;;  %v8854_v20 = vpop.permute.xlu0 %3934  ;;  %v8994_v49 = vadd.f32 %v8829_v62, %v4012_v41  ;;  %v3894_v62 = vadd.f32 %v8439_v23, %v8839_v42 }
 0x5ab   : > { %v8859_v51 = vpop.permute.xlu1 %3936  ;;  %4184 = vrot.lane.b32.xlu0 %v8850_v34, %s6404_s7  ;;  %v4014_v39 = vadd.f32 %v8854_v20, %v3894_v62 }
 0x5ac   : > { %v4015_v38 = vadd.f32 %v8859_v51, %v3895_v13 }
 0x5ad   : > { %4186 = vrot.lane.b32.xlu1 %v8857_v45, %s6404_s7  ;;  %v8865_v9 = vpop.permute.xlu0 %4054 }
 0x5ae   : > { %v9030_v6 = vadd.f32 %v8865_v9, %v4014_v39 }
 0x5af   : > { %v8867_v57 = vpop.permute.xlu1 %4056  ;;  %4274 = vrot.lane.b32.xlu0 %v8850_v34, %s6405_s13 }
 0x5b0   : > { %v9037_v23 = vadd.f32 %v8867_v57, %v4015_v38 }
 0x5b1   : > { %4276 = vrot.lane.b32.xlu1 %v8857_v45, %s6405_s13  ;;  %v8875_v33 = vpop.permute.xlu0 %3818 }
 0x5b2   : > { %v3896_v9 = vadd.f32 %v8483_v5, %v8875_v33 }
 0x5b3   : > { %v8880_v40 = vpop.permute.xlu1 %3820  ;;  %4364 = vrot.lane.b32.xlu0 %v8850_v34, %s6406_s29 }
 0x5b4   : > { %v3897_v62 = vadd.f32 %v8492_v44, %v8880_v40 }
 0x5b5   : > { %4366 = vrot.lane.b32.xlu1 %v8857_v45, %s6406_s29  ;;  %v8890_v26 = vpop.permute.xlu0 %3938 }
 0x5b6   : > { %v4016_v13 = vadd.f32 %v8890_v26, %v3896_v9 }
 0x5b7   : > { %v8895_v48 = vpop.permute.xlu1 %3940  ;;  %4188 = vrot.lane.b32.xlu0 %v8886_v2, %s6404_s7 }
 0x5b8   : > { %v4017_v38 = vadd.f32 %v8895_v48, %v3897_v62 }
 0x5b9   : > { %4190 = vrot.lane.b32.xlu1 %v8893_v12, %s6404_s7  ;;  %v8901_v14 = vpop.permute.xlu0 %4058 }
 0x5ba   : > { %v9066_v28 = vadd.f32 %v8901_v14, %v4016_v13 }
 0x5bb   : > { %v8903_v11 = vpop.permute.xlu1 %4060  ;;  %4278 = vrot.lane.b32.xlu0 %v8886_v2, %s6405_s13 }
 0x5bc   : > { %v9073_v5 = vadd.f32 %v8903_v11, %v4017_v38 }
 0x5bd   : > { %4280 = vrot.lane.b32.xlu1 %v8893_v12, %s6405_s13  ;;  %v8911_v22 = vpop.permute.xlu0 %3822 }
 0x5be   : > { %v3898_v14 = vadd.f32 %v8527_v61, %v8911_v22 }
 0x5bf   : > { %v8916_v55 = vpop.permute.xlu1 %3824  ;;  %4368 = vrot.lane.b32.xlu0 %v8886_v2, %s6406_s29 }
 0x5c0   : > { %v3899_v9 = vadd.f32 %v8536_v59, %v8916_v55 }
 0x5c1   : > { %4370 = vrot.lane.b32.xlu1 %v8893_v12, %s6406_s29  ;;  %v8926_v17 = vpop.permute.xlu0 %3942 }
 0x5c2   : > { %v4018_v62 = vadd.f32 %v8926_v17, %v3898_v14 }
 0x5c3   : > { %v8931_v56 = vpop.permute.xlu1 %3944  ;;  %4192 = vrot.lane.b32.xlu0 %v8922_v0, %s6404_s7 }
 0x5c4   : > { %v4019_v38 = vadd.f32 %v8931_v56, %v3899_v9 }
 0x5c5   : > { %4194 = vrot.lane.b32.xlu1 %v8929_v24, %s6404_s7  ;;  %v8937_v29 = vpop.permute.xlu0 %4062 }
 0x5c6   : > { %v9102_v44 = vadd.f32 %v8937_v29, %v4018_v62 }
 0x5c7   : > { %v8939_v53 = vpop.permute.xlu1 %4064  ;;  %4282 = vrot.lane.b32.xlu0 %v8922_v0, %s6405_s13 }
 0x5c8   : > { %v9109_v61 = vadd.f32 %v8939_v53, %v4019_v38 }
 0x5c9   : > { %4284 = vrot.lane.b32.xlu1 %v8929_v24, %s6405_s13  ;;  %v8947_v18 = vpop.permute.xlu0 %3826 }
 0x5ca   : > { %v3900_v29 = vadd.f32 %v8571_v63, %v8947_v18 }
 0x5cb   : > { %v8952_v7 = vpop.permute.xlu1 %3828  ;;  %4372 = vrot.lane.b32.xlu0 %v8922_v0, %s6406_s29 }
 0x5cc   : > { %v3901_v14 = vadd.f32 %v8580_v1, %v8952_v7 }
 0x5cd   : > { %4374 = vrot.lane.b32.xlu1 %v8929_v24, %s6406_s29  ;;  %v8962_v31 = vpop.permute.xlu0 %3946 }
 0x5ce   : > { %v4020_v9 = vadd.f32 %v8962_v31, %v3900_v29 }
 0x5cf   : > { %v8967_v37 = vpop.permute.xlu1 %3948  ;;  %4196 = vrot.lane.b32.xlu0 %v8958_v3, %s6404_s7 }
 0x5d0   : > { %v4021_v38 = vadd.f32 %v8967_v37, %v3901_v14 }
 0x5d1   : > { %4198 = vrot.lane.b32.xlu1 %v8965_v47, %s6404_s7  ;;  %v8973_v19 = vpop.permute.xlu0 %4066 }
 0x5d2   : > { %v9138_v59 = vadd.f32 %v8973_v19, %v4020_v9 }
 0x5d3   : > { %v8975_v46 = vpop.permute.xlu1 %4068  ;;  %4286 = vrot.lane.b32.xlu0 %v8958_v3, %s6405_s13 }
 0x5d4   : > { %v9145_v63 = vadd.f32 %v8975_v46, %v4021_v38 }
 0x5d5   : > { %4288 = vrot.lane.b32.xlu1 %v8965_v47, %s6405_s13  ;;  %v8983_v52 = vpop.permute.xlu0 %3830 }
 0x5d6   : > { %v3902_v19 = vadd.f32 %v8615_v10, %v8983_v52 }
 0x5d7   : > { %v8988_v27 = vpop.permute.xlu1 %3832  ;;  %4376 = vrot.lane.b32.xlu0 %v8958_v3, %s6406_s29 }
 0x5d8   : > { %v3903_v29 = vadd.f32 %v8624_v4, %v8988_v27 }
 0x5d9   : > { %4378 = vrot.lane.b32.xlu1 %v8965_v47, %s6406_s29  ;;  %v8998_v16 = vpop.permute.xlu0 %3950 }
 0x5da   : > { %v4022_v14 = vadd.f32 %v8998_v16, %v3902_v19 }
 0x5db   : > { %v9003_v21 = vpop.permute.xlu1 %3952  ;;  %4200 = vrot.lane.b32.xlu0 %v8994_v49, %s6404_s7 }
 0x5dc   : > { %v4023_v38 = vadd.f32 %v9003_v21, %v3903_v29 }
 0x5dd   : > { %4202 = vrot.lane.b32.xlu1 %v9001_v8, %s6404_s7  ;;  %v9009_v25 = vpop.permute.xlu0 %4070 }
 0x5de   : > { %v9174_v1 = vadd.f32 %v9009_v25, %v4022_v14 }
 0x5df   : > { %v9011_v15 = vpop.permute.xlu1 %4072  ;;  %4290 = vrot.lane.b32.xlu0 %v8994_v49, %s6405_s13 }
 0x5e0   : > { %v9181_v10 = vadd.f32 %v9011_v15, %v4023_v38 }
 0x5e1   : > { %4292 = vrot.lane.b32.xlu1 %v9001_v8, %s6405_s13  ;;  %v9019_v50 = vpop.permute.xlu0 %3834 }
 0x5e2   : > { %v3904_v25 = vadd.f32 %v8659_v60, %v9019_v50 }
 0x5e3   : > { %v9024_v41 = vpop.permute.xlu1 %3836  ;;  %4380 = vrot.lane.b32.xlu0 %v8994_v49, %s6406_s29 }
 0x5e4   : > { %v3905_v19 = vadd.f32 %v8668_v43, %v9024_v41 }
 0x5e5   : > { %4382 = vrot.lane.b32.xlu1 %v9001_v8, %s6406_s29  ;;  %v9034_v42 = vpop.permute.xlu0 %3954 }
 0x5e6   : > { %v4024_v29 = vadd.f32 %v9034_v42, %v3904_v25 }
 0x5e7   : > { %v9039_v32 = vpop.permute.xlu1 %3956  ;;  %4204 = vrot.lane.b32.xlu0 %v9030_v6, %s6404_s7 }
 0x5e8   : > { %v4025_v38 = vadd.f32 %v9039_v32, %v3905_v19 }
 0x5e9   : > { %4206 = vrot.lane.b32.xlu1 %v9037_v23, %s6404_s7  ;;  %v9045_v20 = vpop.permute.xlu0 %4074 }
 0x5ea   : > { %v9210_v4 = vadd.f32 %v9045_v20, %v4024_v29 }
 0x5eb   : > { %v9047_v51 = vpop.permute.xlu1 %4076  ;;  %4294 = vrot.lane.b32.xlu0 %v9030_v6, %s6405_s13 }
 0x5ec   : > { %9883 = vst [vmem:[#allocation76_spill] sm:$0xff] %v9210_v4  ;;  %v9217_v60 = vadd.f32 %v9047_v51, %v4025_v38 }
 0x5ed   : > { %4296 = vrot.lane.b32.xlu1 %v9037_v23, %s6405_s13  ;;  %v9055_v57 = vpop.permute.xlu0 %3838 }
 0x5ee   : > { %9884 = vst [vmem:[#allocation77_spill] sm:$0xff] %v9217_v60  ;;  %v3906_v20 = vadd.f32 %v8703_v30, %v9055_v57 }
 0x5ef   : > { %v9060_v39 = vpop.permute.xlu1 %3840  ;;  %4384 = vrot.lane.b32.xlu0 %v9030_v6, %s6406_s29 }
 0x5f0   : > { %v3907_v25 = vadd.f32 %v8712_v54, %v9060_v39 }
 0x5f1   : > { %4386 = vrot.lane.b32.xlu1 %v9037_v23, %s6406_s29  ;;  %v9070_v33 = vpop.permute.xlu0 %3958 }
 0x5f2   : > { %v4026_v19 = vadd.f32 %v9070_v33, %v3906_v20  ;;  %v9887_v20 = vld [vmem:[#allocation73_spill] sm:$0xff] }
 0x5f3   : > { %v9075_v40 = vpop.permute.xlu1 %3960  ;;  %4208 = vrot.lane.b32.xlu0 %v9066_v28, %s6404_s7 }
 0x5f4   : > { %v4027_v38 = vadd.f32 %v9075_v40, %v3907_v25 }
 0x5f5   : > { %4210 = vrot.lane.b32.xlu1 %v9073_v5, %s6404_s7  ;;  %v9081_v26 = vpop.permute.xlu0 %4078 }
 0x5f6   : > { %v9244_v43 = vadd.f32 %v9081_v26, %v4026_v19 }
 0x5f7   : > { %v9083_v48 = vpop.permute.xlu1 %4080  ;;  %4298 = vrot.lane.b32.xlu0 %v9066_v28, %s6405_s13 }
 0x5f8   : > { %9885 = vst [vmem:[#allocation78_spill] sm:$0xff] %v9244_v43  ;;  %v9249_v30 = vadd.f32 %v9083_v48, %v4027_v38 }
 0x5f9   : > { %4300 = vrot.lane.b32.xlu1 %v9073_v5, %s6405_s13  ;;  %v9091_v11 = vpop.permute.xlu0 %3842 }
 0x5fa   : > { %9886 = vst [vmem:[#allocation79_spill] sm:$0xff] %v9249_v30  ;;  %v3908_v26 = vadd.f32 %v8747_v36, %v9091_v11 }
 0x5fb   : > { %v9096_v13 = vpop.permute.xlu1 %3844  ;;  %4388 = vrot.lane.b32.xlu0 %v9066_v28, %s6406_s29 }
 0x5fc   : > { %v3909_v25 = vadd.f32 %v9887_v20, %v9096_v13 }
 0x5fd   : > { %4390 = vrot.lane.b32.xlu1 %v9073_v5, %s6406_s29  ;;  %v9106_v22 = vpop.permute.xlu0 %3962 }
 0x5fe   : > { %v4028_v19 = vadd.f32 %v9106_v22, %v3908_v26 }
 0x5ff   : > { %v9111_v55 = vpop.permute.xlu1 %3964  ;;  %4212 = vrot.lane.b32.xlu0 %v9102_v44, %s6404_s7 }
 0x600   : > { %v4029_v54 = vadd.f32 %v9111_v55, %v3909_v25  ;;  %v9888_v55 = vld [vmem:[#allocation74_spill] sm:$0xff] }
 0x601   : > { %4214 = vrot.lane.b32.xlu1 %v9109_v61, %s6404_s7  ;;  %v9117_v17 = vpop.permute.xlu0 %4082 }
 0x603   : > { %v9119_v56 = vpop.permute.xlu1 %4084  ;;  %4302 = vrot.lane.b32.xlu0 %v9102_v44, %s6405_s13 }
 0x604   : > { %v9279_v36 = vadd.f32 %v9119_v56, %v4029_v54  ;;  %v9889_v56 = vld [vmem:[#allocation75_spill] sm:$0xff] }
 0x605   : > { %4304 = vrot.lane.b32.xlu1 %v9109_v61, %s6405_s13  ;;  %v9127_v53 = vpop.permute.xlu0 %3846 }
 0x607   : > { %v9132_v62 = vpop.permute.xlu1 %3848  ;;  %4392 = vrot.lane.b32.xlu0 %v9102_v44, %s6406_s29 }
 0x608   : > { %v3911_v25 = vadd.f32 %v9889_v56, %v9132_v62 }
 0x609   : > { %4394 = vrot.lane.b32.xlu1 %v9109_v61, %s6406_s29  ;;  %v9142_v18 = vpop.permute.xlu0 %3966 }
 0x60b   : > { %v9147_v7 = vpop.permute.xlu1 %3968  ;;  %4216 = vrot.lane.b32.xlu0 %v9138_v59, %s6404_s7 }
 0x60d   : > { %4218 = vrot.lane.b32.xlu1 %v9145_v63, %s6404_s7  ;;  %v9153_v31 = vpop.permute.xlu0 %4086 }
 0x60f   : > { %v9155_v37 = vpop.permute.xlu1 %4088  ;;  %4306 = vrot.lane.b32.xlu0 %v9138_v59, %s6405_s13 }
 0x611   : > { %4308 = vrot.lane.b32.xlu1 %v9145_v63, %s6405_s13  ;;  %v9163_v46 = vpop.permute.xlu0 %3850 }
 0x613   : > { %v9168_v9 = vpop.permute.xlu1 %3852  ;;  %4396 = vrot.lane.b32.xlu0 %v9138_v59, %s6406_s29 }
 0x615   : > { %4398 = vrot.lane.b32.xlu1 %v9145_v63, %s6406_s29  ;;  %v9178_v52 = vpop.permute.xlu0 %3970 }
 0x617   : > { %v9183_v27 = vpop.permute.xlu1 %3972  ;;  %4220 = vrot.lane.b32.xlu0 %v9174_v1, %s6404_s7 }
 0x619   : > { %4222 = vrot.lane.b32.xlu1 %v9181_v10, %s6404_s7  ;;  %v9189_v16 = vpop.permute.xlu0 %4090 }
 0x61b   : > { %v9191_v21 = vpop.permute.xlu1 %4092  ;;  %4310 = vrot.lane.b32.xlu0 %v9174_v1, %s6405_s13 }
 0x61d   : > { %4312 = vrot.lane.b32.xlu1 %v9181_v10, %s6405_s13  ;;  %v9199_v15 = vpop.permute.xlu0 %4184 }
 0x61f   : > { %v9204_v14 = vpop.permute.xlu1 %4186  ;;  %4400 = vrot.lane.b32.xlu0 %v9174_v1, %s6406_s29 }
 0x621   : > { %4402 = vrot.lane.b32.xlu1 %v9181_v10, %s6406_s29  ;;  %v9214_v50 = vpop.permute.xlu0 %4274 }
 0x623   : > { %v9219_v41 = vpop.permute.xlu1 %4276  ;;  %4224 = vrot.lane.b32.xlu0 %v9210_v4, %s6404_s7 }
 0x625   : > { %4226 = vrot.lane.b32.xlu1 %v9217_v60, %s6404_s7  ;;  %v4365_v42 = vpop.permute.xlu0 %4364 }
 0x627   : > { %v9225_v32 = vpop.permute.xlu1 %4366  ;;  %4314 = vrot.lane.b32.xlu0 %v9210_v4, %s6405_s13 }
 0x629   : > { %4316 = vrot.lane.b32.xlu1 %v9217_v60, %s6405_s13  ;;  %v9233_v51 = vpop.permute.xlu0 %4188 }
 0x62b   : > { %v9238_v29 = vpop.permute.xlu1 %4190  ;;  %4404 = vrot.lane.b32.xlu0 %v9210_v4, %s6406_s29 }
 0x62d   : > { %4406 = vrot.lane.b32.xlu1 %v9217_v60, %s6406_s29  ;;  %v4279_v57 = vpop.permute.xlu0 %4278  ;;  %v9274_v60 = vadd.f32 %v9117_v17, %v4028_v19  ;;  %v3910_v17 = vadd.f32 %v9888_v55, %v9127_v53 }
 0x62f   : > { %v9251_v39 = vpop.permute.xlu1 %4280  ;;  %4228 = vrot.lane.b32.xlu0 %v9244_v43, %s6404_s7  ;;  %v4030_v19 = vadd.f32 %v9142_v18, %v3910_v17  ;;  %v4454_v18 = vsel %vm3581_vm0, %v8850_v34, %v9199_v15 }
 0x631   : > { %4230 = vrot.lane.b32.xlu1 %v9249_v30, %s6404_s7  ;;  %v4369_v33 = vpop.permute.xlu0 %4368 }
 0x633   : > { %v9257_v40 = vpop.permute.xlu1 %4370  ;;  %4318 = vrot.lane.b32.xlu0 %v9244_v43, %s6405_s13 }
 0x635   : > { %4320 = vrot.lane.b32.xlu1 %v9249_v30, %s6405_s13  ;;  %v4193_v48 = vpop.permute.xlu0 %4192 }
 0x637   : > { %v9268_v38 = vpop.permute.xlu1 %4194  ;;  %4408 = vrot.lane.b32.xlu0 %v9244_v43, %s6406_s29  ;;  %v9298_v43 = vadd.f32 %v9153_v31, %v4030_v19  ;;  %v3912_v31 = vadd.f32 %v8819_v58, %v9163_v46 }
 0x639   : > { %4410 = vrot.lane.b32.xlu1 %v9249_v30, %s6406_s29  ;;  %v4283_v11 = vpop.permute.xlu0 %4282  ;;  %v4031_v30 = vadd.f32 %v9147_v7, %v3911_v25  ;;  %v3913_v25 = vadd.f32 %v8825_v35, %v9168_v9 }
 0x63b   : > { %v4285_v13 = vpop.permute.xlu1 %4284  ;;  %4232 = vrot.lane.b32.xlu0 %v9274_v60, %s6404_s7  ;;  %v9303_v55 = vadd.f32 %v9155_v37, %v4031_v30  ;;  %v4484_v30 = vsel %vm3612_vm1, %v4454_v18, %v9214_v50  ;;  %v4455_v37 = vsel %vm3581_vm0, %v8857_v45, %v9204_v14  ;;  %v4032_v50 = vadd.f32 %v9178_v52, %v3912_v31 }
 0x63c   : > { %v4514_v17 = vsel %vm3643_vm2, %v4484_v30, %v4365_v42  ;;  %v4485_v15 = vsel %vm3612_vm1, %v4455_v37, %v9219_v41  ;;  %v4456_v45 = vsel %vm3581_vm0, %v8886_v2, %v9233_v51  ;;  %v4033_v41 = vadd.f32 %v9183_v27, %v3913_v25 }
 0x63d   : > { %4234 = vrot.lane.b32.xlu1 %v9279_v36, %s6404_s7  ;;  %v4373_v22 = vpop.permute.xlu0 %4372  ;;  %v4515_v46 = vsel %vm3643_vm2, %v4485_v15, %v9225_v32  ;;  %6051 = vrcp.f32 %v4514_v17  ;;  %v4486_v42 = vsel %vm3612_vm1, %v4456_v45, %v4279_v57  ;;  %v9339_v9 = vadd.f32 %v9189_v16, %v4032_v50  ;;  %v9892_v45 = vld [vmem:[#allocation18_spill] sm:$0xff] }
 0x63e   : > { %v4457_v52 = vsel %vm3581_vm0, %v8893_v12, %v9238_v29  ;;  %v4516_v32 = vsel %vm3643_vm2, %v4486_v42, %v4369_v33  ;;  %6053 = vrcp.f32 %v4515_v46  ;;  %v9350_v57 = vadd.f32 %v9191_v21, %v4033_v41 }
 0x63f   : > { %v4375_v26 = vpop.permute.xlu1 %4374  ;;  %4322 = vrot.lane.b32.xlu0 %v9274_v60, %s6405_s13  ;;  %v4487_v51 = vsel %vm3612_vm1, %v4457_v52, %v9251_v39  ;;  %v4458_v16 = vsel %vm3581_vm0, %v8922_v0, %v4193_v48  ;;  %6055 = vrcp.f32 %v4516_v32  ;;  %v4459_v39 = vsel %vm3581_vm0, %v8929_v24, %v9268_v38 }
 0x640   : > { %v4517_v27 = vsel %vm3643_vm2, %v4487_v51, %v9257_v40  ;;  %v4488_v29 = vsel %vm3612_vm1, %v4458_v16, %v4283_v11  ;;  %v4489_v0 = vsel %vm3612_vm1, %v4459_v39, %v4285_v13 }
 0x641   : > { %4324 = vrot.lane.b32.xlu1 %v9279_v36, %s6405_s13  ;;  %v4197_v54 = vpop.permute.xlu0 %4196  ;;  %v4518_v21 = vsel %vm3643_vm2, %v4488_v29, %v4373_v22  ;;  %6057 = vrcp.f32 %v4517_v27  ;;  %v4519_v40 = vsel %vm3643_vm2, %v4489_v0, %v4375_v26  ;;  %v9894_v29 = vld [vmem:[#allocation51_spill] sm:$0xff] }
 0x642   : > { %v4460_v48 = vsel %vm3581_vm0, %v8958_v3, %v4197_v54  ;;  %6059 = vrcp.f32 %v4518_v21 }
 0x643   : > { %v4199_v20 = vpop.permute.xlu1 %4198  ;;  %4412 = vrot.lane.b32.xlu0 %v9274_v60, %s6406_s29  ;;  %6061 = vrcp.f32 %v4519_v40 }
 0x644   : > { %v4461_v38 = vsel %vm3581_vm0, %v8965_v47, %v4199_v20 }
 0x645   : > { %4414 = vrot.lane.b32.xlu1 %v9279_v36, %s6406_s29  ;;  %v4287_v53 = vpop.permute.xlu0 %4286 }
 0x646   : > { %v4490_v24 = vsel %vm3612_vm1, %v4460_v48, %v4287_v53 }
 0x647   : > { %v4289_v4 = vpop.permute.xlu1 %4288  ;;  %4236 = vrot.lane.b32.xlu0 %v9298_v43, %s6404_s7  ;;  %v6052_v22 = vpop.eup %6051 }
 0x648   : > { %v4491_v3 = vsel %vm3612_vm1, %v4461_v38, %v4289_v4  ;;  %v6054_v47 = vpop.eup %6053 }
 0x649   : > { %4238 = vrot.lane.b32.xlu1 %v9303_v55, %s6404_s7  ;;  %v4377_v62 = vpop.permute.xlu0 %4376 }
 0x64a   : > { %v4520_v11 = vsel %vm3643_vm2, %v4490_v24, %v4377_v62 }
 0x64b   : > { %v4379_v7 = vpop.permute.xlu1 %4378  ;;  %4326 = vrot.lane.b32.xlu0 %v9298_v43, %s6405_s13  ;;  %6063 = vrcp.f32 %v4520_v11 }
 0x64c   : > { %v4521_v26 = vsel %vm3643_vm2, %v4491_v3, %v4379_v7  ;;  %v9890_v7 = vld [vmem:[#allocation46_spill] sm:$0xff] }
 0x64d   : > { %4328 = vrot.lane.b32.xlu1 %v9303_v55, %s6405_s13  ;;  %v4201_v34 = vpop.permute.xlu0 %4200  ;;  %v4574_v30 = vmul.f32 %v6052_v22, %v9890_v7  ;;  %6065 = vrcp.f32 %v4521_v26 }
 0x64e   : > { %v4462_v54 = vsel %vm3581_vm0, %v8994_v49, %v4201_v34  ;;  %v6056_v49 = vpop.eup %6055  ;;  %v9891_v34 = vld [vmem:[#allocation48_spill] sm:$0xff] }
 0x64f   : > { %v4203_v14 = vpop.permute.xlu1 %4202  ;;  %4416 = vrot.lane.b32.xlu0 %v9298_v43, %s6406_s29  ;;  %v4575_v15 = vmul.f32 %v6054_v47, %v9891_v34  ;;  %v9898_v47 = vld [vmem:[#allocation57_spill] sm:$0xff]  ;;  %v9900_v34 = vld [vmem:[#allocation59_spill] sm:$0xff] }
 0x650   : > { %v4463_v53 = vsel %vm3581_vm0, %v9001_v8, %v4203_v14  ;;  %v6058_v8 = vpop.eup %6057  ;;  %v4576_v14 = vmul.f32 %v6056_v49, %v9892_v45 }
 0x651   : > { %4418 = vrot.lane.b32.xlu1 %v9303_v55, %s6406_s29  ;;  %v4291_v2 = vpop.permute.xlu0 %4290  ;;  %v6060_v42 = vpop.eup %6059 }
 0x652   : > { %v4492_v20 = vsel %vm3612_vm1, %v4462_v54, %v4291_v2  ;;  %v6062_v27 = vpop.eup %6061  ;;  %v4578_v39 = vmul.f32 %v6060_v42, %v9894_v29 }
 0x653   : > { %v4293_v12 = vpop.permute.xlu1 %4292  ;;  %4240 = vrot.lane.b32.xlu0 %v9339_v9, %s6404_s7 }
 0x654   : > { %v4493_v31 = vsel %vm3612_vm1, %v4463_v53, %v4293_v12 }
 0x655   : > { %4242 = vrot.lane.b32.xlu1 %v9350_v57, %s6404_s7  ;;  %v4381_v33 = vpop.permute.xlu0 %4380  ;;  %v6064_v21 = vpop.eup %6063 }
 0x656   : > { %v4522_v62 = vsel %vm3643_vm2, %v4492_v20, %v4381_v33  ;;  %v9895_v33 = vld [vmem:[#allocation54_spill] sm:$0xff] }
 0x657   : > { %v4383_v19 = vpop.permute.xlu1 %4382  ;;  %4330 = vrot.lane.b32.xlu0 %v9339_v9, %s6405_s13  ;;  %6067 = vrcp.f32 %v4522_v62  ;;  %v4579_v0 = vmul.f32 %v6062_v27, %v9895_v33  ;;  %v6066_v40 = vpop.eup %6065 }
 0x658   : > { %v4523_v37 = vsel %vm3643_vm2, %v4493_v31, %v4383_v19  ;;  %v9896_v19 = vld [vmem:[#allocation55_spill] sm:$0xff] }
 0x659   : > { %4332 = vrot.lane.b32.xlu1 %v9350_v57, %s6405_s13  ;;  %v4205_v13 = vpop.permute.xlu0 %4204  ;;  %6069 = vrcp.f32 %v4523_v37  ;;  %v4580_v24 = vmul.f32 %v6064_v21, %v9896_v19 }
 0x65a   : > { %v4464_v25 = vsel %vm3581_vm0, %v9030_v6, %v4205_v13  ;;  %v9893_v6 = vld [vmem:[#allocation20_spill] sm:$0xff] }
 0x65b   : > { %v4207_v18 = vpop.permute.xlu1 %4206  ;;  %4420 = vrot.lane.b32.xlu0 %v9339_v9, %s6406_s29  ;;  %v4577_v51 = vmul.f32 %v6058_v8, %v9893_v6  ;;  %v9897_v13 = vld [vmem:[#allocation56_spill] sm:$0xff] }
 0x65c   : > { %v4465_v41 = vsel %vm3581_vm0, %v9037_v23, %v4207_v18  ;;  %v4581_v22 = vmul.f32 %v6066_v40, %v9897_v13  ;;  %v9901_v8 = vld [vmem:[#allocation60_spill] sm:$0xff] }
 0x65d   : > { %4422 = vrot.lane.b32.xlu1 %v9350_v57, %s6406_s29  ;;  %v4295_v4 = vpop.permute.xlu0 %4294 }
 0x65e   : > { %v4494_v50 = vsel %vm3612_vm1, %v4464_v25, %v4295_v4 }
 0x65f   : > { %v4297_v17 = vpop.permute.xlu1 %4296  ;;  %4634 = vrot.lane.b32.xlu0 %v4574_v30, %s6405_s13 }
 0x660   : > { %v4495_v32 = vsel %vm3612_vm1, %v4465_v41, %v4297_v17 }
 0x661   : > { %4636 = vrot.lane.b32.xlu1 %v4575_v15, %s6405_s13  ;;  %v4385_v46 = vpop.permute.xlu0 %4384  ;;  %v6068_v38 = vpop.eup %6067 }
 0x662   : > { %v4524_v52 = vsel %vm3643_vm2, %v4494_v50, %v4385_v46  ;;  %v4582_v20 = vmul.f32 %v6068_v38, %v9898_v47  ;;  %v9904_v38 = vld [vmem:[#allocation63_spill] sm:$0xff] }
 0x663   : > { %v4387_v2 = vpop.permute.xlu1 %4386  ;;  %4638 = vrot.lane.b32.xlu0 %v4576_v14, %s6405_s13  ;;  %6071 = vrcp.f32 %v4524_v52  ;;  %v6070_v3 = vpop.eup %6069 }
 0x664   : > { %v4525_v16 = vsel %vm3643_vm2, %v4495_v32, %v4387_v2  ;;  %v9902_v2 = vld [vmem:[#allocation61_spill] sm:$0xff] }
 0x665   : > { %4640 = vrot.lane.b32.xlu1 %v4577_v51, %s6405_s13  ;;  %v4209_v12 = vpop.permute.xlu0 %4208  ;;  %6073 = vrcp.f32 %v4525_v16 }
 0x666   : > { %v4466_v26 = vsel %vm3581_vm0, %v9066_v28, %v4209_v12  ;;  %v9899_v28 = vld [vmem:[#allocation58_spill] sm:$0xff] }
 0x667   : > { %v4211_v23 = vpop.permute.xlu1 %4210  ;;  %4642 = vrot.lane.b32.xlu0 %v4578_v39, %s6405_s13  ;;  %v4583_v49 = vmul.f32 %v6070_v3, %v9899_v28 }
 0x668   : > { %v4467_v62 = vsel %vm3581_vm0, %v9073_v5, %v4211_v23 }
 0x669   : > { %4644 = vrot.lane.b32.xlu1 %v4579_v0, %s6405_s13  ;;  %v4299_v48 = vpop.permute.xlu0 %4298 }
 0x66a   : > { %v4496_v54 = vsel %vm3612_vm1, %v4466_v26, %v4299_v48 }
 0x66b   : > { %v4301_v11 = vpop.permute.xlu1 %4300  ;;  %4646 = vrot.lane.b32.xlu0 %v4580_v24, %s6405_s13 }
 0x66c   : > { %v4497_v7 = vsel %vm3612_vm1, %v4467_v62, %v4301_v11 }
 0x66d   : > { %4648 = vrot.lane.b32.xlu1 %v4581_v22, %s6405_s13  ;;  %v4389_v18 = vpop.permute.xlu0 %4388  ;;  %v6072_v53 = vpop.eup %6071 }
 0x66e   : > { %v4526_v4 = vsel %vm3643_vm2, %v4496_v54, %v4389_v18  ;;  %v4584_v15 = vmul.f32 %v6072_v53, %v9900_v34 }
 0x66f   : > { %6075 = vrcp.f32 %v4526_v4  ;;  %v4391_v30 = vpop.permute.xlu1 %4390  ;;  %4650 = vrot.lane.b32.xlu0 %v4582_v20, %s6405_s13  ;;  %v6074_v31 = vpop.eup %6073 }
 0x670   : > { %v4527_v37 = vsel %vm3643_vm2, %v4497_v7, %v4391_v30  ;;  %v4585_v25 = vmul.f32 %v6074_v31, %v9901_v8 }
 0x671   : > { %6077 = vrcp.f32 %v4527_v37  ;;  %4652 = vrot.lane.b32.xlu1 %v4583_v49, %s6405_s13  ;;  %v4213_v17 = vpop.permute.xlu0 %4212  ;;  %v9906_v49 = vld [vmem:[#allocation65_spill] sm:$0xff] }
 0x672   : > { %v4468_v45 = vsel %vm3581_vm0, %v9102_v44, %v4213_v17  ;;  %v9903_v44 = vld [vmem:[#allocation62_spill] sm:$0xff] }
 0x673   : > { %v4215_v5 = vpop.permute.xlu1 %4214  ;;  %4654 = vrot.lane.b32.xlu0 %v4584_v15, %s6405_s13 }
 0x674   : > { %v4469_v52 = vsel %vm3581_vm0, %v9109_v61, %v4215_v5 }
 0x675   : > { %4656 = vrot.lane.b32.xlu1 %v4585_v25, %s6405_s13  ;;  %v4303_v50 = vpop.permute.xlu0 %4302 }
 0x676   : > { %v4498_v42 = vsel %vm3612_vm1, %v4468_v45, %v4303_v50 }
 0x677   : > { %v4305_v46 = vpop.permute.xlu1 %4304 }
 0x678   : > { %v4499_v27 = vsel %vm3612_vm1, %v4469_v52, %v4305_v46  ;;  %v9908_v46 = vld [vmem:[#allocation76_spill] sm:$0xff]  ;;  %v9909_v52 = vld [vmem:[#allocation77_spill] sm:$0xff] }
 0x679   : > { %v6076_v14 = vpop.eup %6075  ;;  %v4393_v41 = vpop.permute.xlu0 %4392 }
 0x67a   : > { %v4528_v32 = vsel %vm3643_vm2, %v4498_v42, %v4393_v41  ;;  %v4586_v6 = vmul.f32 %v6076_v14, %v9902_v2 }
 0x67b   : > { %v6078_v51 = vpop.eup %6077  ;;  %6079 = vrcp.f32 %v4528_v32  ;;  %v4395_v16 = vpop.permute.xlu1 %4394 }
 0x67c   : > { %v4529_v12 = vsel %vm3643_vm2, %v4499_v27, %v4395_v16  ;;  %4658 = vrot.lane.b32.xlu0 %v4586_v6, %s6405_s13  ;;  %v4587_v29 = vmul.f32 %v6078_v51, %v9903_v44  ;;  %v9910_v6 = vld [vmem:[#allocation67_spill] sm:$0xff] }
 0x67d   : > { %6081 = vrcp.f32 %v4529_v12  ;;  %v4217_v39 = vpop.permute.xlu0 %4216 }
 0x67e   : > { %4660 = vrot.lane.b32.xlu1 %v4587_v29, %s6405_s13  ;;  %v4470_v33 = vsel %vm3581_vm0, %v9138_v59, %v4217_v39  ;;  %v9905_v59 = vld [vmem:[#allocation64_spill] sm:$0xff] }
 0x67f   : > { %v4219_v61 = vpop.permute.xlu1 %4218  ;;  %v9911_v29 = vld [vmem:[#allocation68_spill] sm:$0xff] }
 0x680   : > { %v4471_v19 = vsel %vm3581_vm0, %v9145_v63, %v4219_v61 }
 0x681   : > { %v4307_v21 = vpop.permute.xlu0 %4306 }
 0x682   : > { %v4500_v40 = vsel %vm3612_vm1, %v4470_v33, %v4307_v21 }
 0x683   : > { %v4309_v23 = vpop.permute.xlu1 %4308 }
 0x684   : > { %v4501_v22 = vsel %vm3612_vm1, %v4471_v19, %v4309_v23 }
 0x685   : > { %v6080_v0 = vpop.eup %6079  ;;  %v4397_v48 = vpop.permute.xlu0 %4396 }
 0x686   : > { %v4530_v24 = vsel %vm3643_vm2, %v4500_v40, %v4397_v48  ;;  %v4588_v11 = vmul.f32 %v6080_v0, %v9904_v38  ;;  %v9912_v0 = vld [vmem:[#allocation78_spill] sm:$0xff]  ;;  %v9913_v38 = vld [vmem:[#allocation79_spill] sm:$0xff] }
 0x687   : > { %v6082_v13 = vpop.eup %6081  ;;  %6083 = vrcp.f32 %v4530_v24  ;;  %v4399_v3 = vpop.permute.xlu1 %4398 }
 0x688   : > { %v4531_v26 = vsel %vm3643_vm2, %v4501_v22, %v4399_v3  ;;  %4662 = vrot.lane.b32.xlu0 %v4588_v11, %s6405_s13  ;;  %v4589_v54 = vmul.f32 %v6082_v13, %v9905_v59  ;;  %v9914_v22 = vld [vmem:[#allocation53_spill] sm:$0xff] }
 0x689   : > { %6085 = vrcp.f32 %v4531_v26  ;;  %v4221_v18 = vpop.permute.xlu0 %4220 }
 0x68a   : > { %4664 = vrot.lane.b32.xlu1 %v4589_v54, %s6405_s13  ;;  %v4472_v53 = vsel %vm3581_vm0, %v9174_v1, %v4221_v18  ;;  %v9907_v1 = vld [vmem:[#allocation66_spill] sm:$0xff] }
 0x68b   : > { %v4223_v63 = vpop.permute.xlu1 %4222 }
 0x68c   : > { %v4473_v30 = vsel %vm3581_vm0, %v9181_v10, %v4223_v63  ;;  %v9915_v63 = vld [vmem:[#allocation69_spill] sm:$0xff] }
 0x68d   : > { %v4311_v47 = vpop.permute.xlu0 %4310 }
 0x68e   : > { %v4502_v4 = vsel %vm3612_vm1, %v4472_v53, %v4311_v47 }
 0x68f   : > { %v4313_v20 = vpop.permute.xlu1 %4312 }
 0x690   : > { %v4503_v17 = vsel %vm3612_vm1, %v4473_v30, %v4313_v20 }
 0x691   : > { %v6084_v62 = vpop.eup %6083  ;;  %v4401_v7 = vpop.permute.xlu0 %4400 }
 0x692   : > { %v4532_v28 = vsel %vm3643_vm2, %v4502_v4, %v4401_v7  ;;  %v4590_v31 = vmul.f32 %v6084_v62, %v9906_v49 }
 0x693   : > { %v6086_v37 = vpop.eup %6085  ;;  %6087 = vrcp.f32 %v4532_v28  ;;  %v4403_v34 = vpop.permute.xlu1 %4402 }
 0x694   : > { %v4533_v15 = vsel %vm3643_vm2, %v4503_v17, %v4403_v34  ;;  %4666 = vrot.lane.b32.xlu0 %v4590_v31, %s6405_s13  ;;  %v4591_v5 = vmul.f32 %v6086_v37, %v9907_v1  ;;  %v9916_v17 = vld [vmem:[#allocation70_spill] sm:$0xff] }
 0x695   : > { %6089 = vrcp.f32 %v4533_v15  ;;  %v4225_v8 = vpop.permute.xlu0 %4224 }
 0x696   : > { %4668 = vrot.lane.b32.xlu1 %v4591_v5, %s6405_s13  ;;  %v4474_v45 = vsel %vm3581_vm0, %v9908_v46, %v4225_v8 }
 0x697   : > { %v4227_v10 = vpop.permute.xlu1 %4226 }
 0x698   : > { %v4475_v32 = vsel %vm3581_vm0, %v9909_v52, %v4227_v10 }
 0x699   : > { %v4315_v25 = vpop.permute.xlu0 %4314 }
 0x69a   : > { %v4504_v42 = vsel %vm3612_vm1, %v4474_v45, %v4315_v25 }
 0x69b   : > { %v4317_v50 = vpop.permute.xlu1 %4316 }
 0x69c   : > { %v4505_v16 = vsel %vm3612_vm1, %v4475_v32, %v4317_v50 }
 0x69d   : > { %v6088_v14 = vpop.eup %6087  ;;  %v4405_v41 = vpop.permute.xlu0 %4404 }
 0x69e   : > { %v4534_v2 = vsel %vm3643_vm2, %v4504_v42, %v4405_v41  ;;  %v4592_v51 = vmul.f32 %v6088_v14, %v9910_v6 }
 0x69f   : > { %v6090_v27 = vpop.eup %6089  ;;  %6091 = vrcp.f32 %v4534_v2  ;;  %v4407_v12 = vpop.permute.xlu1 %4406  ;;  %v9918_v2 = vld [vmem:[#allocation72_spill] sm:$0xff] }
 0x6a0   : > { %v4535_v44 = vsel %vm3643_vm2, %v4505_v16, %v4407_v12  ;;  %4670 = vrot.lane.b32.xlu0 %v4592_v51, %s6405_s13  ;;  %v4593_v39 = vmul.f32 %v6090_v27, %v9911_v29 }
 0x6a1   : > { %6093 = vrcp.f32 %v4535_v44  ;;  %v4229_v61 = vpop.permute.xlu0 %4228 }
 0x6a2   : > { %4672 = vrot.lane.b32.xlu1 %v4593_v39, %s6405_s13  ;;  %v4476_v40 = vsel %vm3581_vm0, %v9912_v0, %v4229_v61 }
 0x6a3   : > { %v4231_v21 = vpop.permute.xlu1 %4230 }
 0x6a4   : > { %v4477_v11 = vsel %vm3581_vm0, %v9913_v38, %v4231_v21  ;;  %v6154_v21 = vld [vmem:[#allocation10] sm:$0x3] }
 0x6a5   : > { %v4319_v23 = vpop.permute.xlu0 %4318 }
 0x6a6   : > { %v4506_v19 = vsel %vm3612_vm1, %v4476_v40, %v4319_v23  ;;  %v9920_v23 = vld [vmem:[#allocation17_spill] sm:$0xff] }
 0x6a7   : > { %v4321_v33 = vpop.permute.xlu1 %4320 }
 0x6a8   : > { %v4507_v59 = vsel %vm3612_vm1, %v4477_v11, %v4321_v33  ;;  %v9921_v33 = vsub.s32 1, %v9920_v23 }
 0x6a9   : > { %v6092_v48 = vpop.eup %6091  ;;  %v4409_v24 = vpop.permute.xlu0 %4408 }
 0x6aa   : > { %v4536_v13 = vsel %vm3643_vm2, %v4506_v19, %v4409_v24  ;;  %v4594_v3 = vmul.f32 %v6092_v48, %v9914_v22  ;;  %v9517_v0 = vrot.slane %v6154_v21, %v9921_v33  ;;  %v9932_v21 = vld [vmem:[#allocation29_spill] sm:$0xff] }
 0x6ab   : > { %v6094_v26 = vpop.eup %6093  ;;  %6095 = vrcp.f32 %v4536_v13  ;;  %v4411_v54 = vpop.permute.xlu1 %4410  ;;  %v9922_v13 = vld [vmem:[#allocation74_spill] sm:$0xff] }
 0x6ac   : > { %v4537_v18 = vsel %vm3643_vm2, %v4507_v59, %v4411_v54  ;;  %4674 = vrot.lane.b32.xlu0 %v4594_v3, %s6405_s13  ;;  %v4595_v47 = vmul.f32 %v6094_v26, %v9915_v63  ;;  %v9923_v54 = vld [vmem:[#allocation19_spill] sm:$0xff]  ;;  %v5408_v23 = vadd.f32 %v9932_v21, %v9517_v0 }
 0x6ad   : > { %6097 = vrcp.f32 %v4537_v18  ;;  %v4233_v20 = vpop.permute.xlu0 %4232 }
 0x6ae   : > { %4676 = vrot.lane.b32.xlu1 %v4595_v47, %s6405_s13  ;;  %v4478_v7 = vsel %vm3581_vm0, %v9274_v60, %v4233_v20  ;;  %v9917_v60 = vld [vmem:[#allocation71_spill] sm:$0xff]  ;;  %v9924_v47 = vld [vmem:[#allocation21_spill] sm:$0xff] }
 0x6af   : > { %v4235_v53 = vpop.permute.xlu1 %4234  ;;  %v5392_v20 = vadd.f32 %v9924_v47, %v9517_v0 }
 0x6b0   : > { %v4479_v31 = vsel %vm3581_vm0, %v9279_v36, %v4235_v53 }
 0x6b1   : > { %v4323_v62 = vpop.permute.xlu0 %4322 }
 0x6b2   : > { %v4508_v28 = vsel %vm3612_vm1, %v4478_v7, %v4323_v62  ;;  %v9925_v7 = vld [vmem:[#allocation22_spill] sm:$0xff] }
 0x6b3   : > { %v4325_v4 = vpop.permute.xlu1 %4324 }
 0x6b4   : > { %v4509_v1 = vsel %vm3612_vm1, %v4479_v31, %v4325_v4  ;;  %v9926_v31 = vld [vmem:[#allocation23_spill] sm:$0xff] }
 0x6b5   : > { %v6096_v30 = vpop.eup %6095  ;;  %v4413_v49 = vpop.permute.xlu0 %4412 }
 0x6b6   : > { %v4538_v37 = vsel %vm3643_vm2, %v4508_v28, %v4413_v49  ;;  %v4596_v34 = vmul.f32 %v6096_v30, %v9916_v17  ;;  %v5394_v30 = vadd.f32 %v9925_v7, %v9517_v0 }
 0x6b7   : > { %v6098_v15 = vpop.eup %6097  ;;  %6099 = vrcp.f32 %v4538_v37  ;;  %v4415_v5 = vpop.permute.xlu1 %4414  ;;  %v5396_v37 = vadd.f32 %v9926_v31, %v9517_v0 }
 0x6b8   : > { %v4539_v8 = vsel %vm3643_vm2, %v4509_v1, %v4415_v5  ;;  %4678 = vrot.lane.b32.xlu0 %v4596_v34, %s6405_s13  ;;  %v4597_v10 = vmul.f32 %v6098_v15, %v9917_v60  ;;  %v9927_v1 = vld [vmem:[#allocation24_spill] sm:$0xff] }
 0x6b9   : > { %6101 = vrcp.f32 %v4539_v8  ;;  %v4237_v25 = vpop.permute.xlu0 %4236  ;;  %v5398_v5 = vadd.f32 %v9927_v1, %v9517_v0 }
 0x6ba   : > { %4680 = vrot.lane.b32.xlu1 %v4597_v10, %s6405_s13  ;;  %v4480_v45 = vsel %vm3581_vm0, %v9298_v43, %v4237_v25  ;;  %v9919_v43 = vld [vmem:[#allocation73_spill] sm:$0xff] }
 0x6bb   : > { %v4239_v36 = vpop.permute.xlu1 %4238 }
 0x6bc   : > { %v4481_v52 = vsel %vm3581_vm0, %v9303_v55, %v4239_v36  ;;  %v9928_v36 = vld [vmem:[#allocation25_spill] sm:$0xff] }
 0x6bd   : > { %v4327_v50 = vpop.permute.xlu0 %4326 }
 0x6be   : > { %v4510_v42 = vsel %vm3612_vm1, %v4480_v45, %v4327_v50  ;;  %v5400_v50 = vadd.f32 %v9928_v36, %v9517_v0  ;;  %v9940_v36 = vld [vmem:[#allocation37_spill] sm:$0xff] }
 0x6bf   : > { %v4329_v46 = vpop.permute.xlu1 %4328 }
 0x6c0   : > { %v4511_v27 = vsel %vm3612_vm1, %v4481_v52, %v4329_v46  ;;  %v9929_v52 = vld [vmem:[#allocation26_spill] sm:$0xff] }
 0x6c1   : > { %v6100_v14 = vpop.eup %6099  ;;  %v4417_v41 = vpop.permute.xlu0 %4416 }
 0x6c2   : > { %v4540_v32 = vsel %vm3643_vm2, %v4510_v42, %v4417_v41  ;;  %v4598_v6 = vmul.f32 %v6100_v14, %v9918_v2 }
 0x6c3   : > { %v6102_v51 = vpop.eup %6101  ;;  %6103 = vrcp.f32 %v4540_v32  ;;  %v4419_v16 = vpop.permute.xlu1 %4418  ;;  %v5402_v32 = vadd.f32 %v9929_v52, %v9517_v0  ;;  %v9941_v52 = vld [vmem:[#allocation38_spill] sm:$0xff] }
 0x6c4   : > { %v4541_v12 = vsel %vm3643_vm2, %v4511_v27, %v4419_v16  ;;  %4682 = vrot.lane.b32.xlu0 %v4598_v6, %s6405_s13  ;;  %v4599_v44 = vmul.f32 %v6102_v51, %v9919_v43 }
 0x6c5   : > { %6105 = vrcp.f32 %v4541_v12  ;;  %v4241_v29 = vpop.permute.xlu0 %4240 }
 0x6c6   : > { %4684 = vrot.lane.b32.xlu1 %v4599_v44, %s6405_s13  ;;  %v4482_v40 = vsel %vm3581_vm0, %v9339_v9, %v4241_v29  ;;  %v5390_v9 = vadd.f32 %v9923_v54, %v9517_v0  ;;  %v9931_v29 = vld [vmem:[#allocation28_spill] sm:$0xff] }
 0x6c7   : > { %v4243_v55 = vpop.permute.xlu1 %4242 }
 0x6c8   : > { %v4483_v38 = vsel %vm3581_vm0, %v9350_v57, %v4243_v55  ;;  %v5406_v55 = vadd.f32 %v9931_v29, %v9517_v0 }
 0x6c9   : > { %v4331_v39 = vpop.permute.xlu0 %4330 }
 0x6ca   : > { %v4512_v19 = vsel %vm3612_vm1, %v4482_v40, %v4331_v39 }
 0x6cb   : > { %v4333_v61 = vpop.permute.xlu1 %4332 }
 0x6cc   : > { %v4513_v26 = vsel %vm3612_vm1, %v4483_v38, %v4333_v61 }
 0x6cd   : > { %v6104_v48 = vpop.eup %6103  ;;  %v4421_v24 = vpop.permute.xlu0 %4420 }
 0x6ce   : > { %v4542_v11 = vsel %vm3643_vm2, %v4512_v19, %v4421_v24  ;;  %v4600_v22 = vmul.f32 %v6104_v48, %v9922_v13  ;;  %v9933_v19 = vld [vmem:[#allocation30_spill] sm:$0xff] }
 0x6cf   : > { %v6106_v3 = vpop.eup %6105  ;;  %6107 = vrcp.f32 %v4542_v11  ;;  %v4423_v59 = vpop.permute.xlu1 %4422  ;;  %v5410_v24 = vadd.f32 %v9933_v19, %v9517_v0 }
 0x6d0   : > { %v4543_v18 = vsel %vm3643_vm2, %v4513_v26, %v4423_v59  ;;  %4686 = vrot.lane.b32.xlu0 %v4600_v22, %s6405_s13  ;;  %v4601_v57 = vmul.f32 %v6106_v3, %v9889_v56  ;;  %v9934_v22 = vld [vmem:[#allocation31_spill] sm:$0xff] }
 0x6d1   : > { %6109 = vrcp.f32 %v4543_v18  ;;  %v4635_v63 = vpop.permute.xlu0 %4634  ;;  %v5412_v3 = vadd.f32 %v9934_v22, %v9517_v0 }
 0x6d2   : > { %v4724_v53 = vsel %vm3612_vm1, %v5390_v9, %v4635_v63  ;;  %4688 = vrot.lane.b32.xlu1 %v4601_v57, %s6405_s13  ;;  %v9935_v57 = vld [vmem:[#allocation32_spill] sm:$0xff] }
 0x6d3   : > { %v4755_v62 = vsel %vm4754_vm3, %v4724_v53, %v5390_v9  ;;  %v4637_v4 = vpop.permute.xlu1 %4636  ;;  %v5414_v63 = vadd.f32 %v9935_v57, %v9517_v0  ;;  %v9948_v57 = vld [vmem:[#allocation45_spill] sm:$0xff] }
 0x6d4   : > { %4786 = vst [vmem:[%s7206_s28 + $0x8] sm:$0xff] %v4755_v62  ;;  %v4725_v56 = vsel %vm3612_vm1, %v5392_v20, %v4637_v4 }
 0x6d5   : > { %v4756_v28 = vsel %vm4754_vm3, %v4725_v56, %v5392_v20  ;;  %v4639_v49 = vpop.permute.xlu0 %4638  ;;  %v9936_v20 = vld [vmem:[#allocation33_spill] sm:$0xff] }
 0x6d6   : > { %4788 = vst [vmem:[%s7206_s28 + $0x18] sm:$0xff] %v4756_v28  ;;  %v4726_v17 = vsel %vm3612_vm1, %v5394_v30, %v4639_v49  ;;  %v5416_v53 = vadd.f32 %v9936_v20, %v9517_v0  ;;  %v9937_v28 = vld [vmem:[#allocation34_spill] sm:$0xff] }
 0x6d7   : > { %v4757_v34 = vsel %vm4754_vm3, %v4726_v17, %v5394_v30  ;;  %v4641_v15 = vpop.permute.xlu1 %4640  ;;  %v5418_v49 = vadd.f32 %v9937_v28, %v9517_v0  ;;  %v9950_v28 = vld [vmem:[#allocation49_spill] sm:$0xff] }
 0x6d8   : > { %4790 = vst [vmem:[%s7206_s28 + $0x28] sm:$0xff] %v4757_v34  ;;  %v4727_v8 = vsel %vm3612_vm1, %v5396_v37, %v4641_v15 }
 0x6d9   : > { %v6108_v60 = vpop.eup %6107  ;;  %v4758_v10 = vsel %vm4754_vm3, %v4727_v8, %v5396_v37  ;;  %v4643_v25 = vpop.permute.xlu0 %4642  ;;  %v9938_v37 = vld [vmem:[#allocation35_spill] sm:$0xff] }
 0x6da   : > { %4792 = vst [vmem:[%s7206_s28 + $0x38] sm:$0xff] %v4758_v10  ;;  %v4728_v46 = vsel %vm3612_vm1, %v5398_v5, %v4643_v25  ;;  %v4602_v45 = vmul.f32 %v6108_v60, %v8819_v58  ;;  %v9930_v58 = vld [vmem:[#allocation27_spill] sm:$0xff]  ;;  %v5420_v17 = vadd.f32 %v9938_v37, %v9517_v0  ;;  %v9939_v60 = vld [vmem:[#allocation36_spill] sm:$0xff] }
 0x6db   : > { %v6110_v14 = vpop.eup %6109  ;;  %v4759_v42 = vsel %vm4754_vm3, %v4728_v46, %v5398_v5  ;;  %v4645_v41 = vpop.permute.xlu1 %4644  ;;  %v5404_v16 = vadd.f32 %v9930_v58, %v9517_v0  ;;  %v5422_v10 = vadd.f32 %v9939_v60, %v9517_v0  ;;  %v9952_v60 = vld [vmem:[#allocation52_spill] sm:$0xff] }
 0x6dc   : > { %4794 = vst [vmem:[%s7206_s28 + $0x48] sm:$0xff] %v4759_v42  ;;  %v4729_v2 = vsel %vm3612_vm1, %v5400_v50, %v4645_v41  ;;  %4690 = vrot.lane.b32.xlu0 %v4602_v45, %s6405_s13  ;;  %v4603_v6 = vmul.f32 %v6110_v14, %v8825_v35 }
 0x6dd   : > { %v4760_v51 = vsel %vm4754_vm3, %v4729_v2, %v5400_v50  ;;  %v4647_v27 = vpop.permute.xlu0 %4646  ;;  %v5424_v50 = vadd.f32 %v9940_v36, %v9517_v0 }
 0x6de   : > { %4796 = vst [vmem:[%s7206_s28 + $0x58] sm:$0xff] %v4760_v51  ;;  %v4730_v12 = vsel %vm3612_vm1, %v5402_v32, %v4647_v27  ;;  %4692 = vrot.lane.b32.xlu1 %v4603_v6, %s6405_s13  ;;  %v9942_v6 = vld [vmem:[#allocation39_spill] sm:$0xff] }
 0x6df   : > { %v4761_v43 = vsel %vm4754_vm3, %v4730_v12, %v5402_v32  ;;  %v4649_v44 = vpop.permute.xlu1 %4648  ;;  %v5426_v32 = vadd.f32 %v9941_v52, %v9517_v0  ;;  %v5428_v51 = vadd.f32 %v9942_v6, %v9517_v0 }
 0x6e0   : > { %4798 = vst [vmem:[%s7206_s28 + $0x68] sm:$0xff] %v4761_v43  ;;  %v4731_v35 = vsel %vm3612_vm1, %v5404_v16, %v4649_v44  ;;  %v9943_v44 = vld [vmem:[#allocation40_spill] sm:$0xff] }
 0x6e1   : > { %v4762_v39 = vsel %vm4754_vm3, %v4731_v35, %v5404_v16  ;;  %v4651_v61 = vpop.permute.xlu0 %4650  ;;  %v5430_v29 = vadd.f32 %v9943_v44, %v9517_v0  ;;  %v9944_v35 = vld [vmem:[#allocation41_spill] sm:$0xff] }
 0x6e2   : > { %4800 = vst [vmem:[%s7206_s28 + $0x78] sm:$0xff] %v4762_v39  ;;  %v4732_v33 = vsel %vm3612_vm1, %v5406_v55, %v4651_v61  ;;  %v5432_v39 = vadd.f32 %v9944_v35, %v9517_v0 }
 0x6e3   : > { %v4763_v40 = vsel %vm4754_vm3, %v4732_v33, %v5406_v55  ;;  %v4653_v48 = vpop.permute.xlu1 %4652 }
 0x6e4   : > { %4802 = vst [vmem:[%s7206_s28 + $0x88] sm:$0xff] %v4763_v40  ;;  %v4733_v38 = vsel %vm3612_vm1, %v5408_v23, %v4653_v48  ;;  %v9945_v48 = vld [vmem:[#allocation42_spill] sm:$0xff] }
 0x6e5   : > { %v4764_v11 = vsel %vm4754_vm3, %v4733_v38, %v5408_v23  ;;  %v4655_v13 = vpop.permute.xlu0 %4654  ;;  %v5434_v19 = vadd.f32 %v9945_v48, %v9517_v0  ;;  %v9946_v38 = vld [vmem:[#allocation43_spill] sm:$0xff] }
 0x6e6   : > { %4804 = vst [vmem:[%s7206_s28 + $0x98] sm:$0xff] %v4764_v11  ;;  %v4734_v26 = vsel %vm3612_vm1, %v5410_v24, %v4655_v13  ;;  %v5436_v11 = vadd.f32 %v9946_v38, %v9517_v0 }
 0x6e7   : > { %v4765_v59 = vsel %vm4754_vm3, %v4734_v26, %v5410_v24  ;;  %v4657_v54 = vpop.permute.xlu1 %4656 }
 0x6e8   : > { %4806 = vst [vmem:[%s7206_s28 + $0xa8] sm:$0xff] %v4765_v59  ;;  %v4735_v9 = vsel %vm3612_vm1, %v5412_v3, %v4657_v54  ;;  %v9947_v54 = vld [vmem:[#allocation44_spill] sm:$0xff] }
 0x6e9   : > { %v4766_v18 = vsel %vm4754_vm3, %v4735_v9, %v5412_v3  ;;  %v5438_v9 = vadd.f32 %v9947_v54, %v9517_v0 }
 0x6ea   : > { %4808 = vst [vmem:[%s7206_s28 + $0xb8] sm:$0xff] %v4766_v18 }
 0x6ee   : > { %v4659_v47 = vpop.permute.xlu0 %4658 }
 0x6ef   : > { %v4736_v62 = vsel %vm3612_vm1, %v5414_v63, %v4659_v47 }
 0x6f0   : > { %v4767_v4 = vsel %vm4754_vm3, %v4736_v62, %v5414_v63  ;;  %v4661_v7 = vpop.permute.xlu1 %4660  ;;  %v5440_v63 = vadd.f32 %v9948_v57, %v9517_v0 }
 0x6f1   : > { %4810 = vst [vmem:[%s7206_s28 + $0xc8] sm:$0xff] %v4767_v4  ;;  %v4737_v30 = vsel %vm3612_vm1, %v5416_v53, %v4661_v7  ;;  %v9949_v7 = vld [vmem:[#allocation47_spill] sm:$0xff] }
 0x6f2   : > { %v4768_v56 = vsel %vm4754_vm3, %v4737_v30, %v5416_v53  ;;  %v5442_v30 = vadd.f32 %v9949_v7, %v9517_v0 }
 0x6f3   : > { %4812 = vst [vmem:[%s7206_s28 + $0xd8] sm:$0xff] %v4768_v56 }
 0x6fa   : > { %v4663_v31 = vpop.permute.xlu0 %4662 }
 0x6fb   : > { %v4738_v34 = vsel %vm3612_vm1, %v5418_v49, %v4663_v31 }
 0x6fc   : > { %v4769_v15 = vsel %vm4754_vm3, %v4738_v34, %v5418_v49  ;;  %v4665_v1 = vpop.permute.xlu1 %4664  ;;  %v5444_v49 = vadd.f32 %v9950_v28, %v9517_v0 }
 0x6fd   : > { %4814 = vst [vmem:[%s7206_s28 + $0xe8] sm:$0xff] %v4769_v15  ;;  %v4739_v5 = vsel %vm3612_vm1, %v5420_v17, %v4665_v1  ;;  %v9951_v1 = vld [vmem:[#allocation50_spill] sm:$0xff] }
 0x6fe   : > { %v4770_v8 = vsel %vm4754_vm3, %v4739_v5, %v5420_v17  ;;  %v5446_v5 = vadd.f32 %v9951_v1, %v9517_v0 }
 0x6ff   : > { %4816 = vst [vmem:[%s7206_s28 + $0xf8] sm:$0xff] %v4770_v8 }
 0x706   : > { %v4667_v25 = vpop.permute.xlu0 %4666 }
 0x707   : > { %v4740_v46 = vsel %vm3612_vm1, %v5422_v10, %v4667_v25 }
 0x708   : > { %v4771_v45 = vsel %vm4754_vm3, %v4740_v46, %v5422_v10  ;;  %v4669_v14 = vpop.permute.xlu1 %4668  ;;  %v5448_v10 = vadd.f32 %v9952_v60, %v9517_v0 }
 0x709   : > { %4818 = vst [vmem:[%s7206_s28 + $0x108] sm:$0xff] %v4771_v45  ;;  %v4741_v42 = vsel %vm3612_vm1, %v5424_v50, %v4669_v14 }
 0x70a   : > { %v4772_v41 = vsel %vm4754_vm3, %v4741_v42, %v5424_v50 }
 0x70b   : > { %4820 = vst [vmem:[%s7206_s28 + $0x118] sm:$0xff] %v4772_v41 }
 0x712   : > { %v4671_v2 = vpop.permute.xlu0 %4670 }
 0x713   : > { %v4742_v27 = vsel %vm3612_vm1, %v5426_v32, %v4671_v2 }
 0x714   : > { %v4773_v58 = vsel %vm4754_vm3, %v4742_v27, %v5426_v32  ;;  %v4673_v16 = vpop.permute.xlu1 %4672 }
 0x715   : > { %4822 = vst [vmem:[%s7206_s28 + $0x128] sm:$0xff] %v4773_v58  ;;  %v4743_v12 = vsel %vm3612_vm1, %v5428_v51, %v4673_v16 }
 0x716   : > { %v4774_v43 = vsel %vm4754_vm3, %v4743_v12, %v5428_v51 }
 0x717   : > { %4824 = vst [vmem:[%s7206_s28 + $0x138] sm:$0xff] %v4774_v43 }
 0x71e   : > { %v4675_v55 = vpop.permute.xlu0 %4674 }
 0x71f   : > { %v4744_v61 = vsel %vm3612_vm1, %v5430_v29, %v4675_v55 }
 0x720   : > { %v4775_v21 = vsel %vm4754_vm3, %v4744_v61, %v5430_v29  ;;  %v4677_v23 = vpop.permute.xlu1 %4676 }
 0x721   : > { %4826 = vst [vmem:[%s7206_s28 + $0x148] sm:$0xff] %v4775_v21  ;;  %v4745_v33 = vsel %vm3612_vm1, %v5432_v39, %v4677_v23 }
 0x722   : > { %v4776_v40 = vsel %vm4754_vm3, %v4745_v33, %v5432_v39 }
 0x723   : > { %4828 = vst [vmem:[%s7206_s28 + $0x158] sm:$0xff] %v4776_v40 }
 0x72a   : > { %v4679_v24 = vpop.permute.xlu0 %4678 }
 0x72b   : > { %v4746_v13 = vsel %vm3612_vm1, %v5434_v19, %v4679_v24 }
 0x72c   : > { %v4777_v22 = vsel %vm4754_vm3, %v4746_v13, %v5434_v19  ;;  %v4681_v3 = vpop.permute.xlu1 %4680 }
 0x72d   : > { %4830 = vst [vmem:[%s7206_s28 + $0x168] sm:$0xff] %v4777_v22  ;;  %v4747_v26 = vsel %vm3612_vm1, %v5436_v11, %v4681_v3 }
 0x72e   : > { %v4778_v59 = vsel %vm4754_vm3, %v4747_v26, %v5436_v11 }
 0x72f   : > { %4832 = vst [vmem:[%s7206_s28 + $0x178] sm:$0xff] %v4778_v59 }
 0x736   : > { %v4683_v18 = vpop.permute.xlu0 %4682 }
 0x737   : > { %v4748_v47 = vsel %vm3612_vm1, %v5438_v9, %v4683_v18 }
 0x738   : > { %v4779_v20 = vsel %vm4754_vm3, %v4748_v47, %v5438_v9  ;;  %v4685_v53 = vpop.permute.xlu1 %4684 }
 0x739   : > { %4834 = vst [vmem:[%s7206_s28 + $0x188] sm:$0xff] %v4779_v20  ;;  %v4749_v62 = vsel %vm3612_vm1, %v5440_v63, %v4685_v53 }
 0x73a   : > { %v4780_v4 = vsel %vm4754_vm3, %v4749_v62, %v5440_v63 }
 0x73b   : > { %4836 = vst [vmem:[%s7206_s28 + $0x198] sm:$0xff] %v4780_v4 }
 0x742   : > { %v4687_v56 = vpop.permute.xlu0 %4686 }
 0x743   : > { %v4750_v31 = vsel %vm3612_vm1, %v5442_v30, %v4687_v56 }
 0x744   : > { %v4781_v37 = vsel %vm4754_vm3, %v4750_v31, %v5442_v30  ;;  %v4689_v17 = vpop.permute.xlu1 %4688 }
 0x745   : > { %4838 = vst [vmem:[%s7206_s28 + $0x1a8] sm:$0xff] %v4781_v37  ;;  %v4751_v34 = vsel %vm3612_vm1, %v5444_v49, %v4689_v17 }
 0x746   : > { %v4782_v15 = vsel %vm4754_vm3, %v4751_v34, %v5444_v49 }
 0x747   : > { %4840 = vst [vmem:[%s7206_s28 + $0x1b8] sm:$0xff] %v4782_v15 }
 0x74e   : > { %v4691_v8 = vpop.permute.xlu0 %4690 }
 0x74f   : > { %v4752_v25 = vsel %vm3612_vm1, %v5446_v5, %v4691_v8 }
 0x750   : > { %v4783_v36 = vsel %vm4754_vm3, %v4752_v25, %v5446_v5  ;;  %v4693_v50 = vpop.permute.xlu1 %4692 }
 0x751   : > { %4842 = vst [vmem:[%s7206_s28 + $0x1c8] sm:$0xff] %v4783_v36  ;;  %v4753_v46 = vsel %vm3612_vm1, %v5448_v10, %v4693_v50 }
 0x752   : > { %v4784_v0 = vsel %vm4754_vm3, %v4753_v46, %v5448_v10 }
 0x753   : > { %4844 = vst [vmem:[%s7206_s28 + $0x1d8] sm:$0xff] %v4784_v0 }
 0x754   : > { %6310 = shalt.err (!%p6307_p0)
}
 0x755   : > { %s6311_s28 = scalar_lea.hbm %s9686_s10, 7680  ;;  %s6315_s24 = scalar_lea.hbm %s9747_s5, 15360 }
 0x756   : > { %p6312_p4 = scmp.ne.s32.totalorder %s9686_s10, %s6311_s28  ;;  %p6316_p12 = scmp.lt.u32.totalorder %s9686_s10, %s9747_s5 }
 0x757   : > { %p6317_p1 = scmp.lt.u32.totalorder %s6315_s24, %s6311_s28  ;;  %p6319_p10 = scmp.lt.u32.totalorder %s6311_s28, %s9686_s10 }
 0x758   : > { %p6313_p13 = pnand %p6312_p4, %p6615_p5 }
 0x759   : > { %p6318_p11 = por %p6317_p1, %p6316_p12 }
 0x75a   : > { %p6314_p6 = pneg %p6313_p13 }
 0x75b   : > { %p6320_p3 = por %p6319_p10, %p6318_p11 }
 0x75d   : > { %p6321_p2 = pnand %p6320_p3, %p6314_p6 }
 0x75f   : > { %6324 = shalt.err (!%p6321_p2)
}
 0x760   : > { %s6408_s17 = smov 256  }
 0x761   : > { %5592 = dma.vmem_to_hbm [thread:$0]  (%p6615_p5), %s9690_s27, 7680, %s9686_s10, %s4846_s21, %s6408_s17, %s6408_s17, %s6405_s13  }
 0x762 PF: > { %s9953_s25 = sld [smem:[#allocation16_spill]]  ;;  %s4877_s9 = sand.u32 1, %s6367_s18  }
 0x763   : > { %p9955_p7 = scmp.ge.s32.totalorder %s6387_s23, 2  ;;  %s4878_s1 = scalar_lea.sflag [#allocation4], %s4877_s9 }
 0x768   : > { %p9954_p8 = scmp.ne.s32.totalorder %s9953_s25, 0 }
 0x76a   : > { %p5612_p9 = pnand %p9955_p7, %p9954_p8 }
 0x76c   : > { %6362 = dma.done.wait (!%p5612_p9), %s4878_s1, 7680  }
 0x76d   : > { %6364 = vsyncadd (!%p5612_p9), %s4878_s1, 4294959616  ;;  %s23_s23 = sadd.s32 1, %s6387_s23   ;;  %s9956_s18 = smov %s6371_s19 }
 0x76e   : > { %p20_p0 = scmp.ge.s32.totalorder %s23_s23, 4   ;;  %s9957_s19 = smov %s6375_s20 }
 0x76f   : > { %s9958_s20 = smov %s6627_s12  ;;  %s9959_s21 = smov %s6383_s22 }
 0x770   : > { %s9960_s22 = smov %s9962_s16  ;;  %22 = sbr.rel (!%p20_p0) target bundleno = 10 (0xa), region = 101 }
 0x777   :  { %4883 = vsyncpa [#allocation3], 1 }
 0x778   :  { %4885 = vsyncpa [#allocation3 + $0x1], 1 }
 0x779   :  { %4886 = vsyncpa [#allocation6], 1 }
 0x77a   :  { %4887 = vsyncpa [#allocation9], 1 }
 0x77b   :  { %4888 = vsyncpa [#allocation4], 1 }
 0x77c   :  { %4890 = vsyncpa [#allocation4 + $0x1], 1 }

</bundles_post_ra>
